<compile_context>
chip_gen: v7x
topology: tpu7x:2x2x1
jax: 0.10.0
libtpu: 0.0.40
codegen_flags: <defaults>
</compile_context>

<pallas_src>
import functools

import jax
import jax.numpy as jnp
from jax import lax
from jax.experimental import pallas as pl
from jax.experimental.pallas import tpu as pltpu


# ----------------------------------------------------------------------------
# Fused kernel: conv1+ReLU+pool1 -> conv2+ReLU+pool2 -> fc1+ReLU+fc2+softmax
# ----------------------------------------------------------------------------
def _cnn_fused_kernel(x_ref, w1_ref, b1_ref, w2_ref, b2_ref,
                      fw1_ref, fb1_ref, fw2_ref, fb2_ref, out_ref,
                      c1_ref, a1p_ref, c2_ref, feat_ref, *, n):
    """Per-image refs (grid over batch):
       x_ref   : (npd*npd, 1)   zero-padded input, flattened row-major
       w1_ref  : (9, 32)        conv1 taps, row k = dh*3 + dw
       b1_ref  : (1, 32)
       w2_ref  : (288, 64)      conv2 im2col weights, row = k*32 + cin
       b2_ref  : (1, 64)
       fw1_ref : (F, 256)       fc1 weights, rows pre-permuted CHW -> HWC
       fb1_ref : (1, 256)
       fw2_ref : (256, 2)
       fb2_ref : (1, 2)
       out_ref : (1, 2)         softmax probabilities
       scratch : c1 (m1,32), a1p (n1p*n1p,32), c2 (m2,64), feat (1,F)
    """
    npd = n + 2                    # padded conv1 input width == flat row stride
    n1 = n // 2                    # spatial size after pool1
    n1p = n1 + 2                   # padded conv2 input width == flat row stride
    n2 = n // 4                    # spatial size after pool2
    m1 = (n - 1) * npd + n         # conv1 output rows (r = h*npd + w)
    m2 = (n1 - 1) * n1p + n1       # conv2 output rows (r = h*n1p + w)
    f32 = jnp.float32

    # ---- conv1 (Cin=1) + bias + ReLU: whole-plane accumulation -------------
    # Output row r = h*npd + w; tap (dh, dw) of the padded input is the
    # constant-offset slice x_flat[r + dh*npd + dw]  (rows with w >= n are
    # harmless "junk" rows that keep every tap a constant shift).
    acc1 = jnp.zeros((m1, 32), f32)
    for dh in range(3):
        for dw in range(3):
            k = dh * 3 + dw
            col = x_ref[pl.ds(dh * npd + dw, m1), :]          # (m1, 1)
            acc1 = acc1 + col * w1_ref[k:k + 1, :]            # (m1,1)*(1,32)
    c1_ref[...] = jnp.maximum(acc1 + b1_ref[...], 0.0)        # (m1, 32)

    # ---- pool1 (2x2/2) -> zero-padded flat conv2 input ---------------------
    a1p_ref[...] = jnp.zeros_like(a1p_ref)                    # pad ring = 0
    for hp in range(n1):
        r0 = 2 * hp * npd
        blk = jnp.maximum(
            jnp.maximum(c1_ref[pl.ds(r0,           n1, stride=2), :],
                        c1_ref[pl.ds(r0 + 1,       n1, stride=2), :]),
            jnp.maximum(c1_ref[pl.ds(r0 + npd,     n1, stride=2), :],
                        c1_ref[pl.ds(r0 + npd + 1, n1, stride=2), :]))
        a1p_ref[pl.ds((hp + 1) * n1p + 1, n1), :] = blk       # pad interior

    # ---- conv2: single im2col MXU matmul (m2, 9*32) x (9*32, 64) -----------
    p2 = jnp.concatenate(
        [a1p_ref[pl.ds(dh * n1p + dw, m2), :]
         for dh in range(3) for dw in range(3)], axis=1)      # (m2, 288)
    a2 = jnp.dot(p2, w2_ref[...], preferred_element_type=f32) + b2_ref[...]
    c2_ref[...] = jnp.maximum(a2, 0.0)                        # (m2, 64)

    # ---- pool2 + flatten (HWC order; fc1 rows were pre-permuted) -----------
    for hp in range(n2):
        r0 = 2 * hp * n1p
        blk = jnp.maximum(
            jnp.maximum(c2_ref[pl.ds(r0,            n2, stride=2), :],
                        c2_ref[pl.ds(r0 + 1,        n2, stride=2), :]),
            jnp.maximum(c2_ref[pl.ds(r0 + n1p,      n2, stride=2), :],
                        c2_ref[pl.ds(r0 + n1p + 1,  n2, stride=2), :]))
        for wp in range(n2):
            feat_ref[:, pl.ds((hp * n2 + wp) * 64, 64)] = blk[wp:wp + 1, :]

    # ---- fc1 + ReLU + fc2 + softmax ----------------------------------------
    # (For bit-closer parity with PyTorch f32, precision=lax.Precision.HIGHEST
    #  could be passed to the dots; default MXU precision is used here.)
    h = jnp.dot(feat_ref[...], fw1_ref[...], preferred_element_type=f32)
    h = jnp.maximum(h + fb1_ref[...], 0.0)                    # (1, 256)
    logits = jnp.dot(h, fw2_ref[...],
                     preferred_element_type=f32) + fb2_ref[...]   # (1, 2)
    mx = jnp.max(logits, axis=-1, keepdims=True)
    e = jnp.exp(logits - mx)
    out_ref[...] = (e / jnp.sum(e, axis=-1, keepdims=True)).astype(out_ref.dtype)


# ----------------------------------------------------------------------------
# Wrapper: one pallas_call for the whole network
# ----------------------------------------------------------------------------
def cnn_forward(x, packed, *, n):
    x = x.reshape(-1, n, n)                # mirrors x.view(-1, 1, n, n); Cin==1
    B = x.shape[0]
    npd, n1, n2 = n + 2, n // 2, n // 4
    n1p = n1 + 2
    m1 = (n - 1) * npd + n
    m2 = (n1 - 1) * n1p + n1
    F = 64 * n2 * n2

    # Single tiny XLA op on the raw input: zero "same" padding, stored flat so
    # every 3x3 tap is a constant offset inside the kernel.
    xpf = jnp.pad(x, ((0, 0), (1, 1), (1, 1))).reshape(B, npd * npd, 1)

    kernel = functools.partial(_cnn_fused_kernel, n=n)
    out = pl.pallas_call(
        kernel,
        out_shape=jax.ShapeDtypeStruct((B, 1, 2), jnp.float32),
        grid=(B,),
        in_specs=[
            pl.BlockSpec((None, npd * npd, 1), lambda b: (b, 0, 0)),   # x
            pl.BlockSpec((9, 32), lambda b: (0, 0)),                   # w1
            pl.BlockSpec((1, 32), lambda b: (0, 0)),                   # b1
            pl.BlockSpec((9 * 32, 64), lambda b: (0, 0)),              # w2
            pl.BlockSpec((1, 64), lambda b: (0, 0)),                   # b2
            pl.BlockSpec((F, 256), lambda b: (0, 0)),                  # fw1
            pl.BlockSpec((1, 256), lambda b: (0, 0)),                  # fb1
            pl.BlockSpec((256, 2), lambda b: (0, 0)),                  # fw2
            pl.BlockSpec((1, 2), lambda b: (0, 0)),                    # fb2
        ],
        out_specs=pl.BlockSpec((None, 1, 2), lambda b: (b, 0, 0)),
        scratch_shapes=[
            pltpu.VMEM((m1, 32), jnp.float32),          # conv1+ReLU output
            pltpu.VMEM((n1p * n1p, 32), jnp.float32),   # pooled, padded, flat
            pltpu.VMEM((m2, 64), jnp.float32),          # conv2+ReLU output
            pltpu.VMEM((1, F), jnp.float32),            # flattened features
        ],
        compiler_params=pltpu.CompilerParams(
            dimension_semantics=("parallel",)),
    )(xpf, packed["w1f"], packed["b1"], packed["w2f"], packed["b2"],
      packed["fw1p"], packed["fb1"], packed["fw2"], packed["fb2"])
    return out.reshape(B, 2)


# ----------------------------------------------------------------------------
# Parameters (PyTorch-equivalent layout) + one-time packing for the kernel
# ----------------------------------------------------------------------------
def init_params(n, key):
    ks = jax.random.split(key, 6)
    F = 64 * n * n // 16
    return {
        "w1": jax.random.normal(ks[0], (9, 1, 32), jnp.float32) / 3.0,
        "b1": jax.random.normal(ks[1], (1, 32), jnp.float32) * 0.01,
        "w2": jax.random.normal(ks[2], (9, 32, 64), jnp.float32) / jnp.sqrt(9.0 * 32.0),
        "b2": jax.random.normal(ks[3], (1, 64), jnp.float32) * 0.01,
        "fw1": jax.random.normal(ks[4], (F, 256), jnp.float32) / jnp.sqrt(float(F)),
        "fb1": jnp.zeros((1, 256), jnp.float32),
        "fw2": jax.random.normal(ks[5], (256, 2), jnp.float32) / 16.0,
        "fb2": jnp.zeros((1, 2), jnp.float32),
    }


def pack_params(params, *, n):
    """One-time re-layout of the weights for the fused kernel."""
    n2 = n // 4
    F = 64 * n2 * n2
    return {
        "w1f": params["w1"].reshape(9, 32),            # (9*Cin, Cout), Cin=1
        "b1": params["b1"],
        "w2f": params["w2"].reshape(9 * 32, 64),       # row = k*32 + cin
        "b2": params["b2"],
        # permute fc1 rows CHW -> HWC so the in-kernel flatten needs no transpose
        "fw1p": params["fw1"].reshape(64, n2, n2, 256)
                             .transpose(1, 2, 0, 3).reshape(F, 256),
        "fb1": params["fb1"],
        "fw2": params["fw2"],
        "fb2": params["fb2"],
    }


# ----------------------------------------------------------------------------
# Pure-JAX reference for a correctness sanity check
# ----------------------------------------------------------------------------
def reference_forward(x_nchw, params, *, n):
    B = x_nchw.shape[0]
    x = x_nchw.reshape(B, 1, n, n)

    def conv(y, w_taps, b, Cout):
        Cin = w_taps.shape[1]
        w_oihw = jnp.transpose(w_taps.reshape(3, 3, Cin, Cout), (3, 2, 0, 1))
        z = lax.conv_general_dilated(
            y, w_oihw, (1, 1), ((1, 1), (1, 1)),
            dimension_numbers=("NCHW", "OIHW", "NCHW"))
        return jnp.maximum(z + b.reshape(1, Cout, 1, 1), 0.0)

    def pool(y):
        return lax.reduce_window(y, -jnp.inf, lax.max,
                                 (1, 1, 2, 2), (1, 1, 2, 2), "VALID")

    y = pool(conv(x, params["w1"], params["b1"], 32))
    y = pool(conv(y, params["w2"], params["b2"], 64))
    f = y.reshape(B, -1)
    h = jnp.maximum(f @ params["fw1"] + params["fb1"], 0.0)
    logits = h @ params["fw2"] + params["fb2"]
    return jax.nn.softmax(logits, axis=-1)


if __name__ == "__main__":
    n = 16
    key = jax.random.PRNGKey(0)
    k_x, k_p = jax.random.split(key)
    x = jax.random.normal(k_x, (2, 1, n, n), jnp.float32)   # batch=2, NCHW
    params = init_params(n, k_p)
    packed = pack_params(params, n=n)                       # done once

    fwd = jax.jit(functools.partial(cnn_forward, n=n))
    out = jax.block_until_ready(fwd(x, packed))

    ref = reference_forward(x, params, n=n)
    assert out.shape == (2, 2)
    assert bool(jnp.allclose(jnp.sum(out, axis=-1), 1.0, atol=1e-5))
    assert bool(jnp.allclose(out, ref, atol=1e-2)), (out, ref)
    print("KERNEL_OK")
</pallas_src>

<mosaic_0001>
module attributes {stable_mosaic.version = 11 : i64} {
  func.func @_cnn_fused_kernel(%arg0: i32, %arg1: memref<1x324x1xf32, #tpu.memory_space<vmem>>, %arg2: memref<9x32xf32, #tpu.memory_space<vmem>>, %arg3: memref<1x32xf32, #tpu.memory_space<vmem>>, %arg4: memref<288x64xf32, #tpu.memory_space<vmem>>, %arg5: memref<1x64xf32, #tpu.memory_space<vmem>>, %arg6: memref<1024x256xf32, #tpu.memory_space<vmem>>, %arg7: memref<1x256xf32, #tpu.memory_space<vmem>>, %arg8: memref<256x2xf32, #tpu.memory_space<vmem>>, %arg9: memref<1x2xf32, #tpu.memory_space<vmem>>, %arg10: memref<1x1x2xf32, #tpu.memory_space<vmem>>, %arg11: memref<286x32xf32, #tpu.memory_space<vmem>>, %arg12: memref<100x32xf32, #tpu.memory_space<vmem>>, %arg13: memref<78x64xf32, #tpu.memory_space<vmem>>, %arg14: memref<1x1024xf32, #tpu.memory_space<vmem>>) attributes {dimension_semantics = [#tpu.dimension_semantics<parallel>], iteration_bounds = array<i64: 2>, scalar_prefetch = 0 : i64, scratch_operands = 4 : i64, tpu.core_type = #tpu.core_type<tc>, window_params = [{transform_indices = @transform_0, window_bounds = array<i64: 1, 324, 1>}, {pipeline_mode = #tpu.pipeline_mode<synchronous>, transform_indices = @transform_1, window_bounds = array<i64: 9, 32>}, {pipeline_mode = #tpu.pipeline_mode<synchronous>, transform_indices = @transform_2, window_bounds = array<i64: 1, 32>}, {pipeline_mode = #tpu.pipeline_mode<synchronous>, transform_indices = @transform_3, window_bounds = array<i64: 288, 64>}, {pipeline_mode = #tpu.pipeline_mode<synchronous>, transform_indices = @transform_4, window_bounds = array<i64: 1, 64>}, {pipeline_mode = #tpu.pipeline_mode<synchronous>, transform_indices = @transform_5, window_bounds = array<i64: 1024, 256>}, {pipeline_mode = #tpu.pipeline_mode<synchronous>, transform_indices = @transform_6, window_bounds = array<i64: 1, 256>}, {pipeline_mode = #tpu.pipeline_mode<synchronous>, transform_indices = @transform_7, window_bounds = array<i64: 256, 2>}, {pipeline_mode = #tpu.pipeline_mode<synchronous>, transform_indices = @transform_8, window_bounds = array<i64: 1, 2>}, {transform_indices = @transform_9, window_bounds = array<i64: 1, 1, 2>}]} {
    %cst = arith.constant 0.000000e+00 : f32
    %0 = vector.broadcast %cst : f32 to vector<286x32xf32>
    %c0 = arith.constant 0 : index
    %c0_0 = arith.constant 0 : index
    %c0_1 = arith.constant 0 : index
    %1 = vector.load %arg1[%c0, %c0_0, %c0_1] : memref<1x324x1xf32, #tpu.memory_space<vmem>>, vector<1x286x1xf32>
    %2 = vector.shape_cast %1 : vector<1x286x1xf32> to vector<286x1xf32>
    %c0_2 = arith.constant 0 : index
    %c0_3 = arith.constant 0 : index
    %3 = vector.load %arg2[%c0_2, %c0_3] : memref<9x32xf32, #tpu.memory_space<vmem>>, vector<1x32xf32>
    %4 = vector.broadcast %2 : vector<286x1xf32> to vector<286x32xf32>
    %5 = vector.broadcast %3 : vector<1x32xf32> to vector<286x32xf32>
    %6 = arith.mulf %4, %5 : vector<286x32xf32>
    %7 = arith.addf %0, %6 : vector<286x32xf32>
    %c0_4 = arith.constant 0 : index
    %c1 = arith.constant 1 : index
    %c0_5 = arith.constant 0 : index
    %8 = vector.load %arg1[%c0_4, %c1, %c0_5] : memref<1x324x1xf32, #tpu.memory_space<vmem>>, vector<1x286x1xf32>
    %9 = vector.shape_cast %8 : vector<1x286x1xf32> to vector<286x1xf32>
    %c1_6 = arith.constant 1 : index
    %c0_7 = arith.constant 0 : index
    %10 = vector.load %arg2[%c1_6, %c0_7] : memref<9x32xf32, #tpu.memory_space<vmem>>, vector<1x32xf32>
    %11 = vector.broadcast %9 : vector<286x1xf32> to vector<286x32xf32>
    %12 = vector.broadcast %10 : vector<1x32xf32> to vector<286x32xf32>
    %13 = arith.mulf %11, %12 : vector<286x32xf32>
    %14 = arith.addf %7, %13 : vector<286x32xf32>
    %c0_8 = arith.constant 0 : index
    %c2 = arith.constant 2 : index
    %c0_9 = arith.constant 0 : index
    %15 = vector.load %arg1[%c0_8, %c2, %c0_9] : memref<1x324x1xf32, #tpu.memory_space<vmem>>, vector<1x286x1xf32>
    %16 = vector.shape_cast %15 : vector<1x286x1xf32> to vector<286x1xf32>
    %c2_10 = arith.constant 2 : index
    %c0_11 = arith.constant 0 : index
    %17 = vector.load %arg2[%c2_10, %c0_11] : memref<9x32xf32, #tpu.memory_space<vmem>>, vector<1x32xf32>
    %18 = vector.broadcast %16 : vector<286x1xf32> to vector<286x32xf32>
    %19 = vector.broadcast %17 : vector<1x32xf32> to vector<286x32xf32>
    %20 = arith.mulf %18, %19 : vector<286x32xf32>
    %21 = arith.addf %14, %20 : vector<286x32xf32>
    %c0_12 = arith.constant 0 : index
    %c18 = arith.constant 18 : index
    %c0_13 = arith.constant 0 : index
    %22 = vector.load %arg1[%c0_12, %c18, %c0_13] : memref<1x324x1xf32, #tpu.memory_space<vmem>>, vector<1x286x1xf32>
    %23 = vector.shape_cast %22 : vector<1x286x1xf32> to vector<286x1xf32>
    %c3 = arith.constant 3 : index
    %c0_14 = arith.constant 0 : index
    %24 = vector.load %arg2[%c3, %c0_14] : memref<9x32xf32, #tpu.memory_space<vmem>>, vector<1x32xf32>
    %25 = vector.broadcast %23 : vector<286x1xf32> to vector<286x32xf32>
    %26 = vector.broadcast %24 : vector<1x32xf32> to vector<286x32xf32>
    %27 = arith.mulf %25, %26 : vector<286x32xf32>
    %28 = arith.addf %21, %27 : vector<286x32xf32>
    %c0_15 = arith.constant 0 : index
    %c19 = arith.constant 19 : index
    %c0_16 = arith.constant 0 : index
    %29 = vector.load %arg1[%c0_15, %c19, %c0_16] : memref<1x324x1xf32, #tpu.memory_space<vmem>>, vector<1x286x1xf32>
    %30 = vector.shape_cast %29 : vector<1x286x1xf32> to vector<286x1xf32>
    %c4 = arith.constant 4 : index
    %c0_17 = arith.constant 0 : index
    %31 = vector.load %arg2[%c4, %c0_17] : memref<9x32xf32, #tpu.memory_space<vmem>>, vector<1x32xf32>
    %32 = vector.broadcast %30 : vector<286x1xf32> to vector<286x32xf32>
    %33 = vector.broadcast %31 : vector<1x32xf32> to vector<286x32xf32>
    %34 = arith.mulf %32, %33 : vector<286x32xf32>
    %35 = arith.addf %28, %34 : vector<286x32xf32>
    %c0_18 = arith.constant 0 : index
    %c20 = arith.constant 20 : index
    %c0_19 = arith.constant 0 : index
    %36 = vector.load %arg1[%c0_18, %c20, %c0_19] : memref<1x324x1xf32, #tpu.memory_space<vmem>>, vector<1x286x1xf32>
    %37 = vector.shape_cast %36 : vector<1x286x1xf32> to vector<286x1xf32>
    %c5 = arith.constant 5 : index
    %c0_20 = arith.constant 0 : index
    %38 = vector.load %arg2[%c5, %c0_20] : memref<9x32xf32, #tpu.memory_space<vmem>>, vector<1x32xf32>
    %39 = vector.broadcast %37 : vector<286x1xf32> to vector<286x32xf32>
    %40 = vector.broadcast %38 : vector<1x32xf32> to vector<286x32xf32>
    %41 = arith.mulf %39, %40 : vector<286x32xf32>
    %42 = arith.addf %35, %41 : vector<286x32xf32>
    %c0_21 = arith.constant 0 : index
    %c36 = arith.constant 36 : index
    %c0_22 = arith.constant 0 : index
    %43 = vector.load %arg1[%c0_21, %c36, %c0_22] : memref<1x324x1xf32, #tpu.memory_space<vmem>>, vector<1x286x1xf32>
    %44 = vector.shape_cast %43 : vector<1x286x1xf32> to vector<286x1xf32>
    %c6 = arith.constant 6 : index
    %c0_23 = arith.constant 0 : index
    %45 = vector.load %arg2[%c6, %c0_23] : memref<9x32xf32, #tpu.memory_space<vmem>>, vector<1x32xf32>
    %46 = vector.broadcast %44 : vector<286x1xf32> to vector<286x32xf32>
    %47 = vector.broadcast %45 : vector<1x32xf32> to vector<286x32xf32>
    %48 = arith.mulf %46, %47 : vector<286x32xf32>
    %49 = arith.addf %42, %48 : vector<286x32xf32>
    %c0_24 = arith.constant 0 : index
    %c37 = arith.constant 37 : index
    %c0_25 = arith.constant 0 : index
    %50 = vector.load %arg1[%c0_24, %c37, %c0_25] : memref<1x324x1xf32, #tpu.memory_space<vmem>>, vector<1x286x1xf32>
    %51 = vector.shape_cast %50 : vector<1x286x1xf32> to vector<286x1xf32>
    %c7 = arith.constant 7 : index
    %c0_26 = arith.constant 0 : index
    %52 = vector.load %arg2[%c7, %c0_26] : memref<9x32xf32, #tpu.memory_space<vmem>>, vector<1x32xf32>
    %53 = vector.broadcast %51 : vector<286x1xf32> to vector<286x32xf32>
    %54 = vector.broadcast %52 : vector<1x32xf32> to vector<286x32xf32>
    %55 = arith.mulf %53, %54 : vector<286x32xf32>
    %56 = arith.addf %49, %55 : vector<286x32xf32>
    %c0_27 = arith.constant 0 : index
    %c38 = arith.constant 38 : index
    %c0_28 = arith.constant 0 : index
    %57 = vector.load %arg1[%c0_27, %c38, %c0_28] : memref<1x324x1xf32, #tpu.memory_space<vmem>>, vector<1x286x1xf32>
    %58 = vector.shape_cast %57 : vector<1x286x1xf32> to vector<286x1xf32>
    %c8 = arith.constant 8 : index
    %c0_29 = arith.constant 0 : index
    %59 = vector.load %arg2[%c8, %c0_29] : memref<9x32xf32, #tpu.memory_space<vmem>>, vector<1x32xf32>
    %60 = vector.broadcast %58 : vector<286x1xf32> to vector<286x32xf32>
    %61 = vector.broadcast %59 : vector<1x32xf32> to vector<286x32xf32>
    %62 = arith.mulf %60, %61 : vector<286x32xf32>
    %63 = arith.addf %56, %62 : vector<286x32xf32>
    %c0_30 = arith.constant 0 : index
    %c0_31 = arith.constant 0 : index
    %64 = vector.load %arg3[%c0_30, %c0_31] : memref<1x32xf32, #tpu.memory_space<vmem>>, vector<1x32xf32>
    %65 = vector.broadcast %64 : vector<1x32xf32> to vector<286x32xf32>
    %66 = arith.addf %63, %65 : vector<286x32xf32>
    %cst_32 = arith.constant 0.000000e+00 : f32
    %67 = vector.broadcast %cst_32 : f32 to vector<286x32xf32>
    %68 = arith.maximumf %66, %67 : vector<286x32xf32>
    %c0_33 = arith.constant 0 : index
    %c0_34 = arith.constant 0 : index
    %69 = vector.load %arg11[%c0_33, %c0_34] : memref<286x32xf32, #tpu.memory_space<vmem>>, vector<286x32xf32>
    tpu.vector_store %arg11[%c0_33, %c0_34], %68 {strides = array<i32>} : memref<286x32xf32, #tpu.memory_space<vmem>>, vector<286x32xf32>,
    %cst_35 = arith.constant 0.000000e+00 : f32
    %70 = vector.broadcast %cst_35 : f32 to vector<100x32xf32>
    %c0_36 = arith.constant 0 : index
    %c0_37 = arith.constant 0 : index
    %71 = vector.load %arg12[%c0_36, %c0_37] : memref<100x32xf32, #tpu.memory_space<vmem>>, vector<100x32xf32>
    tpu.vector_store %arg12[%c0_36, %c0_37], %70 {strides = array<i32>} : memref<100x32xf32, #tpu.memory_space<vmem>>, vector<100x32xf32>,
    %c0_38 = arith.constant 0 : index
    %c0_39 = arith.constant 0 : index
    %72 = tpu.strided_load %arg11[%c0_38, %c0_39] {strides = array<i32: 2, 1>} : memref<286x32xf32, #tpu.memory_space<vmem>>, vector<8x32xf32>
    %c1_40 = arith.constant 1 : index
    %c0_41 = arith.constant 0 : index
    %73 = tpu.strided_load %arg11[%c1_40, %c0_41] {strides = array<i32: 2, 1>} : memref<286x32xf32, #tpu.memory_space<vmem>>, vector<8x32xf32>
    %74 = arith.maximumf %72, %73 : vector<8x32xf32>
    %c18_42 = arith.constant 18 : index
    %c0_43 = arith.constant 0 : index
    %75 = tpu.strided_load %arg11[%c18_42, %c0_43] {strides = array<i32: 2, 1>} : memref<286x32xf32, #tpu.memory_space<vmem>>, vector<8x32xf32>
    %c19_44 = arith.constant 19 : index
    %c0_45 = arith.constant 0 : index
    %76 = tpu.strided_load %arg11[%c19_44, %c0_45] {strides = array<i32: 2, 1>} : memref<286x32xf32, #tpu.memory_space<vmem>>, vector<8x32xf32>
    %77 = arith.maximumf %75, %76 : vector<8x32xf32>
    %78 = arith.maximumf %74, %77 : vector<8x32xf32>
    %c11 = arith.constant 11 : index
    %c0_46 = arith.constant 0 : index
    %79 = vector.load %arg12[%c11, %c0_46] : memref<100x32xf32, #tpu.memory_space<vmem>>, vector<8x32xf32>
    tpu.vector_store %arg12[%c11, %c0_46], %78 {strides = array<i32>} : memref<100x32xf32, #tpu.memory_space<vmem>>, vector<8x32xf32>,
    %c36_47 = arith.constant 36 : index
    %c0_48 = arith.constant 0 : index
    %80 = tpu.strided_load %arg11[%c36_47, %c0_48] {strides = array<i32: 2, 1>} : memref<286x32xf32, #tpu.memory_space<vmem>>, vector<8x32xf32>
    %c37_49 = arith.constant 37 : index
    %c0_50 = arith.constant 0 : index
    %81 = tpu.strided_load %arg11[%c37_49, %c0_50] {strides = array<i32: 2, 1>} : memref<286x32xf32, #tpu.memory_space<vmem>>, vector<8x32xf32>
    %82 = arith.maximumf %80, %81 : vector<8x32xf32>
    %c54 = arith.constant 54 : index
    %c0_51 = arith.constant 0 : index
    %83 = tpu.strided_load %arg11[%c54, %c0_51] {strides = array<i32: 2, 1>} : memref<286x32xf32, #tpu.memory_space<vmem>>, vector<8x32xf32>
    %c55 = arith.constant 55 : index
    %c0_52 = arith.constant 0 : index
    %84 = tpu.strided_load %arg11[%c55, %c0_52] {strides = array<i32: 2, 1>} : memref<286x32xf32, #tpu.memory_space<vmem>>, vector<8x32xf32>
    %85 = arith.maximumf %83, %84 : vector<8x32xf32>
    %86 = arith.maximumf %82, %85 : vector<8x32xf32>
    %c21 = arith.constant 21 : index
    %c0_53 = arith.constant 0 : index
    %87 = vector.load %arg12[%c21, %c0_53] : memref<100x32xf32, #tpu.memory_space<vmem>>, vector<8x32xf32>
    tpu.vector_store %arg12[%c21, %c0_53], %86 {strides = array<i32>} : memref<100x32xf32, #tpu.memory_space<vmem>>, vector<8x32xf32>,
    %c72 = arith.constant 72 : index
    %c0_54 = arith.constant 0 : index
    %88 = tpu.strided_load %arg11[%c72, %c0_54] {strides = array<i32: 2, 1>} : memref<286x32xf32, #tpu.memory_space<vmem>>, vector<8x32xf32>
    %c73 = arith.constant 73 : index
    %c0_55 = arith.constant 0 : index
    %89 = tpu.strided_load %arg11[%c73, %c0_55] {strides = array<i32: 2, 1>} : memref<286x32xf32, #tpu.memory_space<vmem>>, vector<8x32xf32>
    %90 = arith.maximumf %88, %89 : vector<8x32xf32>
    %c90 = arith.constant 90 : index
    %c0_56 = arith.constant 0 : index
    %91 = tpu.strided_load %arg11[%c90, %c0_56] {strides = array<i32: 2, 1>} : memref<286x32xf32, #tpu.memory_space<vmem>>, vector<8x32xf32>
    %c91 = arith.constant 91 : index
    %c0_57 = arith.constant 0 : index
    %92 = tpu.strided_load %arg11[%c91, %c0_57] {strides = array<i32: 2, 1>} : memref<286x32xf32, #tpu.memory_space<vmem>>, vector<8x32xf32>
    %93 = arith.maximumf %91, %92 : vector<8x32xf32>
    %94 = arith.maximumf %90, %93 : vector<8x32xf32>
    %c31 = arith.constant 31 : index
    %c0_58 = arith.constant 0 : index
    %95 = vector.load %arg12[%c31, %c0_58] : memref<100x32xf32, #tpu.memory_space<vmem>>, vector<8x32xf32>
    tpu.vector_store %arg12[%c31, %c0_58], %94 {strides = array<i32>} : memref<100x32xf32, #tpu.memory_space<vmem>>, vector<8x32xf32>,
    %c108 = arith.constant 108 : index
    %c0_59 = arith.constant 0 : index
    %96 = tpu.strided_load %arg11[%c108, %c0_59] {strides = array<i32: 2, 1>} : memref<286x32xf32, #tpu.memory_space<vmem>>, vector<8x32xf32>
    %c109 = arith.constant 109 : index
    %c0_60 = arith.constant 0 : index
    %97 = tpu.strided_load %arg11[%c109, %c0_60] {strides = array<i32: 2, 1>} : memref<286x32xf32, #tpu.memory_space<vmem>>, vector<8x32xf32>
    %98 = arith.maximumf %96, %97 : vector<8x32xf32>
    %c126 = arith.constant 126 : index
    %c0_61 = arith.constant 0 : index
    %99 = tpu.strided_load %arg11[%c126, %c0_61] {strides = array<i32: 2, 1>} : memref<286x32xf32, #tpu.memory_space<vmem>>, vector<8x32xf32>
    %c127 = arith.constant 127 : index
    %c0_62 = arith.constant 0 : index
    %100 = tpu.strided_load %arg11[%c127, %c0_62] {strides = array<i32: 2, 1>} : memref<286x32xf32, #tpu.memory_space<vmem>>, vector<8x32xf32>
    %101 = arith.maximumf %99, %100 : vector<8x32xf32>
    %102 = arith.maximumf %98, %101 : vector<8x32xf32>
    %c41 = arith.constant 41 : index
    %c0_63 = arith.constant 0 : index
    %103 = vector.load %arg12[%c41, %c0_63] : memref<100x32xf32, #tpu.memory_space<vmem>>, vector<8x32xf32>
    tpu.vector_store %arg12[%c41, %c0_63], %102 {strides = array<i32>} : memref<100x32xf32, #tpu.memory_space<vmem>>, vector<8x32xf32>,
    %c144 = arith.constant 144 : index
    %c0_64 = arith.constant 0 : index
    %104 = tpu.strided_load %arg11[%c144, %c0_64] {strides = array<i32: 2, 1>} : memref<286x32xf32, #tpu.memory_space<vmem>>, vector<8x32xf32>
    %c145 = arith.constant 145 : index
    %c0_65 = arith.constant 0 : index
    %105 = tpu.strided_load %arg11[%c145, %c0_65] {strides = array<i32: 2, 1>} : memref<286x32xf32, #tpu.memory_space<vmem>>, vector<8x32xf32>
    %106 = arith.maximumf %104, %105 : vector<8x32xf32>
    %c162 = arith.constant 162 : index
    %c0_66 = arith.constant 0 : index
    %107 = tpu.strided_load %arg11[%c162, %c0_66] {strides = array<i32: 2, 1>} : memref<286x32xf32, #tpu.memory_space<vmem>>, vector<8x32xf32>
    %c163 = arith.constant 163 : index
    %c0_67 = arith.constant 0 : index
    %108 = tpu.strided_load %arg11[%c163, %c0_67] {strides = array<i32: 2, 1>} : memref<286x32xf32, #tpu.memory_space<vmem>>, vector<8x32xf32>
    %109 = arith.maximumf %107, %108 : vector<8x32xf32>
    %110 = arith.maximumf %106, %109 : vector<8x32xf32>
    %c51 = arith.constant 51 : index
    %c0_68 = arith.constant 0 : index
    %111 = vector.load %arg12[%c51, %c0_68] : memref<100x32xf32, #tpu.memory_space<vmem>>, vector<8x32xf32>
    tpu.vector_store %arg12[%c51, %c0_68], %110 {strides = array<i32>} : memref<100x32xf32, #tpu.memory_space<vmem>>, vector<8x32xf32>,
    %c180 = arith.constant 180 : index
    %c0_69 = arith.constant 0 : index
    %112 = tpu.strided_load %arg11[%c180, %c0_69] {strides = array<i32: 2, 1>} : memref<286x32xf32, #tpu.memory_space<vmem>>, vector<8x32xf32>
    %c181 = arith.constant 181 : index
    %c0_70 = arith.constant 0 : index
    %113 = tpu.strided_load %arg11[%c181, %c0_70] {strides = array<i32: 2, 1>} : memref<286x32xf32, #tpu.memory_space<vmem>>, vector<8x32xf32>
    %114 = arith.maximumf %112, %113 : vector<8x32xf32>
    %c198 = arith.constant 198 : index
    %c0_71 = arith.constant 0 : index
    %115 = tpu.strided_load %arg11[%c198, %c0_71] {strides = array<i32: 2, 1>} : memref<286x32xf32, #tpu.memory_space<vmem>>, vector<8x32xf32>
    %c199 = arith.constant 199 : index
    %c0_72 = arith.constant 0 : index
    %116 = tpu.strided_load %arg11[%c199, %c0_72] {strides = array<i32: 2, 1>} : memref<286x32xf32, #tpu.memory_space<vmem>>, vector<8x32xf32>
    %117 = arith.maximumf %115, %116 : vector<8x32xf32>
    %118 = arith.maximumf %114, %117 : vector<8x32xf32>
    %c61 = arith.constant 61 : index
    %c0_73 = arith.constant 0 : index
    %119 = vector.load %arg12[%c61, %c0_73] : memref<100x32xf32, #tpu.memory_space<vmem>>, vector<8x32xf32>
    tpu.vector_store %arg12[%c61, %c0_73], %118 {strides = array<i32>} : memref<100x32xf32, #tpu.memory_space<vmem>>, vector<8x32xf32>,
    %c216 = arith.constant 216 : index
    %c0_74 = arith.constant 0 : index
    %120 = tpu.strided_load %arg11[%c216, %c0_74] {strides = array<i32: 2, 1>} : memref<286x32xf32, #tpu.memory_space<vmem>>, vector<8x32xf32>
    %c217 = arith.constant 217 : index
    %c0_75 = arith.constant 0 : index
    %121 = tpu.strided_load %arg11[%c217, %c0_75] {strides = array<i32: 2, 1>} : memref<286x32xf32, #tpu.memory_space<vmem>>, vector<8x32xf32>
    %122 = arith.maximumf %120, %121 : vector<8x32xf32>
    %c234 = arith.constant 234 : index
    %c0_76 = arith.constant 0 : index
    %123 = tpu.strided_load %arg11[%c234, %c0_76] {strides = array<i32: 2, 1>} : memref<286x32xf32, #tpu.memory_space<vmem>>, vector<8x32xf32>
    %c235 = arith.constant 235 : index
    %c0_77 = arith.constant 0 : index
    %124 = tpu.strided_load %arg11[%c235, %c0_77] {strides = array<i32: 2, 1>} : memref<286x32xf32, #tpu.memory_space<vmem>>, vector<8x32xf32>
    %125 = arith.maximumf %123, %124 : vector<8x32xf32>
    %126 = arith.maximumf %122, %125 : vector<8x32xf32>
    %c71 = arith.constant 71 : index
    %c0_78 = arith.constant 0 : index
    %127 = vector.load %arg12[%c71, %c0_78] : memref<100x32xf32, #tpu.memory_space<vmem>>, vector<8x32xf32>
    tpu.vector_store %arg12[%c71, %c0_78], %126 {strides = array<i32>} : memref<100x32xf32, #tpu.memory_space<vmem>>, vector<8x32xf32>,
    %c252 = arith.constant 252 : index
    %c0_79 = arith.constant 0 : index
    %128 = tpu.strided_load %arg11[%c252, %c0_79] {strides = array<i32: 2, 1>} : memref<286x32xf32, #tpu.memory_space<vmem>>, vector<8x32xf32>
    %c253 = arith.constant 253 : index
    %c0_80 = arith.constant 0 : index
    %129 = tpu.strided_load %arg11[%c253, %c0_80] {strides = array<i32: 2, 1>} : memref<286x32xf32, #tpu.memory_space<vmem>>, vector<8x32xf32>
    %130 = arith.maximumf %128, %129 : vector<8x32xf32>
    %c270 = arith.constant 270 : index
    %c0_81 = arith.constant 0 : index
    %131 = tpu.strided_load %arg11[%c270, %c0_81] {strides = array<i32: 2, 1>} : memref<286x32xf32, #tpu.memory_space<vmem>>, vector<8x32xf32>
    %c271 = arith.constant 271 : index
    %c0_82 = arith.constant 0 : index
    %132 = tpu.strided_load %arg11[%c271, %c0_82] {strides = array<i32: 2, 1>} : memref<286x32xf32, #tpu.memory_space<vmem>>, vector<8x32xf32>
    %133 = arith.maximumf %131, %132 : vector<8x32xf32>
    %134 = arith.maximumf %130, %133 : vector<8x32xf32>
    %c81 = arith.constant 81 : index
    %c0_83 = arith.constant 0 : index
    %135 = vector.load %arg12[%c81, %c0_83] : memref<100x32xf32, #tpu.memory_space<vmem>>, vector<8x32xf32>
    tpu.vector_store %arg12[%c81, %c0_83], %134 {strides = array<i32>} : memref<100x32xf32, #tpu.memory_space<vmem>>, vector<8x32xf32>,
    %c0_84 = arith.constant 0 : index
    %c0_85 = arith.constant 0 : index
    %136 = vector.load %arg12[%c0_84, %c0_85] : memref<100x32xf32, #tpu.memory_space<vmem>>, vector<78x32xf32>
    %c1_86 = arith.constant 1 : index
    %c0_87 = arith.constant 0 : index
    %137 = vector.load %arg12[%c1_86, %c0_87] : memref<100x32xf32, #tpu.memory_space<vmem>>, vector<78x32xf32>
    %c2_88 = arith.constant 2 : index
    %c0_89 = arith.constant 0 : index
    %138 = vector.load %arg12[%c2_88, %c0_89] : memref<100x32xf32, #tpu.memory_space<vmem>>, vector<78x32xf32>
    %c10 = arith.constant 10 : index
    %c0_90 = arith.constant 0 : index
    %139 = vector.load %arg12[%c10, %c0_90] : memref<100x32xf32, #tpu.memory_space<vmem>>, vector<78x32xf32>
    %c11_91 = arith.constant 11 : index
    %c0_92 = arith.constant 0 : index
    %140 = vector.load %arg12[%c11_91, %c0_92] : memref<100x32xf32, #tpu.memory_space<vmem>>, vector<78x32xf32>
    %c12 = arith.constant 12 : index
    %c0_93 = arith.constant 0 : index
    %141 = vector.load %arg12[%c12, %c0_93] : memref<100x32xf32, #tpu.memory_space<vmem>>, vector<78x32xf32>
    %c20_94 = arith.constant 20 : index
    %c0_95 = arith.constant 0 : index
    %142 = vector.load %arg12[%c20_94, %c0_95] : memref<100x32xf32, #tpu.memory_space<vmem>>, vector<78x32xf32>
    %c21_96 = arith.constant 21 : index
    %c0_97 = arith.constant 0 : index
    %143 = vector.load %arg12[%c21_96, %c0_97] : memref<100x32xf32, #tpu.memory_space<vmem>>, vector<78x32xf32>
    %c22 = arith.constant 22 : index
    %c0_98 = arith.constant 0 : index
    %144 = vector.load %arg12[%c22, %c0_98] : memref<100x32xf32, #tpu.memory_space<vmem>>, vector<78x32xf32>
    %145 = tpu.concatenate %136, %137, %138, %139, %140, %141, %142, %143, %144 in 1 : vector<78x32xf32>, vector<78x32xf32>, vector<78x32xf32>, vector<78x32xf32>, vector<78x32xf32>, vector<78x32xf32>, vector<78x32xf32>, vector<78x32xf32>, vector<78x32xf32> -> vector<78x288xf32>
    %c0_99 = arith.constant 0 : index
    %c0_100 = arith.constant 0 : index
    %146 = vector.load %arg4[%c0_99, %c0_100] : memref<288x64xf32, #tpu.memory_space<vmem>>, vector<288x64xf32>
    %cst_101 = arith.constant dense<0.000000e+00> : vector<78x64xf32>
    %147 = tpu.matmul %145, %146, %cst_101 {dimension_numbers = #tpu.dot_dimension_numbers<[1], [0], [0], [1], [0, 0, 1, 1], [], []>} : vector<78x288xf32>, vector<288x64xf32>, vector<78x64xf32> -> vector<78x64xf32>
    %c0_102 = arith.constant 0 : index
    %c0_103 = arith.constant 0 : index
    %148 = vector.load %arg5[%c0_102, %c0_103] : memref<1x64xf32, #tpu.memory_space<vmem>>, vector<1x64xf32>
    %149 = vector.broadcast %148 : vector<1x64xf32> to vector<78x64xf32>
    %150 = arith.addf %147, %149 : vector<78x64xf32>
    %cst_104 = arith.constant 0.000000e+00 : f32
    %151 = vector.broadcast %cst_104 : f32 to vector<78x64xf32>
    %152 = arith.maximumf %150, %151 : vector<78x64xf32>
    %c0_105 = arith.constant 0 : index
    %c0_106 = arith.constant 0 : index
    %153 = vector.load %arg13[%c0_105, %c0_106] : memref<78x64xf32, #tpu.memory_space<vmem>>, vector<78x64xf32>
    tpu.vector_store %arg13[%c0_105, %c0_106], %152 {strides = array<i32>} : memref<78x64xf32, #tpu.memory_space<vmem>>, vector<78x64xf32>,
    %c0_107 = arith.constant 0 : index
    %c0_108 = arith.constant 0 : index
    %154 = tpu.strided_load %arg13[%c0_107, %c0_108] {strides = array<i32: 2, 1>} : memref<78x64xf32, #tpu.memory_space<vmem>>, vector<4x64xf32>
    %c1_109 = arith.constant 1 : index
    %c0_110 = arith.constant 0 : index
    %155 = tpu.strided_load %arg13[%c1_109, %c0_110] {strides = array<i32: 2, 1>} : memref<78x64xf32, #tpu.memory_space<vmem>>, vector<4x64xf32>
    %156 = arith.maximumf %154, %155 : vector<4x64xf32>
    %c10_111 = arith.constant 10 : index
    %c0_112 = arith.constant 0 : index
    %157 = tpu.strided_load %arg13[%c10_111, %c0_112] {strides = array<i32: 2, 1>} : memref<78x64xf32, #tpu.memory_space<vmem>>, vector<4x64xf32>
    %c11_113 = arith.constant 11 : index
    %c0_114 = arith.constant 0 : index
    %158 = tpu.strided_load %arg13[%c11_113, %c0_114] {strides = array<i32: 2, 1>} : memref<78x64xf32, #tpu.memory_space<vmem>>, vector<4x64xf32>
    %159 = arith.maximumf %157, %158 : vector<4x64xf32>
    %160 = arith.maximumf %156, %159 : vector<4x64xf32>
    %161 = vector.extract_strided_slice %160 {offsets = [0, 0], sizes = [1, 64], strides = [1, 1]} : vector<4x64xf32> to vector<1x64xf32>
    %c0_115 = arith.constant 0 : index
    %c0_116 = arith.constant 0 : index
    %162 = vector.load %arg14[%c0_115, %c0_116] : memref<1x1024xf32, #tpu.memory_space<vmem>>, vector<1x64xf32>
    tpu.vector_store %arg14[%c0_115, %c0_116], %161 {strides = array<i32>} : memref<1x1024xf32, #tpu.memory_space<vmem>>, vector<1x64xf32>,
    %163 = vector.extract_strided_slice %160 {offsets = [1, 0], sizes = [1, 64], strides = [1, 1]} : vector<4x64xf32> to vector<1x64xf32>
    %c0_117 = arith.constant 0 : index
    %c64 = arith.constant 64 : index
    %164 = vector.load %arg14[%c0_117, %c64] : memref<1x1024xf32, #tpu.memory_space<vmem>>, vector<1x64xf32>
    tpu.vector_store %arg14[%c0_117, %c64], %163 {strides = array<i32>} : memref<1x1024xf32, #tpu.memory_space<vmem>>, vector<1x64xf32>,
    %165 = vector.extract_strided_slice %160 {offsets = [2, 0], sizes = [1, 64], strides = [1, 1]} : vector<4x64xf32> to vector<1x64xf32>
    %c0_118 = arith.constant 0 : index
    %c128 = arith.constant 128 : index
    %166 = vector.load %arg14[%c0_118, %c128] : memref<1x1024xf32, #tpu.memory_space<vmem>>, vector<1x64xf32>
    tpu.vector_store %arg14[%c0_118, %c128], %165 {strides = array<i32>} : memref<1x1024xf32, #tpu.memory_space<vmem>>, vector<1x64xf32>,
    %167 = vector.extract_strided_slice %160 {offsets = [3, 0], sizes = [1, 64], strides = [1, 1]} : vector<4x64xf32> to vector<1x64xf32>
    %c0_119 = arith.constant 0 : index
    %c192 = arith.constant 192 : index
    %168 = vector.load %arg14[%c0_119, %c192] : memref<1x1024xf32, #tpu.memory_space<vmem>>, vector<1x64xf32>
    tpu.vector_store %arg14[%c0_119, %c192], %167 {strides = array<i32>} : memref<1x1024xf32, #tpu.memory_space<vmem>>, vector<1x64xf32>,
    %c20_120 = arith.constant 20 : index
    %c0_121 = arith.constant 0 : index
    %169 = tpu.strided_load %arg13[%c20_120, %c0_121] {strides = array<i32: 2, 1>} : memref<78x64xf32, #tpu.memory_space<vmem>>, vector<4x64xf32>
    %c21_122 = arith.constant 21 : index
    %c0_123 = arith.constant 0 : index
    %170 = tpu.strided_load %arg13[%c21_122, %c0_123] {strides = array<i32: 2, 1>} : memref<78x64xf32, #tpu.memory_space<vmem>>, vector<4x64xf32>
    %171 = arith.maximumf %169, %170 : vector<4x64xf32>
    %c30 = arith.constant 30 : index
    %c0_124 = arith.constant 0 : index
    %172 = tpu.strided_load %arg13[%c30, %c0_124] {strides = array<i32: 2, 1>} : memref<78x64xf32, #tpu.memory_space<vmem>>, vector<4x64xf32>
    %c31_125 = arith.constant 31 : index
    %c0_126 = arith.constant 0 : index
    %173 = tpu.strided_load %arg13[%c31_125, %c0_126] {strides = array<i32: 2, 1>} : memref<78x64xf32, #tpu.memory_space<vmem>>, vector<4x64xf32>
    %174 = arith.maximumf %172, %173 : vector<4x64xf32>
    %175 = arith.maximumf %171, %174 : vector<4x64xf32>
    %176 = vector.extract_strided_slice %175 {offsets = [0, 0], sizes = [1, 64], strides = [1, 1]} : vector<4x64xf32> to vector<1x64xf32>
    %c0_127 = arith.constant 0 : index
    %c256 = arith.constant 256 : index
    %177 = vector.load %arg14[%c0_127, %c256] : memref<1x1024xf32, #tpu.memory_space<vmem>>, vector<1x64xf32>
    tpu.vector_store %arg14[%c0_127, %c256], %176 {strides = array<i32>} : memref<1x1024xf32, #tpu.memory_space<vmem>>, vector<1x64xf32>,
    %178 = vector.extract_strided_slice %175 {offsets = [1, 0], sizes = [1, 64], strides = [1, 1]} : vector<4x64xf32> to vector<1x64xf32>
    %c0_128 = arith.constant 0 : index
    %c320 = arith.constant 320 : index
    %179 = vector.load %arg14[%c0_128, %c320] : memref<1x1024xf32, #tpu.memory_space<vmem>>, vector<1x64xf32>
    tpu.vector_store %arg14[%c0_128, %c320], %178 {strides = array<i32>} : memref<1x1024xf32, #tpu.memory_space<vmem>>, vector<1x64xf32>,
    %180 = vector.extract_strided_slice %175 {offsets = [2, 0], sizes = [1, 64], strides = [1, 1]} : vector<4x64xf32> to vector<1x64xf32>
    %c0_129 = arith.constant 0 : index
    %c384 = arith.constant 384 : index
    %181 = vector.load %arg14[%c0_129, %c384] : memref<1x1024xf32, #tpu.memory_space<vmem>>, vector<1x64xf32>
    tpu.vector_store %arg14[%c0_129, %c384], %180 {strides = array<i32>} : memref<1x1024xf32, #tpu.memory_space<vmem>>, vector<1x64xf32>,
    %182 = vector.extract_strided_slice %175 {offsets = [3, 0], sizes = [1, 64], strides = [1, 1]} : vector<4x64xf32> to vector<1x64xf32>
    %c0_130 = arith.constant 0 : index
    %c448 = arith.constant 448 : index
    %183 = vector.load %arg14[%c0_130, %c448] : memref<1x1024xf32, #tpu.memory_space<vmem>>, vector<1x64xf32>
    tpu.vector_store %arg14[%c0_130, %c448], %182 {strides = array<i32>} : memref<1x1024xf32, #tpu.memory_space<vmem>>, vector<1x64xf32>,
    %c40 = arith.constant 40 : index
    %c0_131 = arith.constant 0 : index
    %184 = tpu.strided_load %arg13[%c40, %c0_131] {strides = array<i32: 2, 1>} : memref<78x64xf32, #tpu.memory_space<vmem>>, vector<4x64xf32>
    %c41_132 = arith.constant 41 : index
    %c0_133 = arith.constant 0 : index
    %185 = tpu.strided_load %arg13[%c41_132, %c0_133] {strides = array<i32: 2, 1>} : memref<78x64xf32, #tpu.memory_space<vmem>>, vector<4x64xf32>
    %186 = arith.maximumf %184, %185 : vector<4x64xf32>
    %c50 = arith.constant 50 : index
    %c0_134 = arith.constant 0 : index
    %187 = tpu.strided_load %arg13[%c50, %c0_134] {strides = array<i32: 2, 1>} : memref<78x64xf32, #tpu.memory_space<vmem>>, vector<4x64xf32>
    %c51_135 = arith.constant 51 : index
    %c0_136 = arith.constant 0 : index
    %188 = tpu.strided_load %arg13[%c51_135, %c0_136] {strides = array<i32: 2, 1>} : memref<78x64xf32, #tpu.memory_space<vmem>>, vector<4x64xf32>
    %189 = arith.maximumf %187, %188 : vector<4x64xf32>
    %190 = arith.maximumf %186, %189 : vector<4x64xf32>
    %191 = vector.extract_strided_slice %190 {offsets = [0, 0], sizes = [1, 64], strides = [1, 1]} : vector<4x64xf32> to vector<1x64xf32>
    %c0_137 = arith.constant 0 : index
    %c512 = arith.constant 512 : index
    %192 = vector.load %arg14[%c0_137, %c512] : memref<1x1024xf32, #tpu.memory_space<vmem>>, vector<1x64xf32>
    tpu.vector_store %arg14[%c0_137, %c512], %191 {strides = array<i32>} : memref<1x1024xf32, #tpu.memory_space<vmem>>, vector<1x64xf32>,
    %193 = vector.extract_strided_slice %190 {offsets = [1, 0], sizes = [1, 64], strides = [1, 1]} : vector<4x64xf32> to vector<1x64xf32>
    %c0_138 = arith.constant 0 : index
    %c576 = arith.constant 576 : index
    %194 = vector.load %arg14[%c0_138, %c576] : memref<1x1024xf32, #tpu.memory_space<vmem>>, vector<1x64xf32>
    tpu.vector_store %arg14[%c0_138, %c576], %193 {strides = array<i32>} : memref<1x1024xf32, #tpu.memory_space<vmem>>, vector<1x64xf32>,
    %195 = vector.extract_strided_slice %190 {offsets = [2, 0], sizes = [1, 64], strides = [1, 1]} : vector<4x64xf32> to vector<1x64xf32>
    %c0_139 = arith.constant 0 : index
    %c640 = arith.constant 640 : index
    %196 = vector.load %arg14[%c0_139, %c640] : memref<1x1024xf32, #tpu.memory_space<vmem>>, vector<1x64xf32>
    tpu.vector_store %arg14[%c0_139, %c640], %195 {strides = array<i32>} : memref<1x1024xf32, #tpu.memory_space<vmem>>, vector<1x64xf32>,
    %197 = vector.extract_strided_slice %190 {offsets = [3, 0], sizes = [1, 64], strides = [1, 1]} : vector<4x64xf32> to vector<1x64xf32>
    %c0_140 = arith.constant 0 : index
    %c704 = arith.constant 704 : index
    %198 = vector.load %arg14[%c0_140, %c704] : memref<1x1024xf32, #tpu.memory_space<vmem>>, vector<1x64xf32>
    tpu.vector_store %arg14[%c0_140, %c704], %197 {strides = array<i32>} : memref<1x1024xf32, #tpu.memory_space<vmem>>, vector<1x64xf32>,
    %c60 = arith.constant 60 : index
    %c0_141 = arith.constant 0 : index
    %199 = tpu.strided_load %arg13[%c60, %c0_141] {strides = array<i32: 2, 1>} : memref<78x64xf32, #tpu.memory_space<vmem>>, vector<4x64xf32>
    %c61_142 = arith.constant 61 : index
    %c0_143 = arith.constant 0 : index
    %200 = tpu.strided_load %arg13[%c61_142, %c0_143] {strides = array<i32: 2, 1>} : memref<78x64xf32, #tpu.memory_space<vmem>>, vector<4x64xf32>
    %201 = arith.maximumf %199, %200 : vector<4x64xf32>
    %c70 = arith.constant 70 : index
    %c0_144 = arith.constant 0 : index
    %202 = tpu.strided_load %arg13[%c70, %c0_144] {strides = array<i32: 2, 1>} : memref<78x64xf32, #tpu.memory_space<vmem>>, vector<4x64xf32>
    %c71_145 = arith.constant 71 : index
    %c0_146 = arith.constant 0 : index
    %203 = tpu.strided_load %arg13[%c71_145, %c0_146] {strides = array<i32: 2, 1>} : memref<78x64xf32, #tpu.memory_space<vmem>>, vector<4x64xf32>
    %204 = arith.maximumf %202, %203 : vector<4x64xf32>
    %205 = arith.maximumf %201, %204 : vector<4x64xf32>
    %206 = vector.extract_strided_slice %205 {offsets = [0, 0], sizes = [1, 64], strides = [1, 1]} : vector<4x64xf32> to vector<1x64xf32>
    %c0_147 = arith.constant 0 : index
    %c768 = arith.constant 768 : index
    %207 = vector.load %arg14[%c0_147, %c768] : memref<1x1024xf32, #tpu.memory_space<vmem>>, vector<1x64xf32>
    tpu.vector_store %arg14[%c0_147, %c768], %206 {strides = array<i32>} : memref<1x1024xf32, #tpu.memory_space<vmem>>, vector<1x64xf32>,
    %208 = vector.extract_strided_slice %205 {offsets = [1, 0], sizes = [1, 64], strides = [1, 1]} : vector<4x64xf32> to vector<1x64xf32>
    %c0_148 = arith.constant 0 : index
    %c832 = arith.constant 832 : index
    %209 = vector.load %arg14[%c0_148, %c832] : memref<1x1024xf32, #tpu.memory_space<vmem>>, vector<1x64xf32>
    tpu.vector_store %arg14[%c0_148, %c832], %208 {strides = array<i32>} : memref<1x1024xf32, #tpu.memory_space<vmem>>, vector<1x64xf32>,
    %210 = vector.extract_strided_slice %205 {offsets = [2, 0], sizes = [1, 64], strides = [1, 1]} : vector<4x64xf32> to vector<1x64xf32>
    %c0_149 = arith.constant 0 : index
    %c896 = arith.constant 896 : index
    %211 = vector.load %arg14[%c0_149, %c896] : memref<1x1024xf32, #tpu.memory_space<vmem>>, vector<1x64xf32>
    tpu.vector_store %arg14[%c0_149, %c896], %210 {strides = array<i32>} : memref<1x1024xf32, #tpu.memory_space<vmem>>, vector<1x64xf32>,
    %212 = vector.extract_strided_slice %205 {offsets = [3, 0], sizes = [1, 64], strides = [1, 1]} : vector<4x64xf32> to vector<1x64xf32>
    %c0_150 = arith.constant 0 : index
    %c960 = arith.constant 960 : index
    %213 = vector.load %arg14[%c0_150, %c960] : memref<1x1024xf32, #tpu.memory_space<vmem>>, vector<1x64xf32>
    tpu.vector_store %arg14[%c0_150, %c960], %212 {strides = array<i32>} : memref<1x1024xf32, #tpu.memory_space<vmem>>, vector<1x64xf32>,
    %c0_151 = arith.constant 0 : index
    %c0_152 = arith.constant 0 : index
    %214 = vector.load %arg14[%c0_151, %c0_152] : memref<1x1024xf32, #tpu.memory_space<vmem>>, vector<1x1024xf32>
    %c0_153 = arith.constant 0 : index
    %c0_154 = arith.constant 0 : index
    %215 = vector.load %arg6[%c0_153, %c0_154] : memref<1024x256xf32, #tpu.memory_space<vmem>>, vector<1024x256xf32>
    %cst_155 = arith.constant dense<0.000000e+00> : vector<1x256xf32>
    %216 = tpu.matmul %214, %215, %cst_155 {dimension_numbers = #tpu.dot_dimension_numbers<[1], [0], [0], [1], [0, 0, 1, 1], [], []>} : vector<1x1024xf32>, vector<1024x256xf32>, vector<1x256xf32> -> vector<1x256xf32>
    %c0_156 = arith.constant 0 : index
    %c0_157 = arith.constant 0 : index
    %217 = vector.load %arg7[%c0_156, %c0_157] : memref<1x256xf32, #tpu.memory_space<vmem>>, vector<1x256xf32>
    %218 = arith.addf %216, %217 : vector<1x256xf32>
    %cst_158 = arith.constant 0.000000e+00 : f32
    %219 = vector.broadcast %cst_158 : f32 to vector<1x256xf32>
    %220 = arith.maximumf %218, %219 : vector<1x256xf32>
    %c0_159 = arith.constant 0 : index
    %c0_160 = arith.constant 0 : index
    %221 = vector.load %arg8[%c0_159, %c0_160] : memref<256x2xf32, #tpu.memory_space<vmem>>, vector<256x2xf32>
    %cst_161 = arith.constant dense<0.000000e+00> : vector<1x2xf32>
    %222 = tpu.matmul %220, %221, %cst_161 {dimension_numbers = #tpu.dot_dimension_numbers<[1], [0], [0], [1], [0, 0, 1, 1], [], []>} : vector<1x256xf32>, vector<256x2xf32>, vector<1x2xf32> -> vector<1x2xf32>
    %c0_162 = arith.constant 0 : index
    %c0_163 = arith.constant 0 : index
    %223 = vector.load %arg9[%c0_162, %c0_163] : memref<1x2xf32, #tpu.memory_space<vmem>>, vector<1x2xf32>
    %224 = arith.addf %222, %223 : vector<1x2xf32>
    %cst_164 = arith.constant dense<0xFF800000> : vector<1xf32>
    %225 = vector.multi_reduction <maximumf>, %224, %cst_164 [1] : vector<1x2xf32> to vector<1xf32>
    %226 = vector.shape_cast %225 : vector<1xf32> to vector<1x1xf32>
    %227 = vector.broadcast %226 : vector<1x1xf32> to vector<1x2xf32>
    %228 = arith.subf %224, %227 : vector<1x2xf32>
    %229 = math.exp %228 : vector<1x2xf32>
    %cst_165 = arith.constant dense<0.000000e+00> : vector<1xf32>
    %230 = vector.multi_reduction <add>, %229, %cst_165 [1] : vector<1x2xf32> to vector<1xf32>
    %231 = vector.shape_cast %230 : vector<1xf32> to vector<1x1xf32>
    %232 = vector.broadcast %231 : vector<1x1xf32> to vector<1x2xf32>
    %233 = arith.divf %229, %232 : vector<1x2xf32>
    %c0_166 = arith.constant 0 : index
    %c0_167 = arith.constant 0 : index
    %c0_168 = arith.constant 0 : index
    %234 = vector.load %arg10[%c0_166, %c0_167, %c0_168] : memref<1x1x2xf32, #tpu.memory_space<vmem>>, vector<1x1x2xf32>
    %235 = vector.shape_cast %234 : vector<1x1x2xf32> to vector<1x2xf32>
    %236 = vector.shape_cast %233 : vector<1x2xf32> to vector<1x1x2xf32>
    tpu.vector_store %arg10[%c0_166, %c0_167, %c0_168], %236 {strides = array<i32>} : memref<1x1x2xf32, #tpu.memory_space<vmem>>, vector<1x1x2xf32>,
    return
  }
  func.func @transform_0(%arg0: i32) -> (i32, i32, i32) {
    %c0_i32 = arith.constant 0 : i32
    %c0_i32_0 = arith.constant 0 : i32
    %c0_i32_1 = arith.constant 0 : i32
    return %arg0, %c0_i32, %c0_i32_0 : i32, i32, i32
  }
  func.func @transform_1(%arg0: i32) -> (i32, i32) {
    %c0_i32 = arith.constant 0 : i32
    %c0_i32_0 = arith.constant 0 : i32
    %c0_i32_1 = arith.constant 0 : i32
    return %c0_i32, %c0_i32_0 : i32, i32
  }
  func.func @transform_2(%arg0: i32) -> (i32, i32) {
    %c0_i32 = arith.constant 0 : i32
    %c0_i32_0 = arith.constant 0 : i32
    %c0_i32_1 = arith.constant 0 : i32
    return %c0_i32, %c0_i32_0 : i32, i32
  }
  func.func @transform_3(%arg0: i32) -> (i32, i32) {
    %c0_i32 = arith.constant 0 : i32
    %c0_i32_0 = arith.constant 0 : i32
    %c0_i32_1 = arith.constant 0 : i32
    return %c0_i32, %c0_i32_0 : i32, i32
  }
  func.func @transform_4(%arg0: i32) -> (i32, i32) {
    %c0_i32 = arith.constant 0 : i32
    %c0_i32_0 = arith.constant 0 : i32
    %c0_i32_1 = arith.constant 0 : i32
    return %c0_i32, %c0_i32_0 : i32, i32
  }
  func.func @transform_5(%arg0: i32) -> (i32, i32) {
    %c0_i32 = arith.constant 0 : i32
    %c0_i32_0 = arith.constant 0 : i32
    %c0_i32_1 = arith.constant 0 : i32
    return %c0_i32, %c0_i32_0 : i32, i32
  }
  func.func @transform_6(%arg0: i32) -> (i32, i32) {
    %c0_i32 = arith.constant 0 : i32
    %c0_i32_0 = arith.constant 0 : i32
    %c0_i32_1 = arith.constant 0 : i32
    return %c0_i32, %c0_i32_0 : i32, i32
  }
  func.func @transform_7(%arg0: i32) -> (i32, i32) {
    %c0_i32 = arith.constant 0 : i32
    %c0_i32_0 = arith.constant 0 : i32
    %c0_i32_1 = arith.constant 0 : i32
    return %c0_i32, %c0_i32_0 : i32, i32
  }
  func.func @transform_8(%arg0: i32) -> (i32, i32) {
    %c0_i32 = arith.constant 0 : i32
    %c0_i32_0 = arith.constant 0 : i32
    %c0_i32_1 = arith.constant 0 : i32
    return %c0_i32, %c0_i32_0 : i32, i32
  }
  func.func @transform_9(%arg0: i32) -> (i32, i32, i32) {
    %c0_i32 = arith.constant 0 : i32
    %c0_i32_0 = arith.constant 0 : i32
    %c0_i32_1 = arith.constant 0 : i32
    return %arg0, %c0_i32, %c0_i32_0 : i32, i32, i32
  }
}

</mosaic_0001>

<bundles_post_ra>
// kernel: cnn_forward.1
= control target key start
LH: loop header
LB: loop body
LE: loop exit
PB: predicated region body
PF: predicated region fallthrough
CT: control target
= control target key end

     0   :  { %14 = vsyncpa [#allocation7], 0  ;;  %s8118_s0 = inlined_call_operand.vmem [shape: f32[2,324,1], index: 0, kind: input, shape index: {}]   ;;  %s8119_s1 = inlined_call_operand.vmem [shape: f32[9,32], index: 1, kind: input, shape index: {}]   ;;  %s8120_s2 = inlined_call_operand.vmem [shape: f32[1,32], index: 2, kind: input, shape index: {}]   ;;  %s8121_s3 = inlined_call_operand.vmem [shape: f32[288,64], index: 3, kind: input, shape index: {}]   ;;  %s8122_s4 = inlined_call_operand.vmem [shape: f32[1,64], index: 4, kind: input, shape index: {}]   ;;  %s8123_s5 = inlined_call_operand.hbm [shape: f32[1024,256], index: 5, kind: input, shape index: {}]   ;;  %s8124_s6 = inlined_call_operand.vmem [shape: f32[1,256], index: 6, kind: input, shape index: {}]   ;;  %s8125_s7 = inlined_call_operand.vmem [shape: f32[256,2], index: 7, kind: input, shape index: {}]   ;;  %s8126_s8 = inlined_call_operand.vmem [shape: f32[1,2], index: 8, kind: input, shape index: {}]   ;;  %s8127_s9 = inlined_call_operand.hbm [shape: f32[2,1,2], index: 9, kind: output, shape index: {}]  }
   0x1   :  { %15 = vsyncpa [#allocation8], 0 }
   0x2   :  { %17 = vsyncpa [#allocation8 + $0x1], 0  ;;  %s5770_s30 = smov 0   ;;  %s5772_s10 = smov 0  }
   0x3   :  { %s5774_s11 = smov 0   ;;  %s5776_s12 = smov 0  }
   0x4 LB: > { %s5791_s13 = sadd.s32 4294967295, %s5708_s12   ;;  %s4878_s14 = sadd.s32 4294967294, %s5708_s12   ;;  %s5708_s12 = sphi %s5776_s12, %s8389_s12   ;;  %s5704_s11 = sphi %s5774_s11, %s8388_s11   ;;  %s5700_s10 = sphi %s5772_s10, %s8387_s10   ;;  %s5696_s30 = sphi %s5770_s30, %s8386_s30  }
   0x5   : > { %s5795_s15 = sadd.s32 1, %s5708_s12   ;;  %s224_s16 = sadd.s32 1, %s5704_s11 }
   0x6   : > { %s221_s17 = ssub.s32 %s5708_s12, %s5795_s15  ;;  %p234_p0 = scmp.ne.s32.totalorder %s5704_s11, %s5700_s10 }
   0x7   : > { %p222_p1 = scmp.eq.s32.totalorder %s221_s17, 0  ;;  %p235_p2 = scmp.eq.s32.totalorder %s5791_s13, 1 }
   0x8   : > { %p240_p3 = scmp.ne.s32.totalorder %s5700_s10, %s5696_s30  ;;  %p241_p4 = scmp.eq.s32.totalorder %s4878_s14, 1 }
   0x9   : > { %s5806_s18 = scalar_select %p222_p1, %s5704_s11, %s224_s16  }
   0xa   : > { %p5808_p5 = por %p235_p2, %p234_p0  ;;  %p5812_p6 = por %p241_p4, %p240_p3 }
   0xb   : > { %p4879_p7 = scmp.ge.s32.totalorder %s5708_s12, 1  ;;  %p248_p8 = scmp.lt.s32.totalorder %s5708_s12, 3 }
   0xc   : > { %s8132_s19 = scalar_select %p5808_p5, 1, 0 }
   0xd   : > { %s8133_s20 = scalar_select %p5812_p6, 1, 0 }
   0xe   : > { %p8128_p9 = scmp.eq.s32.totalorder %s5791_s13, 0  ;;  %p5819_p10 = pnand %p4879_p7, %p248_p8 }
   0xf   : > { %s5710_s22 = smov [#allocation6]   ;;  %s5614_s27 = scalar_lea.hbm %s8123_s5, 32768 }
  0x10   : > { %s8134_s21 = scalar_select %p5819_p10, 1, 0 }
  0x11   : > { %s272_s23 = sshll.u32 %s5710_s22, 4  ;;  %p5386_p11 = pneg %p5819_p10  ;;  %s273_s23 = int_to_ptr.vmem [resolvable:$true] %s272_s23 }
  0x12   : > { %p5615_p13 = scmp.ne.s32.totalorder %s8123_s5, %s5614_s27  ;;  %p5621_p3 = scmp.lt.u32.totalorder %s5614_s27, %s8123_s5 }
  0x13   : > { %p5827_p12 = pnand %p8128_p9, %p5386_p11 }
  0x15   : > { %p5616_p0 = pneg %p5827_p12 }
  0x17   : > { %p5617_p1 = pnand %p5616_p0, %p5615_p13 }
  0x19   : > { %p5618_p2 = pneg %p5617_p1 }
  0x1b   : > { %p5623_p4 = pnand %p5621_p3, %p5618_p2 }
  0x1d   : > { %5626 = shalt.err (!%p5623_p4)
}
  0x1e   : > { %s5627_s17 = scalar_lea.vmem %s273_s23, 32768  ;;  %p5635_p9 = scmp.lt.s32.totalorder %s273_s23, %s273_s23 }
  0x1f   : > { %p5628_p7 = scmp.ne.s32.totalorder %s273_s23, %s5627_s17  ;;  %p5636_p6 = scmp.lt.s32.totalorder %s5627_s17, %s5627_s17 }
  0x21   : > { %p5630_p8 = pnand %p5628_p7, %p5616_p0  ;;  %p5637_p5 = por %p5636_p6, %p5635_p9 }
  0x23   : > { %p5631_p11 = pneg %p5630_p8 }
  0x25   : > { %p5638_p10 = pnand %p5637_p5, %p5631_p11 }
  0x27   : > { %5641 = shalt.err (!%p5638_p10)
}
  0x28   : > { %s5711_s22 = smov 256   ;;  %s5712_s25 = smov 16  }
  0x29   : > { %5389 = dma.hbm_to_vmem [thread:$0]  (!%p5827_p12), %s8123_s5, 32768, %s273_s23, [#allocation7], %s5711_s22, %s5711_s22, %s5712_s25  }
  0x2a   : > { %p8136_p13 = scmp.ne.s32.totalorder %s8134_s21, 0 }
  0x2c   : > { %305 = sbr.rel (%p8136_p13) target bundleno = 2275 (0x8e3), region = 56 }
  0x33   : > { %p8137_p1 = scmp.eq.s32.totalorder %s5791_s13, 0 }
  0x35   : > { %5687 = dma.done.wait (%p8137_p1), [#allocation7], 32768   ;;  %p8138_p0 = pmov %p8137_p1 }
  0x36   : > { %p340_p5 = scmp.lt.s32.totalorder %s5791_s13, 1  ;;  %v5713_v0 = vmov 0   ;;  %vm3061_vm0 = vcmask 261120   ;;  %s5715_s22 = smov 64   ;;  %vm3111_vm1 = vcmask 257024   ;;  %vm3097_vm2 = vcmask 259072  }
  0x37   : > { %5689 = vsyncadd (%p8138_p0), [#allocation7], 4294934528  ;;  %5439 = vset.pattern.permute.xlu1 %v5713_v0  ;;  %5438 = vset.pattern.permute.xlu0 %v5713_v0  ;;  %s5717_s28 = smov 96   ;;  %vm3516_vm3 = vcmask 523264   ;;  %vm3527_vm4 = vcmask 785408   ;;  %vm3890_vm5 = vcmask 521216  }
  0x38   : > { %s341_s24 = scalar_select %p340_p5, %s5791_s13, 1  ;;  %vm4785_vm10 = vcmask 8192  }
  0x39   : > { %s338_s26 = sand.u32 1, %s5700_s10   ;;  %p8384_p9 = scmp.ne.s32.totalorder %s8132_s19, 0 }
  0x3a   : > { %s5379_s27 = smul.u32 328, %s341_s24  ;;  %s5716_s24 = smov 32  }
  0x3b   : > { %s4799_s14 = scalar_lea.sflag [#allocation8], %s338_s26 }
  0x3c   : > { %s5858_s23 = scalar_lea.vmem %s8118_s0, %s5379_s27 }
  0x3d   : > { %v347_v1 = vld [vmem:[%s5858_s23 + $0x10] sm:$0xff]  ;;  %v345_v2 = vld [vmem:[%s5858_s23] sm:$0xff]  ;;  %v348_v3 = vld [vmem:[%s5858_s23 + $0x18] sm:$0xff] }
  0x3e   : > { %394 = vperm.xlu1 %5439, %v347_v1   ;;  %384 = vperm.xlu0 %5438, %v345_v2   ;;  %v346_v4 = vld [vmem:[%s5858_s23 + $0x8] sm:$0xff]  ;;  %v349_v6 = vld [vmem:[%s5858_s23 + $0x20] sm:$0xff]  ;;  %v352_v7 = vld [vmem:[%s5858_s23 + $0x38] sm:$0xff] }
  0x3f   : > { %v350_v5 = vld [vmem:[%s5858_s23 + $0x28] sm:$0xff]  ;;  %v351_v8 = vld [vmem:[%s5858_s23 + $0x30] sm:$0xff]  ;;  %v353_v10 = vld [vmem:[%s5858_s23 + $0x40] sm:$0xff] }
  0x40   : > { %v354_v9 = vld [vmem:[%s5858_s23 + $0x48] sm:$0xff]  ;;  %v356_v11 = vld [vmem:[%s5858_s23 + $0x58] sm:$0xff]  ;;  %v355_v12 = vld [vmem:[%s5858_s23 + $0x50] sm:$0xff] }
  0x41   : > { %v358_v13 = vld [vmem:[%s5858_s23 + $0x68] sm:$0xff]  ;;  %v357_v14 = vld [vmem:[%s5858_s23 + $0x60] sm:$0xff]  ;;  %v360_v15 = vld [vmem:[%s5858_s23 + $0x78] sm:$0xff] }
  0x42   : > { %399 = vperm.xlu1 %5439, %v348_v3   ;;  %389 = vperm.xlu0 %5438, %v346_v4   ;;  %v359_v16 = vld [vmem:[%s5858_s23 + $0x70] sm:$0xff]  ;;  %v362_v17 = vld [vmem:[%s5858_s23 + $0x88] sm:$0xff]  ;;  %v361_v18 = vld [vmem:[%s5858_s23 + $0x80] sm:$0xff] }
  0x43   : > { %v364_v19 = vld [vmem:[%s5858_s23 + $0x98] sm:$0xff]  ;;  %v363_v20 = vld [vmem:[%s5858_s23 + $0x90] sm:$0xff]  ;;  %v366_v21 = vld [vmem:[%s5858_s23 + $0xa8] sm:$0xff] }
  0x44   : > { %v365_v22 = vld [vmem:[%s5858_s23 + $0xa0] sm:$0xff]  ;;  %v368_v23 = vld [vmem:[%s5858_s23 + $0xb8] sm:$0xff]  ;;  %v367_v24 = vld [vmem:[%s5858_s23 + $0xb0] sm:$0xff] }
  0x45   : > { %v370_v25 = vld [vmem:[%s5858_s23 + $0xc8] sm:$0xff]  ;;  %v369_v26 = vld [vmem:[%s5858_s23 + $0xc0] sm:$0xff]  ;;  %v372_v27 = vld [vmem:[%s5858_s23 + $0xd8] sm:$0xff] }
  0x46   : > { %409 = vperm.xlu1 %5439, %v350_v5   ;;  %404 = vperm.xlu0 %5438, %v349_v6   ;;  %v371_v28 = vld [vmem:[%s5858_s23 + $0xd0] sm:$0xff]  ;;  %v374_v29 = vld [vmem:[%s5858_s23 + $0xe8] sm:$0xff]  ;;  %v373_v30 = vld [vmem:[%s5858_s23 + $0xe0] sm:$0xff] }
  0x47   : > { %v376_v31 = vld [vmem:[%s5858_s23 + $0xf8] sm:$0xff]  ;;  %v375_v32 = vld [vmem:[%s5858_s23 + $0xf0] sm:$0xff]  ;;  %v378_v33 = vld [vmem:[%s5858_s23 + $0x108] sm:$0xff] }
  0x48   : > { %v377_v34 = vld [vmem:[%s5858_s23 + $0x100] sm:$0xff]  ;;  %v380_v35 = vld [vmem:[%s5858_s23 + $0x118] sm:$0x3f]  ;;  %v379_v36 = vld [vmem:[%s5858_s23 + $0x110] sm:$0xff] }
  0x49   : > { %v639_v37 = vld [vmem:[%s5858_s23 + $0x9] sm:$0xff]  ;;  %v638_v38 = vld [vmem:[%s5858_s23 + $0x1] sm:$0xff]  ;;  %v641_v39 = vld [vmem:[%s5858_s23 + $0x19] sm:$0xff] }
  0x4a   : > { %419 = vperm.xlu1 %5439, %v352_v7   ;;  %414 = vperm.xlu0 %5438, %v351_v8   ;;  %v640_v40 = vld [vmem:[%s5858_s23 + $0x11] sm:$0xff]  ;;  %v643_v41 = vld [vmem:[%s5858_s23 + $0x29] sm:$0xff]  ;;  %v642_v42 = vld [vmem:[%s5858_s23 + $0x21] sm:$0xff] }
  0x4b   : > { %v645_v43 = vld [vmem:[%s5858_s23 + $0x39] sm:$0xff]  ;;  %v644_v44 = vld [vmem:[%s5858_s23 + $0x31] sm:$0xff]  ;;  %v647_v45 = vld [vmem:[%s5858_s23 + $0x49] sm:$0xff] }
  0x4c   : > { %v646_v46 = vld [vmem:[%s5858_s23 + $0x41] sm:$0xff]  ;;  %v932_v47 = vld [vmem:[%s5858_s23 + $0xa] sm:$0xff]  ;;  %v933_v50 = vld [vmem:[%s5858_s23 + $0x12] sm:$0xff] }
  0x4d   : > { %v931_v48 = vld [vmem:[%s5858_s23 + $0x2] sm:$0xff]  ;;  %v934_v49 = vld [vmem:[%s5858_s23 + $0x1a] sm:$0xff]  ;;  %v936_v51 = vld [vmem:[%s5858_s23 + $0x2a] sm:$0xff] }
  0x4e   : > { %429 = vperm.xlu1 %5439, %v354_v9   ;;  %424 = vperm.xlu0 %5438, %v353_v10   ;;  %v935_v52 = vld [vmem:[%s5858_s23 + $0x22] sm:$0xff]  ;;  %v938_v53 = vld [vmem:[%s5858_s23 + $0x3a] sm:$0xff]  ;;  %v937_v54 = vld [vmem:[%s5858_s23 + $0x32] sm:$0xff] }
  0x4f   : > { %v939_v55 = vld [vmem:[%s5858_s23 + $0x42] sm:$0xff]  ;;  %v649_v56 = vld [vmem:[%s5858_s23 + $0x59] sm:$0xff]  ;;  %v648_v57 = vld [vmem:[%s5858_s23 + $0x51] sm:$0xff] }
  0x50   : > { %v651_v58 = vld [vmem:[%s5858_s23 + $0x69] sm:$0xff]  ;;  %v650_v59 = vld [vmem:[%s5858_s23 + $0x61] sm:$0xff]  ;;  %v1232_v62 = vld [vmem:[%s5858_s23 + $0x52] sm:$0xff] }
  0x51   : > { %v1231_v63 = vld [vmem:[%s5858_s23 + $0x4a] sm:$0xff]  ;;  %v1518_v2 = vld [vmem:[%s5858_s23 + $0x1b] sm:$0xff]  ;;  %v1517_v3 = vld [vmem:[%s5858_s23 + $0x13] sm:$0xff] }
  0x52   : > { %439 = vperm.xlu1 %5439, %v356_v11   ;;  %434 = vperm.xlu0 %5438, %v355_v12   ;;  %v1520_v6 = vld [vmem:[%s5858_s23 + $0x2b] sm:$0xff]  ;;  %v1519_v7 = vld [vmem:[%s5858_s23 + $0x23] sm:$0xff]  ;;  %v1521_v10 = vld [vmem:[%s5858_s23 + $0x33] sm:$0xff] }
  0x56   : > { %449 = vperm.xlu1 %5439, %v358_v13   ;;  %444 = vperm.xlu0 %5438, %v357_v14   ;;  %v942_v13 = vld [vmem:[%s5858_s23 + $0x5a] sm:$0xff] }
  0x5a   : > { %459 = vperm.xlu1 %5439, %v360_v15   ;;  %454 = vperm.xlu0 %5438, %v359_v16   ;;  %v944_v16 = vld [vmem:[%s5858_s23 + $0x6a] sm:$0xff] }
  0x5e   : > { %469 = vperm.xlu1 %5439, %v362_v17   ;;  %464 = vperm.xlu0 %5438, %v361_v18   ;;  %v943_v17 = vld [vmem:[%s5858_s23 + $0x62] sm:$0xff] }
  0x62   : > { %479 = vperm.xlu1 %5439, %v364_v19   ;;  %474 = vperm.xlu0 %5438, %v363_v20   ;;  %v1523_v20 = vld [vmem:[%s5858_s23 + $0x43] sm:$0xff] }
  0x66   : > { %489 = vperm.xlu1 %5439, %v366_v21   ;;  %484 = vperm.xlu0 %5438, %v365_v22   ;;  %v1522_v21 = vld [vmem:[%s5858_s23 + $0x3b] sm:$0xff] }
  0x6a   : > { %499 = vperm.xlu1 %5439, %v368_v23   ;;  %494 = vperm.xlu0 %5438, %v367_v24   ;;  %v1525_v24 = vld [vmem:[%s5858_s23 + $0x53] sm:$0xff] }
  0x6e   : > { %509 = vperm.xlu1 %5439, %v370_v25   ;;  %504 = vperm.xlu0 %5438, %v369_v26   ;;  %v1524_v25 = vld [vmem:[%s5858_s23 + $0x4b] sm:$0xff] }
  0x72   : > { %519 = vperm.xlu1 %5439, %v372_v27   ;;  %514 = vperm.xlu0 %5438, %v371_v28   ;;  %v1811_v28 = vld [vmem:[%s5858_s23 + $0x1c] sm:$0xff] }
  0x76   : > { %529 = vperm.xlu1 %5439, %v374_v29   ;;  %524 = vperm.xlu0 %5438, %v373_v30   ;;  %v1810_v29 = vld [vmem:[%s5858_s23 + $0x14] sm:$0xff] }
  0x7a   : > { %539 = vperm.xlu1 %5439, %v376_v31   ;;  %534 = vperm.xlu0 %5438, %v375_v32   ;;  %v1813_v32 = vld [vmem:[%s5858_s23 + $0x2c] sm:$0xff] }
  0x7e   : > { %549 = vperm.xlu1 %5439, %v378_v33   ;;  %544 = vperm.xlu0 %5438, %v377_v34   ;;  %v1812_v33 = vld [vmem:[%s5858_s23 + $0x24] sm:$0xff] }
  0x82   : > { %559 = vperm.xlu1 %5439, %v380_v35   ;;  %554 = vperm.xlu0 %5438, %v379_v36   ;;  %v652_v36 = vld [vmem:[%s5858_s23 + $0x71] sm:$0xff] }
  0x86   : > { %682 = vperm.xlu1 %5439, %v639_v37   ;;  %677 = vperm.xlu0 %5438, %v638_v38   ;;  %v1814_v37 = vld [vmem:[%s5858_s23 + $0x34] sm:$0xff] }
  0x8a   : > { %692 = vperm.xlu1 %5439, %v641_v39   ;;  %687 = vperm.xlu0 %5438, %v640_v40   ;;  %v654_v40 = vld [vmem:[%s5858_s23 + $0x81] sm:$0xff] }
  0x8e   : > { %702 = vperm.xlu1 %5439, %v643_v41   ;;  %697 = vperm.xlu0 %5438, %v642_v42   ;;  %v653_v41 = vld [vmem:[%s5858_s23 + $0x79] sm:$0xff] }
  0x92   : > { %712 = vperm.xlu1 %5439, %v645_v43   ;;  %707 = vperm.xlu0 %5438, %v644_v44   ;;  %v655_v44 = vld [vmem:[%s5858_s23 + $0x89] sm:$0xff] }
  0x96   : > { %722 = vperm.xlu1 %5439, %v647_v45   ;;  %717 = vperm.xlu0 %5438, %v646_v46  }
  0x9a   : > { %975 = vperm.xlu1 %5439, %v932_v47   ;;  %970 = vperm.xlu0 %5438, %v931_v48  }
  0x9e   : > { %985 = vperm.xlu1 %5439, %v934_v49   ;;  %980 = vperm.xlu0 %5438, %v933_v50  }
  0xa2   : > { %995 = vperm.xlu1 %5439, %v936_v51   ;;  %990 = vperm.xlu0 %5438, %v935_v52  }
  0xa6   : > { %1005 = vperm.xlu1 %5439, %v938_v53   ;;  %1000 = vperm.xlu0 %5438, %v937_v54  }
  0xaa   : > { %1263 = vperm.xlu1 %5439, %v933_v50   ;;  %1010 = vperm.xlu0 %5438, %v939_v55   ;;  %v1236_v50 = vld [vmem:[%s5858_s23 + $0x72] sm:$0xff] }
  0xae   : > { %1273 = vperm.xlu1 %5439, %v935_v52   ;;  %1268 = vperm.xlu0 %5438, %v934_v49   ;;  %v1237_v49 = vld [vmem:[%s5858_s23 + $0x7a] sm:$0xff] }
  0xb2   : > { %1283 = vperm.xlu1 %5439, %v937_v54   ;;  %1278 = vperm.xlu0 %5438, %v936_v51   ;;  %v1815_v54 = vld [vmem:[%s5858_s23 + $0x3c] sm:$0xff] }
  0xb6   : > { %732 = vperm.xlu1 %5439, %v649_v56   ;;  %727 = vperm.xlu0 %5438, %v648_v57   ;;  %v1818_v57 = vld [vmem:[%s5858_s23 + $0x54] sm:$0xff] }
  0xba   : > { %742 = vperm.xlu1 %5439, %v651_v58   ;;  %737 = vperm.xlu0 %5438, %v650_v59   ;;  %v1817_v58 = vld [vmem:[%s5858_s23 + $0x4c] sm:$0xff] }
  0xbd   : > { %v5919_v60 = vpop.permute.xlu1 %394  ;;  %v5921_v61 = vpop.permute.xlu0 %384 }
  0xbe   : > { %1293 = vperm.xlu1 %5439, %v939_v55   ;;  %1288 = vperm.xlu0 %5438, %v938_v53   ;;  %v1816_v53 = vld [vmem:[%s5858_s23 + $0x44] sm:$0xff] }
  0xc1   : > { %v5925_v0 = vpop.permute.xlu1 %399  ;;  %v5927_v1 = vpop.permute.xlu0 %389 }
  0xc2   : > { %1303 = vperm.xlu1 %5439, %v1232_v62   ;;  %1298 = vperm.xlu0 %5438, %v1231_v63  }
  0xc5   : > { %v5931_v4 = vpop.permute.xlu1 %409  ;;  %v5933_v5 = vpop.permute.xlu0 %404 }
  0xc6   : > { %1561 = vperm.xlu1 %5439, %v1518_v2   ;;  %1556 = vperm.xlu0 %5438, %v1517_v3  }
  0xc9   : > { %v5937_v8 = vpop.permute.xlu1 %419  ;;  %v5939_v9 = vpop.permute.xlu0 %414 }
  0xca   : > { %8139 = vst [vmem:[#allocation12_spill] sm:$0xff] %v5937_v8  ;;  %1571 = vperm.xlu1 %5439, %v1520_v6   ;;  %1566 = vperm.xlu0 %5438, %v1519_v7   ;;  %v661_v8 = vld [vmem:[%s5858_s23 + $0xb9] sm:$0xff] }
  0xcd   : > { %v5942_v11 = vpop.permute.xlu1 %429  ;;  %v5944_v12 = vpop.permute.xlu0 %424 }
  0xce   : > { %8140 = vst [vmem:[#allocation13_spill] sm:$0xff] %v5942_v11  ;;  %8141 = vst [vmem:[#allocation14_spill] sm:$0xff] %v5944_v12  ;;  %1015 = vperm.xlu1 %5439, %v1231_v63   ;;  %1576 = vperm.xlu0 %5438, %v1521_v10  }
  0xd1   : > { %v5947_v14 = vpop.permute.xlu1 %439  ;;  %v5949_v15 = vpop.permute.xlu0 %434 }
  0xd2   : > { %8142 = vst [vmem:[#allocation15_spill] sm:$0xff] %v5947_v14  ;;  %8143 = vst [vmem:[#allocation16_spill] sm:$0xff] %v5949_v15  ;;  %1025 = vperm.xlu1 %5439, %v942_v13   ;;  %1020 = vperm.xlu0 %5438, %v1232_v62   ;;  %v1531_v14 = vld [vmem:[%s5858_s23 + $0x83] sm:$0xff] }
  0xd5   : > { %v5953_v18 = vpop.permute.xlu1 %449  ;;  %v5955_v19 = vpop.permute.xlu0 %444 }
  0xd6   : > { %8144 = vst [vmem:[#allocation17_spill] sm:$0xff] %v5953_v18  ;;  %8145 = vst [vmem:[#allocation18_spill] sm:$0xff] %v5955_v19  ;;  %1035 = vperm.xlu1 %5439, %v944_v16   ;;  %1030 = vperm.xlu0 %5438, %v943_v17  }
  0xd9   : > { %v5959_v22 = vpop.permute.xlu1 %459  ;;  %v5961_v23 = vpop.permute.xlu0 %454 }
  0xda   : > { %8146 = vst [vmem:[#allocation19_spill] sm:$0xff] %v5959_v22  ;;  %8147 = vst [vmem:[#allocation20_spill] sm:$0xff] %v5961_v23  ;;  %1586 = vperm.xlu1 %5439, %v1523_v20   ;;  %1581 = vperm.xlu0 %5438, %v1522_v21   ;;  %v1526_v20 = vld [vmem:[%s5858_s23 + $0x5b] sm:$0xff]  ;;  %v948_v21 = vld [vmem:[%s5858_s23 + $0x8a] sm:$0xff] }
  0xdb   : > { %v2689_v23 = vld [vmem:[%s5858_s23 + $0x26] sm:$0xff] }
  0xdc   : > { %v2404_v22 = vld [vmem:[%s5858_s23 + $0x65] sm:$0xff] }
  0xdd   : > { %v5965_v26 = vpop.permute.xlu1 %469  ;;  %v5967_v27 = vpop.permute.xlu0 %464 }
  0xde   : > { %8148 = vst [vmem:[#allocation21_spill] sm:$0xff] %v5965_v26  ;;  %8149 = vst [vmem:[#allocation22_spill] sm:$0xff] %v5967_v27  ;;  %1596 = vperm.xlu1 %5439, %v1525_v24   ;;  %1591 = vperm.xlu0 %5438, %v1524_v25  }
  0xe1   : > { %v5971_v30 = vpop.permute.xlu1 %479  ;;  %v5973_v31 = vpop.permute.xlu0 %474 }
  0xe2   : > { %8150 = vst [vmem:[#allocation23_spill] sm:$0xff] %v5971_v30  ;;  %8151 = vst [vmem:[#allocation24_spill] sm:$0xff] %v5973_v31  ;;  %1854 = vperm.xlu1 %5439, %v1811_v28   ;;  %1849 = vperm.xlu0 %5438, %v1810_v29   ;;  %v1528_v28 = vld [vmem:[%s5858_s23 + $0x6b] sm:$0xff]  ;;  %v1527_v29 = vld [vmem:[%s5858_s23 + $0x63] sm:$0xff] }
  0xe3   : > { %v6124_v30 = vld [vmem:[%s5858_s23 + $0x7c] sm:$0xff] }
  0xe4   : > { %v2402_v31 = vld [vmem:[%s5858_s23 + $0x55] sm:$0xff] }
  0xe5   : > { %v5977_v34 = vpop.permute.xlu1 %489  ;;  %v5979_v35 = vpop.permute.xlu0 %484 }
  0xe6   : > { %8152 = vst [vmem:[#allocation25_spill] sm:$0xff] %v5977_v34  ;;  %8153 = vst [vmem:[#allocation26_spill] sm:$0xff] %v5979_v35  ;;  %1864 = vperm.xlu1 %5439, %v1813_v32   ;;  %1859 = vperm.xlu0 %5438, %v1812_v33   ;;  %v2401_v34 = vld [vmem:[%s5858_s23 + $0x4d] sm:$0xff] }
  0xe9   : > { %v5983_v38 = vpop.permute.xlu1 %499  ;;  %v5985_v39 = vpop.permute.xlu0 %494 }
  0xea   : > { %8154 = vst [vmem:[#allocation27_spill] sm:$0xff] %v5983_v38  ;;  %8155 = vst [vmem:[#allocation28_spill] sm:$0xff] %v5985_v39  ;;  %747 = vperm.xlu1 %5439, %v652_v36   ;;  %1869 = vperm.xlu0 %5438, %v1814_v37   ;;  %v1530_v36 = vld [vmem:[%s5858_s23 + $0x7b] sm:$0xff] }
  0xed   : > { %v5989_v42 = vpop.permute.xlu1 %509  ;;  %v5991_v43 = vpop.permute.xlu0 %504 }
  0xee   : > { %8156 = vst [vmem:[#allocation29_spill] sm:$0xff] %v5989_v42  ;;  %8157 = vst [vmem:[#allocation30_spill] sm:$0xff] %v5991_v43  ;;  %757 = vperm.xlu1 %5439, %v654_v40   ;;  %752 = vperm.xlu0 %5438, %v653_v41  }
  0xf1   : > { %v5994_v45 = vpop.permute.xlu1 %519  ;;  %v5996_v46 = vpop.permute.xlu0 %514 }
  0xf2   : > { %8158 = vst [vmem:[#allocation31_spill] sm:$0xff] %v5994_v45  ;;  %8159 = vst [vmem:[#allocation32_spill] sm:$0xff] %v5996_v46  ;;  %1308 = vperm.xlu1 %5439, %v942_v13   ;;  %762 = vperm.xlu0 %5438, %v655_v44   ;;  %v6033_v13 = vld [vmem:[%s5858_s23 + $0x82] sm:$0xff] }
  0xf5   : > { %v5998_v47 = vpop.permute.xlu1 %529  ;;  %v6000_v48 = vpop.permute.xlu0 %524 }
  0xf6   : > { %8160 = vst [vmem:[#allocation33_spill] sm:$0xff] %v5998_v47  ;;  %8161 = vst [vmem:[#allocation34_spill] sm:$0xff] %v6000_v48  ;;  %1318 = vperm.xlu1 %5439, %v944_v16   ;;  %1313 = vperm.xlu0 %5438, %v943_v17   ;;  %v2400_v48 = vld [vmem:[%s5858_s23 + $0x45] sm:$0xff] }
  0xf9   : > { %v6004_v51 = vpop.permute.xlu1 %539  ;;  %v6006_v52 = vpop.permute.xlu0 %534 }
  0xfa   : > { %8162 = vst [vmem:[#allocation35_spill] sm:$0xff] %v6004_v51  ;;  %8163 = vst [vmem:[#allocation36_spill] sm:$0xff] %v6006_v52  ;;  %1328 = vperm.xlu1 %5439, %v1237_v49   ;;  %1323 = vperm.xlu0 %5438, %v1236_v50   ;;  %v656_v51 = vld [vmem:[%s5858_s23 + $0x91] sm:$0xff] }
  0xfd   : > { %v6010_v55 = vpop.permute.xlu1 %549  ;;  %v6012_v56 = vpop.permute.xlu0 %544 }
  0xfe   : > { %8164 = vst [vmem:[#allocation37_spill] sm:$0xff] %v6010_v55  ;;  %8165 = vst [vmem:[#allocation38_spill] sm:$0xff] %v6012_v56  ;;  %1879 = vperm.xlu1 %5439, %v1816_v53   ;;  %1874 = vperm.xlu0 %5438, %v1815_v54  }
 0x101   : > { %v6016_v59 = vpop.permute.xlu1 %559  ;;  %v6018_v62 = vpop.permute.xlu0 %554 }
 0x102   : > { %8166 = vst [vmem:[#allocation39_spill] sm:$0xff] %v6016_v59  ;;  %8167 = vst [vmem:[#allocation40_spill] sm:$0xff] %v6018_v62  ;;  %1889 = vperm.xlu1 %5439, %v1818_v57   ;;  %1884 = vperm.xlu0 %5438, %v1817_v58   ;;  %v1241_v62 = vld [vmem:[%s5858_s23 + $0x9a] sm:$0xff] }
 0x105   : > { %v6020_v63 = vpop.permute.xlu1 %682  ;;  %v6022_v2 = vpop.permute.xlu0 %677 }
 0x106   : > { %2147 = vperm.xlu1 %5439, %v1813_v32   ;;  %2142 = vperm.xlu0 %5438, %v1812_v33  }
 0x109   : > { %v6024_v3 = vpop.permute.xlu1 %692  ;;  %v6026_v6 = vpop.permute.xlu0 %687 }
 0x10a   : > { %2157 = vperm.xlu1 %5439, %v1815_v54   ;;  %2152 = vperm.xlu0 %5438, %v1814_v37   ;;  %v1529_v37 = vld [vmem:[%s5858_s23 + $0x73] sm:$0xff] }
 0x10d   : > { %v6028_v7 = vpop.permute.xlu1 %702  ;;  %v6030_v10 = vpop.permute.xlu0 %697 }
 0x10e   : > { %1040 = vperm.xlu1 %5439, %v1236_v50   ;;  %2162 = vperm.xlu0 %5438, %v1816_v53   ;;  %v2111_v50 = vld [vmem:[%s5858_s23 + $0x64] sm:$0xff]  ;;  %v2110_v53 = vld [vmem:[%s5858_s23 + $0x5c] sm:$0xff] }
 0x111   : > { %v6035_v16 = vpop.permute.xlu1 %712  ;;  %v6037_v17 = vpop.permute.xlu0 %707 }
 0x112   : > { %1050 = vperm.xlu1 %5439, %v6033_v13   ;;  %1045 = vperm.xlu0 %5438, %v1237_v49  }
 0x115   : > { %v6042_v24 = vpop.permute.xlu1 %722  ;;  %v6044_v25 = vpop.permute.xlu0 %717 }
 0x116   : > { %8168 = vst [vmem:[#allocation41_spill] sm:$0xff] %v6042_v24  ;;  %1601 = vperm.xlu1 %5439, %v1526_v20   ;;  %1055 = vperm.xlu0 %5438, %v948_v21  }
 0x119   : > { %v6048_v32 = vpop.permute.xlu1 %975  ;;  %v6050_v33 = vpop.permute.xlu0 %970 }
 0x11a   : > { %1611 = vperm.xlu1 %5439, %v1528_v28   ;;  %1606 = vperm.xlu0 %5438, %v1527_v29   ;;  %v2397_v28 = vld [vmem:[%s5858_s23 + $0x2d] sm:$0xff]  ;;  %v2396_v29 = vld [vmem:[%s5858_s23 + $0x25] sm:$0xff] }
 0x11d   : > { %v6054_v40 = vpop.permute.xlu1 %985  ;;  %v6056_v41 = vpop.permute.xlu0 %980 }
 0x11e   : > { %1621 = vperm.xlu1 %5439, %v1530_v36   ;;  %1616 = vperm.xlu0 %5438, %v1529_v37  }
 0x121   : > { %v6058_v44 = vpop.permute.xlu1 %995  ;;  %v6060_v49 = vpop.permute.xlu0 %990 }
 0x122   : > { %2172 = vperm.xlu1 %5439, %v1818_v57   ;;  %2167 = vperm.xlu0 %5438, %v1817_v58   ;;  %v2399_v57 = vld [vmem:[%s5858_s23 + $0x3d] sm:$0xff]  ;;  %v2398_v58 = vld [vmem:[%s5858_s23 + $0x35] sm:$0xff] }
 0x125   : > { %v6064_v54 = vpop.permute.xlu1 %1005  ;;  %v6066_v20 = vpop.permute.xlu0 %1000 }
 0x126   : > { %8169 = vst [vmem:[#allocation42_spill] sm:$0xff] %v6064_v54  ;;  %2182 = vperm.xlu1 %5439, %v2111_v50   ;;  %2177 = vperm.xlu0 %5438, %v2110_v53   ;;  %v2701_v54 = vld [vmem:[%s5858_s23 + $0x86] sm:$0xff] }
 0x129   : > { %v6070_v36 = vpop.permute.xlu1 %1263  ;;  %v6072_v37 = vpop.permute.xlu0 %1010 }
 0x12a   : > { %8170 = vst [vmem:[#allocation43_spill] sm:$0xff] %v6072_v37  ;;  %2440 = vperm.xlu1 %5439, %v2397_v28   ;;  %2435 = vperm.xlu0 %5438, %v2396_v29   ;;  %v658_v28 = vld [vmem:[%s5858_s23 + $0xa1] sm:$0xff]  ;;  %v657_v29 = vld [vmem:[%s5858_s23 + $0x99] sm:$0xff] }
 0x12d   : > { %v6076_v59 = vpop.permute.xlu1 %1273  ;;  %v6078_v55 = vpop.permute.xlu0 %1268 }
 0x12e   : > { %2450 = vperm.xlu1 %5439, %v2399_v57   ;;  %2445 = vperm.xlu0 %5438, %v2398_v58   ;;  %v660_v57 = vld [vmem:[%s5858_s23 + $0xb1] sm:$0xff]  ;;  %v659_v58 = vld [vmem:[%s5858_s23 + $0xa9] sm:$0xff] }
 0x131   : > { %v6082_v47 = vpop.permute.xlu1 %1283  ;;  %v6084_v45 = vpop.permute.xlu0 %1278 }
 0x132   : > { %767 = vperm.xlu1 %5439, %v656_v51   ;;  %2455 = vperm.xlu0 %5438, %v2400_v48  }
 0x135   : > { %v6088_v42 = vpop.permute.xlu1 %732  ;;  %v6090_v46 = vpop.permute.xlu0 %727 }
 0x136   : > { %8171 = vst [vmem:[#allocation44_spill] sm:$0xff] %v6088_v42  ;;  %8172 = vst [vmem:[#allocation45_spill] sm:$0xff] %v6090_v46  ;;  %777 = vperm.xlu1 %5439, %v658_v28   ;;  %772 = vperm.xlu0 %5438, %v657_v29   ;;  %v1240_v28 = vld [vmem:[%s5858_s23 + $0x92] sm:$0xff]  ;;  %v1534_v42 = vld [vmem:[%s5858_s23 + $0x9b] sm:$0xff] }
 0x137   : > { %v1533_v46 = vld [vmem:[%s5858_s23 + $0x93] sm:$0xff] }
 0x139   : > { %v6094_v38 = vpop.permute.xlu1 %742  ;;  %v6096_v43 = vpop.permute.xlu0 %737 }
 0x13a   : > { %8173 = vst [vmem:[#allocation46_spill] sm:$0xff] %v6094_v38  ;;  %8174 = vst [vmem:[#allocation47_spill] sm:$0xff] %v6096_v43  ;;  %787 = vperm.xlu1 %5439, %v660_v57   ;;  %782 = vperm.xlu0 %5438, %v659_v58   ;;  %v2690_v43 = vld [vmem:[%s5858_s23 + $0x2e] sm:$0xff] }
 0x13d   : > { %v6098_v48 = vpop.permute.xlu1 %1293  ;;  %v6100_v51 = vpop.permute.xlu0 %1288 }
 0x13e   : > { %8175 = vst [vmem:[#allocation48_spill] sm:$0xff] %v6098_v48  ;;  %8176 = vst [vmem:[#allocation49_spill] sm:$0xff] %v6100_v51  ;;  %1338 = vperm.xlu1 %5439, %v948_v21   ;;  %1333 = vperm.xlu0 %5438, %v6033_v13   ;;  %v6114_v21 = vld [vmem:[%s5858_s23 + $0x74] sm:$0xff]  ;;  %v1821_v13 = vld [vmem:[%s5858_s23 + $0x6c] sm:$0xff] }
 0x141   : > { %v6105_v29 = vpop.permute.xlu1 %1303  ;;  %v6107_v56 = vpop.permute.xlu0 %1298 }
 0x142   : > { %8177 = vst [vmem:[#allocation50_spill] sm:$0xff] %v6105_v29  ;;  %8178 = vst [vmem:[#allocation51_spill] sm:$0xff] %v6107_v56  ;;  %1348 = vperm.xlu1 %5439, %v1241_v62   ;;  %1343 = vperm.xlu0 %5438, %v1240_v28   ;;  %v2406_v56 = vld [vmem:[%s5858_s23 + $0x75] sm:$0xff] }
 0x145   : > { %v6109_v57 = vpop.permute.xlu1 %1561  ;;  %v6111_v58 = vpop.permute.xlu0 %1556 }
 0x146   : > { %1899 = vperm.xlu1 %5439, %v2111_v50   ;;  %1894 = vperm.xlu0 %5438, %v2110_v53   ;;  %v2403_v53 = vld [vmem:[%s5858_s23 + $0x5d] sm:$0xff] }
 0x149   : > { %v6117_v52 = vpop.permute.xlu1 %1571  ;;  %v6119_v39 = vpop.permute.xlu0 %1566 }
 0x14a   : > { %1909 = vperm.xlu1 %5439, %v6114_v21   ;;  %1904 = vperm.xlu0 %5438, %v1821_v13  }
 0x14d   : > { %v6126_v35 = vpop.permute.xlu1 %1015  ;;  %v6128_v50 = vpop.permute.xlu0 %1576 }
 0x14e   : > { %8179 = vst [vmem:[#allocation52_spill] sm:$0xff] %v6126_v35  ;;  %2460 = vperm.xlu1 %5439, %v2401_v34   ;;  %1914 = vperm.xlu0 %5438, %v6124_v30   ;;  %v2691_v34 = vld [vmem:[%s5858_s23 + $0x36] sm:$0xff] }
 0x151   : > { %v6133_v27 = vpop.permute.xlu1 %1025  ;;  %v6135_v26 = vpop.permute.xlu0 %1020 }
 0x152   : > { %8180 = vst [vmem:[#allocation53_spill] sm:$0xff] %v6133_v27  ;;  %8181 = vst [vmem:[#allocation54_spill] sm:$0xff] %v6135_v26  ;;  %2470 = vperm.xlu1 %5439, %v2403_v53   ;;  %2465 = vperm.xlu0 %5438, %v2402_v31   ;;  %v2693_v53 = vld [vmem:[%s5858_s23 + $0x46] sm:$0xff]  ;;  %v2692_v31 = vld [vmem:[%s5858_s23 + $0x3e] sm:$0xff] }
 0x155   : > { %v6139_v19 = vpop.permute.xlu1 %1035  ;;  %v6141_v18 = vpop.permute.xlu0 %1030 }
 0x156   : > { %8182 = vst [vmem:[#allocation55_spill] sm:$0xff] %v6139_v19  ;;  %8183 = vst [vmem:[#allocation56_spill] sm:$0xff] %v6141_v18  ;;  %2728 = vperm.xlu1 %5439, %v2689_v23   ;;  %2475 = vperm.xlu0 %5438, %v2404_v22  }
 0x159   : > { %v6145_v38 = vpop.permute.xlu1 %1586  ;;  %v6147_v27 = vpop.permute.xlu0 %1581 }
 0x15a   : > { %8184 = vst [vmem:[#allocation57_spill] sm:$0xff] %v6145_v38  ;;  %8185 = vst [vmem:[#allocation58_spill] sm:$0xff] %v6147_v27  ;;  %2738 = vperm.xlu1 %5439, %v2691_v34   ;;  %2733 = vperm.xlu0 %5438, %v2690_v43   ;;  %v952_v34 = vld [vmem:[%s5858_s23 + $0xaa] sm:$0xff]  ;;  %v951_v43 = vld [vmem:[%s5858_s23 + $0xa2] sm:$0xff] }
 0x15d   : > { %v6151_v26 = vpop.permute.xlu1 %1596  ;;  %v6153_v19 = vpop.permute.xlu0 %1591 }
 0x15e   : > { %8186 = vst [vmem:[#allocation59_spill] sm:$0xff] %v6151_v26  ;;  %8187 = vst [vmem:[#allocation60_spill] sm:$0xff] %v6153_v19  ;;  %2748 = vperm.xlu1 %5439, %v2693_v53   ;;  %2743 = vperm.xlu0 %5438, %v2692_v31   ;;  %v953_v53 = vld [vmem:[%s5858_s23 + $0xb2] sm:$0xff]  ;;  %v6235_v26 = vld [vmem:[%s5858_s23 + $0xba] sm:$0xff] }
 0x161   : > { %v6155_v22 = vpop.permute.xlu1 %1854  ;;  %v6157_v23 = vpop.permute.xlu0 %1849 }
 0x162   : > { %1065 = vperm.xlu1 %5439, %v1241_v62   ;;  %1060 = vperm.xlu0 %5438, %v1240_v28   ;;  %v1532_v62 = vld [vmem:[%s5858_s23 + $0x8b] sm:$0xff] }
 0x165   : > { %v6161_v18 = vpop.permute.xlu1 %1864  ;;  %v6163_v15 = vpop.permute.xlu0 %1859 }
 0x166   : > { %1075 = vperm.xlu1 %5439, %v952_v34   ;;  %1070 = vperm.xlu0 %5438, %v951_v43  }
 0x169   : > { %v6167_v31 = vpop.permute.xlu1 %747  ;;  %v6169_v35 = vpop.permute.xlu0 %1869 }
 0x16a   : > { %8188 = vst [vmem:[#allocation61_spill] sm:$0xff] %v6167_v31  ;;  %1626 = vperm.xlu1 %5439, %v1531_v14   ;;  %1080 = vperm.xlu0 %5438, %v953_v53   ;;  %v8131_v31 = vmov 0.0  }
 0x16b   : > { %3099 = vst.msk [vmem:[#allocation3] sm:$0xff] %vm3061_vm0, %v8131_v31  ;;  %3100 = vst.msk [vmem:[#allocation3 + $0x8] sm:$0xff] %vm3061_vm0, %v8131_v31 }
 0x16c   : > { %3101 = vst.msk [vmem:[#allocation3 + $0x10] sm:$0xff] %vm3061_vm0, %v8131_v31  ;;  %3102 = vst.msk [vmem:[#allocation3 + $0x18] sm:$0xff] %vm3061_vm0, %v8131_v31 }
 0x16d   : > { %v6173_v28 = vpop.permute.xlu1 %757  ;;  %v6175_v11 = vpop.permute.xlu0 %752  ;;  %3103 = vst.msk [vmem:[#allocation3 + $0x20] sm:$0xff] %vm3061_vm0, %v8131_v31  ;;  %3104 = vst.msk [vmem:[#allocation3 + $0x28] sm:$0xff] %vm3061_vm0, %v8131_v31 }
 0x16e   : > { %8189 = vst [vmem:[#allocation62_spill] sm:$0xff] %v6173_v28  ;;  %8190 = vst [vmem:[#allocation63_spill] sm:$0xff] %v6175_v11  ;;  %1636 = vperm.xlu1 %5439, %v1533_v46   ;;  %1631 = vperm.xlu0 %5438, %v1532_v62   ;;  %v2116_v46 = vld [vmem:[%s5858_s23 + $0x8c] sm:$0xff] }
 0x16f   : > { %3105 = vst.msk [vmem:[#allocation3 + $0x30] sm:$0xff] %vm3061_vm0, %v8131_v31  ;;  %3106 = vst.msk [vmem:[#allocation3 + $0x38] sm:$0xff] %vm3061_vm0, %v8131_v31 }
 0x170   : > { %3107 = vst.msk [vmem:[#allocation3 + $0x40] sm:$0xff] %vm3061_vm0, %v8131_v31  ;;  %3108 = vst.msk [vmem:[#allocation3 + $0x48] sm:$0xff] %vm3061_vm0, %v8131_v31 }
 0x171   : > { %v6178_v24 = vpop.permute.xlu1 %1308  ;;  %v6180_v19 = vpop.permute.xlu0 %762  ;;  %3109 = vst.msk [vmem:[#allocation3 + $0x50] sm:$0xff] %vm3061_vm0, %v8131_v31  ;;  %3110 = vst.msk [vmem:[#allocation3 + $0x58] sm:$0xff] %vm3061_vm0, %v8131_v31  ;;  %v2694_v31 = vld [vmem:[%s5858_s23 + $0x4e] sm:$0xff] }
 0x172   : > { %8191 = vst [vmem:[#allocation64_spill] sm:$0xff] %v6178_v24  ;;  %8192 = vst [vmem:[#allocation65_spill] sm:$0xff] %v6180_v19  ;;  %2187 = vperm.xlu1 %5439, %v1821_v13   ;;  %1641 = vperm.xlu0 %5438, %v1534_v42   ;;  %v2115_v13 = vld [vmem:[%s5858_s23 + $0x84] sm:$0xff]  ;;  %v2695_v19 = vld [vmem:[%s5858_s23 + $0x56] sm:$0xff] }
 0x175   : > { %v6206_v14 = vpop.permute.xlu1 %1318  ;;  %v6208_v42 = vpop.permute.xlu0 %1313 }
 0x176   : > { %8193 = vst [vmem:[#allocation66_spill] sm:$0xff] %v6206_v14  ;;  %8194 = vst [vmem:[#allocation67_spill] sm:$0xff] %v6208_v42  ;;  %2197 = vperm.xlu1 %5439, %v6124_v30   ;;  %2192 = vperm.xlu0 %5438, %v6114_v21   ;;  %v2697_v30 = vld [vmem:[%s5858_s23 + $0x66] sm:$0xff]  ;;  %v2696_v21 = vld [vmem:[%s5858_s23 + $0x5e] sm:$0xff] }
 0x179   : > { %v6214_v62 = vpop.permute.xlu1 %1328  ;;  %v6216_v28 = vpop.permute.xlu0 %1323 }
 0x17a   : > { %8195 = vst [vmem:[#allocation68_spill] sm:$0xff] %v6214_v62  ;;  %8196 = vst [vmem:[#allocation69_spill] sm:$0xff] %v6216_v28  ;;  %2207 = vperm.xlu1 %5439, %v2116_v46   ;;  %2202 = vperm.xlu0 %5438, %v2115_v13  }
 0x17d   : > { %v6220_v11 = vpop.permute.xlu1 %1879  ;;  %v6222_v14 = vpop.permute.xlu0 %1874 }
 0x17e   : > { %8197 = vst [vmem:[#allocation70_spill] sm:$0xff] %v6220_v11  ;;  %8198 = vst [vmem:[#allocation71_spill] sm:$0xff] %v6222_v14  ;;  %2758 = vperm.xlu1 %5439, %v2695_v19   ;;  %2753 = vperm.xlu0 %5438, %v2694_v31   ;;  %v1827_v14 = vld [vmem:[%s5858_s23 + $0x9c] sm:$0xff] }
 0x181   : > { %v6226_v42 = vpop.permute.xlu1 %1889  ;;  %v6228_v24 = vpop.permute.xlu0 %1884 }
 0x182   : > { %8199 = vst [vmem:[#allocation72_spill] sm:$0xff] %v6226_v42  ;;  %8200 = vst [vmem:[#allocation73_spill] sm:$0xff] %v6228_v24  ;;  %2768 = vperm.xlu1 %5439, %v2697_v30   ;;  %2763 = vperm.xlu0 %5438, %v2696_v21   ;;  %v6243_v30 = vld [vmem:[%s5858_s23 + $0xc2] sm:$0xff] }
 0x185   : > { %v6230_v28 = vpop.permute.xlu1 %2147  ;;  %v6232_v62 = vpop.permute.xlu0 %2142 }
 0x186   : > { %1358 = vperm.xlu1 %5439, %v952_v34   ;;  %1353 = vperm.xlu0 %5438, %v951_v43   ;;  %v1826_v34 = vld [vmem:[%s5858_s23 + $0x94] sm:$0xff] }
 0x189   : > { %v6237_v19 = vpop.permute.xlu1 %2157  ;;  %v6239_v31 = vpop.permute.xlu0 %2152 }
 0x18a   : > { %1368 = vperm.xlu1 %5439, %v6235_v26   ;;  %1363 = vperm.xlu0 %5438, %v953_v53   ;;  %v2405_v53 = vld [vmem:[%s5858_s23 + $0x6d] sm:$0xff] }
 0x18d   : > { %v6245_v21 = vpop.permute.xlu1 %1040  ;;  %v6247_v24 = vpop.permute.xlu0 %2162 }
 0x18e   : > { %8201 = vst [vmem:[#allocation74_spill] sm:$0xff] %v6245_v21  ;;  %1919 = vperm.xlu1 %5439, %v2115_v13   ;;  %1373 = vperm.xlu0 %5438, %v6243_v30   ;;  %v2407_v13 = vld [vmem:[%s5858_s23 + $0x7d] sm:$0xff] }
 0x191   : > { %v6251_v43 = vpop.permute.xlu1 %1050  ;;  %v6253_v42 = vpop.permute.xlu0 %1045 }
 0x192   : > { %8202 = vst [vmem:[#allocation75_spill] sm:$0xff] %v6251_v43  ;;  %8203 = vst [vmem:[#allocation76_spill] sm:$0xff] %v6253_v42  ;;  %1929 = vperm.xlu1 %5439, %v1826_v34   ;;  %1924 = vperm.xlu0 %5438, %v2116_v46   ;;  %v2409_v46 = vld [vmem:[%s5858_s23 + $0x8d] sm:$0xff]  ;;  %v2408_v42 = vld [vmem:[%s5858_s23 + $0x85] sm:$0xff] }
 0x195   : > { %v6257_v11 = vpop.permute.xlu1 %1601  ;;  %v6259_v21 = vpop.permute.xlu0 %1055 }
 0x196   : > { %8204 = vst [vmem:[#allocation77_spill] sm:$0xff] %v6257_v11  ;;  %8205 = vst [vmem:[#allocation78_spill] sm:$0xff] %v6259_v21  ;;  %2480 = vperm.xlu1 %5439, %v2405_v53   ;;  %1934 = vperm.xlu0 %5438, %v1827_v14   ;;  %v1536_v53 = vld [vmem:[%s5858_s23 + $0xab] sm:$0xff]  ;;  %v1535_v21 = vld [vmem:[%s5858_s23 + $0xa3] sm:$0xff] }
 0x199   : > { %v6263_v29 = vpop.permute.xlu1 %1611  ;;  %v6265_v43 = vpop.permute.xlu0 %1606 }
 0x19a   : > { %8206 = vst [vmem:[#allocation79_spill] sm:$0xff] %v6263_v29  ;;  %8207 = vst [vmem:[#allocation80_spill] sm:$0xff] %v6265_v43  ;;  %2490 = vperm.xlu1 %5439, %v2407_v13   ;;  %2485 = vperm.xlu0 %5438, %v2406_v56   ;;  %v1538_v13 = vld [vmem:[%s5858_s23 + $0xbb] sm:$0xff]  ;;  %v1537_v56 = vld [vmem:[%s5858_s23 + $0xb3] sm:$0xff] }
 0x19d   : > { %v6269_v27 = vpop.permute.xlu1 %1621  ;;  %v6271_v11 = vpop.permute.xlu0 %1616 }
 0x19e   : > { %8208 = vst [vmem:[#allocation81_spill] sm:$0xff] %v6269_v27  ;;  %8209 = vst [vmem:[#allocation82_spill] sm:$0xff] %v6271_v11  ;;  %2500 = vperm.xlu1 %5439, %v2409_v46   ;;  %2495 = vperm.xlu0 %5438, %v2408_v42   ;;  %v1539_v42 = vld [vmem:[%s5858_s23 + $0xc3] sm:$0xff] }
 0x1a1   : > { %v6275_v38 = vpop.permute.xlu1 %2172  ;;  %v6277_v29 = vpop.permute.xlu0 %2167 }
 0x1a2   : > { %8210 = vst [vmem:[#allocation83_spill] sm:$0xff] %v6275_v38  ;;  %8211 = vst [vmem:[#allocation84_spill] sm:$0xff] %v6277_v29  ;;  %1651 = vperm.xlu1 %5439, %v1536_v53   ;;  %1646 = vperm.xlu0 %5438, %v1535_v21   ;;  %v2119_v21 = vld [vmem:[%s5858_s23 + $0xa4] sm:$0xff] }
 0x1a5   : > { %v6281_v43 = vpop.permute.xlu1 %2182  ;;  %v6283_v27 = vpop.permute.xlu0 %2177 }
 0x1a6   : > { %8212 = vst [vmem:[#allocation85_spill] sm:$0xff] %v6281_v43  ;;  %8213 = vst [vmem:[#allocation86_spill] sm:$0xff] %v6283_v27  ;;  %1661 = vperm.xlu1 %5439, %v1538_v13   ;;  %1656 = vperm.xlu0 %5438, %v1537_v56   ;;  %v2698_v13 = vld [vmem:[%s5858_s23 + $0x6e] sm:$0xff] }
 0x1a7   : > { %v2120_v56 = vld [vmem:[%s5858_s23 + $0xac] sm:$0xff] }
 0x1a9   : > { %v6286_v46 = vpop.permute.xlu1 %2440  ;;  %v6288_v11 = vpop.permute.xlu0 %2435 }
 0x1aa   : > { %2212 = vperm.xlu1 %5439, %v1826_v34   ;;  %1666 = vperm.xlu0 %5438, %v1539_v42   ;;  %v2700_v34 = vld [vmem:[%s5858_s23 + $0x7e] sm:$0xff]  ;;  %v2699_v42 = vld [vmem:[%s5858_s23 + $0x76] sm:$0xff] }
 0x1ad   : > { %v6291_v53 = vpop.permute.xlu1 %2450  ;;  %v6293_v29 = vpop.permute.xlu0 %2445 }
 0x1ae   : > { %2222 = vperm.xlu1 %5439, %v2119_v21   ;;  %2217 = vperm.xlu0 %5438, %v1827_v14   ;;  %v2702_v14 = vld [vmem:[%s5858_s23 + $0x8e] sm:$0xff] }
 0x1b1   : > { %v6297_v27 = vpop.permute.xlu1 %767  ;;  %v6299_v43 = vpop.permute.xlu0 %2455 }
 0x1b2   : > { %8214 = vst [vmem:[#allocation87_spill] sm:$0xff] %v6297_v27  ;;  %2773 = vperm.xlu1 %5439, %v2698_v13   ;;  %2227 = vperm.xlu0 %5438, %v2120_v56   ;;  %v662_v13 = vld [vmem:[%s5858_s23 + $0xc1] sm:$0xff] }
 0x1b5   : > { %v6303_v38 = vpop.permute.xlu1 %777  ;;  %v6305_v37 = vpop.permute.xlu0 %772 }
 0x1b6   : > { %8215 = vst [vmem:[#allocation88_spill] sm:$0xff] %v6303_v38  ;;  %8216 = vst [vmem:[#allocation89_spill] sm:$0xff] %v6305_v37  ;;  %2783 = vperm.xlu1 %5439, %v2700_v34   ;;  %2778 = vperm.xlu0 %5438, %v2699_v42   ;;  %v664_v37 = vld [vmem:[%s5858_s23 + $0xd1] sm:$0xff]  ;;  %v663_v38 = vld [vmem:[%s5858_s23 + $0xc9] sm:$0xff] }
 0x1b9   : > { %v6309_v12 = vpop.permute.xlu1 %787  ;;  %v6311_v27 = vpop.permute.xlu0 %782 }
 0x1ba   : > { %8217 = vst [vmem:[#allocation90_spill] sm:$0xff] %v6309_v12  ;;  %8218 = vst [vmem:[#allocation91_spill] sm:$0xff] %v6311_v27  ;;  %2793 = vperm.xlu1 %5439, %v2702_v14   ;;  %2788 = vperm.xlu0 %5438, %v2701_v54   ;;  %v6328_v27 = vld [vmem:[%s8119_s1 + $0x1] ss:$0 sm:$0xff]  ;;  %v6333_v54 = vld [vmem:[%s8119_s1] ss:$0 sm:$0xff] }
 0x1bb   : > { %v6340_v14 = vld [vmem:[%s8119_s1 + $0x2] ss:$0 sm:$0xff] }
 0x1bd   : > { %v6315_v51 = vpop.permute.xlu1 %1338  ;;  %v6317_v48 = vpop.permute.xlu0 %1333 }
 0x1be   : > { %8219 = vst [vmem:[#allocation92_spill] sm:$0xff] %v6315_v51  ;;  %8220 = vst [vmem:[#allocation93_spill] sm:$0xff] %v6317_v48  ;;  %797 = vperm.xlu1 %5439, %v662_v13   ;;  %792 = vperm.xlu0 %5438, %v661_v8   ;;  %v860_v8 = vmul.f32 %v6328_v27, %v6020_v63  ;;  %v567_v63 = vmul.f32 %v6333_v54, %v5927_v1  ;;  %v6359_v48 = vld [vmem:[%s8119_s1 + $0x3] ss:$0 sm:$0xff] }
 0x1bf   : > { %v569_v1 = vmul.f32 %v6333_v54, %v5925_v0  ;;  %v6384_v0 = vld [vmem:[%s8119_s1 + $0x4] ss:$0 sm:$0xff] }
 0x1c0   : > { %v896_v51 = vadd.f32 %v860_v8, %v567_v63  ;;  %v1156_v63 = vmul.f32 %v6340_v14, %v6060_v49 }
 0x1c1   : > { %v6321_v34 = vpop.permute.xlu1 %1348  ;;  %v6323_v42 = vpop.permute.xlu0 %1343 }
 0x1c2   : > { %8221 = vst [vmem:[#allocation94_spill] sm:$0xff] %v6321_v34  ;;  %8222 = vst [vmem:[#allocation95_spill] sm:$0xff] %v6323_v42  ;;  %807 = vperm.xlu1 %5439, %v664_v37   ;;  %802 = vperm.xlu0 %5438, %v663_v38   ;;  %v859_v38 = vmul.f32 %v6328_v27, %v6022_v2  ;;  %v568_v37 = vmul.f32 %v6333_v54, %v5919_v60  ;;  %v6362_v2 = vld [vmem:[%s5858_s23 + $0xbc] sm:$0xff] }
 0x1c3   : > { %v862_v42 = vmul.f32 %v6328_v27, %v6024_v3  ;;  %v861_v34 = vmul.f32 %v6328_v27, %v6026_v6  ;;  %v566_v60 = vmul.f32 %v6333_v54, %v5921_v61  ;;  %v863_v3 = vmul.f32 %v6328_v27, %v6030_v10 }
 0x1c4   : > { %v1152_v6 = vmul.f32 %v6340_v14, %v6050_v33  ;;  %v1154_v61 = vmul.f32 %v6340_v14, %v6056_v41 }
 0x1c5   : > { %v6342_v13 = vpop.permute.xlu1 %1899  ;;  %v6344_v12 = vpop.permute.xlu0 %1894  ;;  %v898_v41 = vadd.f32 %v862_v42, %v569_v1  ;;  %v897_v8 = vadd.f32 %v861_v34, %v568_v37  ;;  %v1446_v42 = vmul.f32 %v6359_v48, %v6078_v55  ;;  %v1738_v34 = vmul.f32 %v6384_v0, %v6111_v58 }
 0x1c6   : > { %8223 = vst [vmem:[#allocation96_spill] sm:$0xff] %v6342_v13  ;;  %8224 = vst [vmem:[#allocation97_spill] sm:$0xff] %v6344_v12  ;;  %1944 = vperm.xlu1 %5439, %v2120_v56   ;;  %1939 = vperm.xlu0 %5438, %v2119_v21   ;;  %v6365_v21 = vld [vmem:[%s5858_s23 + $0xb4] sm:$0xff]  ;;  %v570_v56 = vmul.f32 %v6333_v54, %v5933_v5  ;;  %v1153_v13 = vmul.f32 %v6340_v14, %v6048_v32 }
 0x1c7   : > { %v895_v12 = vadd.f32 %v859_v38, %v566_v60  ;;  %v1155_v5 = vmul.f32 %v6340_v14, %v6054_v40  ;;  %v1445_v32 = vmul.f32 %v6359_v48, %v6070_v36  ;;  %v6403_v38 = vld [vmem:[%s8119_s1 + $0x5] ss:$0 sm:$0xff]  ;;  %v2410_v40 = vld [vmem:[%s5858_s23 + $0x95] sm:$0xff]  ;;  %v1190_v37 = vadd.f32 %v1154_v61, %v897_v8  ;;  %v6436_v61 = vld [vmem:[%s8119_s1 + $0x7] ss:$0 sm:$0xff] }
 0x1c8   : > { %v6407_v60 = vld [vmem:[%s5858_s23 + $0xc4] sm:$0xff]  ;;  %v899_v36 = vadd.f32 %v863_v3, %v570_v56  ;;  %v1189_v49 = vadd.f32 %v1153_v13, %v896_v51  ;;  %v1448_v1 = vmul.f32 %v6359_v48, %v6084_v45  ;;  %v2031_v13 = vmul.f32 %v6403_v38, %v6157_v23 }
 0x1c9   : > { %v6386_v10 = vpop.permute.xlu1 %1909  ;;  %v6388_v33 = vpop.permute.xlu0 %1904  ;;  %v1191_v58 = vadd.f32 %v1155_v5, %v898_v41  ;;  %v1739_v45 = vmul.f32 %v6384_v0, %v6109_v57  ;;  %v1740_v56 = vmul.f32 %v6384_v0, %v6119_v39  ;;  %v2411_v5 = vld [vmem:[%s5858_s23 + $0x9d] sm:$0xff]  ;;  %v1741_v41 = vmul.f32 %v6384_v0, %v6117_v52 }
 0x1ca   : > { %8225 = vst [vmem:[#allocation98_spill] sm:$0xff] %v6386_v10  ;;  %8226 = vst [vmem:[#allocation99_spill] sm:$0xff] %v6388_v33  ;;  %1954 = vperm.xlu1 %5439, %v6362_v2   ;;  %1949 = vperm.xlu0 %5438, %v6365_v21   ;;  %v1447_v10 = vmul.f32 %v6359_v48, %v6076_v59  ;;  %v1188_v33 = vadd.f32 %v1152_v6, %v895_v12  ;;  %v6420_v12 = vld [vmem:[%s8119_s1 + $0x6] ss:$0 sm:$0xff] }
 0x1cb   : > { %v1449_v59 = vmul.f32 %v6359_v48, %v6082_v47  ;;  %v1192_v47 = vadd.f32 %v1156_v63, %v899_v36  ;;  %v1484_v57 = vadd.f32 %v1448_v1, %v1191_v58  ;;  %v2032_v39 = vmul.f32 %v6403_v38, %v6155_v22 }
 0x1cc   : > { %v1481_v51 = vadd.f32 %v1445_v32, %v1188_v33  ;;  %v1483_v6 = vadd.f32 %v1447_v10, %v1190_v37  ;;  %v2412_v33 = vld [vmem:[%s5858_s23 + $0xa5] sm:$0xff]  ;;  %v1482_v32 = vadd.f32 %v1446_v42, %v1189_v49  ;;  %v2324_v10 = vmul.f32 %v6420_v12, %v6232_v62 }
 0x1cd   : > { %v6422_v3 = vpop.permute.xlu1 %2460  ;;  %v6424_v55 = vpop.permute.xlu0 %1914  ;;  %v1485_v8 = vadd.f32 %v1449_v59, %v1192_v47  ;;  %v2033_v63 = vmul.f32 %v6403_v38, %v6163_v15  ;;  %v1742_v42 = vmul.f32 %v6384_v0, %v6128_v50  ;;  %v2617_v62 = vmul.f32 %v6436_v61, %v6288_v11  ;;  %v6463_v37 = vld [vmem:[%s8119_s1 + $0x8] ss:$0 sm:$0xff]  ;;  %v2413_v50 = vld [vmem:[%s5858_s23 + $0xad] sm:$0xff] }
 0x1ce   : > { %2505 = vperm.xlu1 %5439, %v2410_v40   ;;  %1959 = vperm.xlu0 %5438, %v6407_v60   ;;  %v1774_v23 = vadd.f32 %v1738_v34, %v1481_v51  ;;  %v1775_v34 = vadd.f32 %v1739_v45, %v1482_v32  ;;  %v1776_v49 = vadd.f32 %v1740_v56, %v1483_v6  ;;  %v6488_v32 = vld [vmem:[%s5858_s23 + $0xca] sm:$0xff] }
 0x1cf   : > { %v2325_v22 = vmul.f32 %v6420_v12, %v6230_v28  ;;  %v2326_v15 = vmul.f32 %v6420_v12, %v6239_v31  ;;  %v1777_v59 = vadd.f32 %v1741_v41, %v1484_v57  ;;  %v2034_v11 = vmul.f32 %v6403_v38, %v6161_v18 }
 0x1d0   : > { %v2067_v52 = vadd.f32 %v2031_v13, %v1774_v23  ;;  %v2035_v1 = vmul.f32 %v6403_v38, %v6169_v35  ;;  %v2068_v51 = vadd.f32 %v2032_v39, %v1775_v34  ;;  %v2069_v28 = vadd.f32 %v2033_v63, %v1776_v49 }
 0x1d1   : > { %v6448_v40 = vpop.permute.xlu1 %2470  ;;  %v6450_v36 = vpop.permute.xlu0 %2465  ;;  %v2618_v31 = vmul.f32 %v6436_v61, %v6286_v46  ;;  %v2619_v13 = vmul.f32 %v6436_v61, %v6293_v29  ;;  %v1778_v45 = vadd.f32 %v1742_v42, %v1485_v8  ;;  %v2328_v46 = vmul.f32 %v6420_v12, %v6247_v24  ;;  %v6485_v29 = vld [vmem:[%s8120_s2] ss:$0 sm:$0xff] }
 0x1d2   : > { %2515 = vperm.xlu1 %5439, %v2412_v33   ;;  %2510 = vperm.xlu0 %5438, %v2411_v5   ;;  %v2360_v58 = vadd.f32 %v2324_v10, %v2067_v52  ;;  %v2361_v35 = vadd.f32 %v2325_v22, %v2068_v51  ;;  %v2327_v33 = vmul.f32 %v6420_v12, %v6237_v19 }
 0x1d3   : > { %v2362_v5 = vadd.f32 %v2326_v15, %v2069_v28  ;;  %v2070_v23 = vadd.f32 %v2034_v11, %v1777_v59  ;;  %v2071_v41 = vadd.f32 %v2035_v1, %v1778_v45  ;;  %v2620_v8 = vmul.f32 %v6436_v61, %v6291_v53  ;;  %v6500_v15 = vld [vmem:[%s5858_s23 + $0xd2] sm:$0xff] }
 0x1d4   : > { %v2653_v56 = vadd.f32 %v2617_v62, %v2360_v58  ;;  %v2621_v57 = vmul.f32 %v6436_v61, %v6299_v43 }
 0x1d5   : > { %v2729_v47 = vpop.permute.xlu1 %2728  ;;  %v6474_v6 = vpop.permute.xlu0 %2475  ;;  %v2655_v19 = vadd.f32 %v2619_v13, %v2362_v5  ;;  %v2363_v62 = vadd.f32 %v2327_v33, %v2070_v23  ;;  %v2364_v34 = vadd.f32 %v2328_v46, %v2071_v41  ;;  %v6523_v46 = vld [vmem:[%s5858_s23 + $0xcc] sm:$0xff] }
 0x1d6   : > { %v2910_v18 = vmul.f32 %v6463_v37, %v2729_v47  ;;  %1085 = vperm.xlu1 %5439, %v6235_v26   ;;  %2520 = vperm.xlu0 %5438, %v2413_v50   ;;  %v2654_v26 = vadd.f32 %v2618_v31, %v2361_v35  ;;  %v6520_v35 = vld [vmem:[%s5858_s23 + $0xd4] sm:$0xff] }
 0x1d7   : > { %v2656_v43 = vadd.f32 %v2620_v8, %v2363_v62  ;;  %v2657_v50 = vadd.f32 %v2621_v57, %v2364_v34  ;;  %v2706_v57 = vld [vmem:[%s5858_s23 + $0xae] sm:$0xff]  ;;  %v864_v62 = vmul.f32 %v6328_v27, %v6028_v7  ;;  %v865_v34 = vmul.f32 %v6328_v27, %v6037_v17 }
 0x1d8   : > { %v2946_v10 = vadd.f32 %v2910_v18, %v2653_v56  ;;  %v1158_v7 = vmul.f32 %v6340_v14, %v6066_v20  ;;  %v866_v17 = vmul.f32 %v6328_v27, %v6035_v16  ;;  %v8231_v20 = vld [vmem:[#allocation49_spill] sm:$0xff]  ;;  %v8232_v16 = vld [vmem:[#allocation12_spill] sm:$0xff] }
 0x1d9   : > { %v2739_v24 = vpop.permute.xlu1 %2738  ;;  %v2734_v39 = vpop.permute.xlu0 %2733 }
 0x1da   : > { %v2989_v63 = vadd.f32 %v6485_v29, %v2946_v10  ;;  %v2912_v42 = vmul.f32 %v6463_v37, %v2739_v24  ;;  %v2911_v52 = vmul.f32 %v6463_v37, %v2734_v39  ;;  %1095 = vperm.xlu1 %5439, %v6488_v32   ;;  %1090 = vperm.xlu0 %5438, %v6243_v30   ;;  %v2705_v24 = vld [vmem:[%s5858_s23 + $0xa6] sm:$0xff] }
 0x1dc   : > { %v3025_v49 = vmax.f32 %v2989_v63, 0.0  ;;  %v2948_v53 = vadd.f32 %v2912_v42, %v2655_v19  ;;  %v2947_v22 = vadd.f32 %v2911_v52, %v2654_v26 }
 0x1dd   : > { %v2749_v59 = vpop.permute.xlu1 %2748  ;;  %v2744_v11 = vpop.permute.xlu0 %2743 }
 0x1de   : > { %3062 = vst.msk [vmem:[#allocation2] sm:$0xff] %vm3061_vm0, %v3025_v49  ;;  %v2991_v1 = vadd.f32 %v6485_v29, %v2948_v53  ;;  %v2990_v58 = vadd.f32 %v6485_v29, %v2947_v22  ;;  %v2914_v51 = vmul.f32 %v6463_v37, %v2749_v59  ;;  %v2913_v30 = vmul.f32 %v6463_v37, %v2744_v11 }
 0x1df   : > { %2232 = vperm.xlu1 %5439, %v6365_v21   ;;  %1100 = vperm.xlu0 %5438, %v6500_v15   ;;  %v571_v22 = vmul.f32 %v6333_v54, %v5931_v4  ;;  %v1157_v59 = vmul.f32 %v6340_v14, %v6058_v44  ;;  %v867_v4 = vmul.f32 %v6328_v27, %v6044_v25  ;;  %v8230_v44 = vld [vmem:[#allocation48_spill] sm:$0xff]  ;;  %v8233_v25 = vld [vmem:[#allocation14_spill] sm:$0xff] }
 0x1e0   : > { %v3027_v28 = vmax.f32 %v2991_v1, 0.0  ;;  %v3026_v31 = vmax.f32 %v2990_v58, 0.0  ;;  %v2950_v13 = vadd.f32 %v2914_v51, %v2657_v50  ;;  %v2949_v47 = vadd.f32 %v2913_v30, %v2656_v43  ;;  %v666_v43 = vld [vmem:[%s5858_s23 + $0xe1] sm:$0xff]  ;;  %v665_v1 = vld [vmem:[%s5858_s23 + $0xd9] sm:$0xff] }
 0x1e1   : > { %v6509_v45 = vpop.permute.xlu1 %1065  ;;  %v6511_v56 = vpop.permute.xlu0 %1060  ;;  %v572_v50 = vmul.f32 %v6333_v54, %v5939_v9  ;;  %v900_v9 = vadd.f32 %v864_v62, %v571_v22  ;;  %v8239_v22 = vld [vmem:[#allocation51_spill] sm:$0xff] }
 0x1e2   : > { %8227 = vst [vmem:[#allocation100_spill] sm:$0xff] %v6509_v45  ;;  %3064 = vst.msk [vmem:[#allocation2 + $0x10] sm:$0xff] %vm3061_vm0, %v3027_v28  ;;  %v2993_v18 = vadd.f32 %v6485_v29, %v2950_v13  ;;  %v2992_v21 = vadd.f32 %v6485_v29, %v2949_v47  ;;  %v1451_v28 = vmul.f32 %v6359_v48, %v8230_v44  ;;  %v8274_v45 = vld [vmem:[#allocation77_spill] sm:$0xff] }
 0x1e3   : > { %3063 = vst.msk [vmem:[#allocation2 + $0x8] sm:$0xff] %vm3061_vm0, %v3026_v31  ;;  %2242 = vperm.xlu1 %5439, %v6407_v60   ;;  %2237 = vperm.xlu0 %5438, %v6362_v2   ;;  %v2704_v2 = vld [vmem:[%s5858_s23 + $0x9e] sm:$0xff]  ;;  %v2703_v60 = vld [vmem:[%s5858_s23 + $0x96] sm:$0xff]  ;;  %v901_v30 = vadd.f32 %v865_v34, %v572_v50  ;;  %v1450_v31 = vmul.f32 %v6359_v48, %v8231_v20 }
 0x1e4   : > { %v3029_v33 = vmax.f32 %v2993_v18, 0.0  ;;  %v3028_v5 = vmax.f32 %v2992_v21, 0.0  ;;  %v573_v13 = vmul.f32 %v6333_v54, %v8232_v16  ;;  %v574_v47 = vmul.f32 %v6333_v54, %v8233_v25  ;;  %v8234_v18 = vld [vmem:[#allocation42_spill] sm:$0xff]  ;;  %v8242_v20 = vld [vmem:[#allocation59_spill] sm:$0xff] }
 0x1e5   : > { %v6525_v23 = vpop.permute.xlu1 %1075  ;;  %v6527_v41 = vpop.permute.xlu0 %1070  ;;  %v1159_v21 = vmul.f32 %v6340_v14, %v8234_v18  ;;  %v1746_v16 = vmul.f32 %v6384_v0, %v8242_v20 }
 0x1e6   : > { %8228 = vst [vmem:[#allocation101_spill] sm:$0xff] %v6525_v23  ;;  %3066 = vst.msk [vmem:[#allocation2 + $0x20] sm:$0xff] %vm3061_vm0, %v3029_v33  ;;  %v8235_v33 = vld [vmem:[#allocation43_spill] sm:$0xff]  ;;  %v902_v62 = vadd.f32 %v866_v17, %v573_v13  ;;  %v903_v34 = vadd.f32 %v867_v4, %v574_v47  ;;  %v8243_v13 = vld [vmem:[#allocation60_spill] sm:$0xff] }
 0x1e7   : > { %3065 = vst.msk [vmem:[#allocation2 + $0x18] sm:$0xff] %vm3061_vm0, %v3028_v5  ;;  %2252 = vperm.xlu1 %5439, %v6520_v35   ;;  %2247 = vperm.xlu0 %5438, %v6523_v46   ;;  %v1160_v5 = vmul.f32 %v6340_v14, %v8235_v33  ;;  %v1745_v25 = vmul.f32 %v6384_v0, %v8243_v13  ;;  %v8245_v33 = vld [vmem:[#allocation84_spill] sm:$0xff] }
 0x1e8   : > { %v1195_v4 = vadd.f32 %v1159_v21, %v902_v62  ;;  %v8273_v23 = vld [vmem:[#allocation56_spill] sm:$0xff] }
 0x1e9   : > { %v6535_v10 = vpop.permute.xlu1 %1626  ;;  %v6537_v26 = vpop.permute.xlu0 %1080  ;;  %v1196_v44 = vadd.f32 %v1160_v5, %v903_v34  ;;  %v8246_v5 = vld [vmem:[#allocation72_spill] sm:$0xff] }
 0x1ea   : > { %8229 = vst [vmem:[#allocation102_spill] sm:$0xff] %v6537_v26  ;;  %v3113_v8 = vld [vmem:[#allocation2] ss:$2 sm:$0xff]  ;;  %v3115_v19 = vld [vmem:[#allocation2 + $0x1] ss:$2 sm:$0xff] }
 0x1eb   : > { %2803 = vperm.xlu1 %5439, %v2704_v2   ;;  %2798 = vperm.xlu0 %5438, %v2703_v60   ;;  %v3116_v49 = vmax.f32 %v3113_v8, %v3115_v19  ;;  %v668_v2 = vld [vmem:[%s5858_s23 + $0xf1] sm:$0xff]  ;;  %v1193_v60 = vadd.f32 %v1157_v59, %v900_v9  ;;  %v1194_v8 = vadd.f32 %v1158_v7, %v901_v30  ;;  %v8241_v30 = vld [vmem:[#allocation71_spill] sm:$0xff] }
 0x1ec   : > { %v8236_v19 = vld [vmem:[#allocation57_spill] sm:$0xff]  ;;  %v2036_v17 = vmul.f32 %v6403_v38, %v8241_v30 }
 0x1ed   : > { %v6541_v42 = vpop.permute.xlu1 %1636  ;;  %v6543_v52 = vpop.permute.xlu0 %1631  ;;  %v1487_v7 = vadd.f32 %v1451_v28, %v1194_v8  ;;  %v8244_v28 = vld [vmem:[#allocation83_spill] sm:$0xff] }
 0x1ee   : > { %v3118_v39 = vld [vmem:[#allocation2 + $0x12] ss:$2 sm:$0xff]  ;;  %v3120_v63 = vld [vmem:[#allocation2 + $0x13] ss:$2 sm:$0xff] }
 0x1ef   : > { %v3121_v53 = vmax.f32 %v3118_v39, %v3120_v63  ;;  %2813 = vperm.xlu1 %5439, %v2706_v57   ;;  %2808 = vperm.xlu0 %5438, %v2705_v24   ;;  %v1744_v57 = vmul.f32 %v6384_v0, %v8236_v19  ;;  %v8237_v24 = vld [vmem:[#allocation58_spill] sm:$0xff]  ;;  %v667_v63 = vld [vmem:[%s5858_s23 + $0xe9] sm:$0xff] }
 0x1f0   : > { %v1743_v39 = vmul.f32 %v6384_v0, %v8237_v24  ;;  %v669_v8 = vld [vmem:[%s5858_s23 + $0xf9] sm:$0xff]  ;;  %v8247_v24 = vld [vmem:[#allocation73_spill] sm:$0xff] }
 0x1f1   : > { %v3122_v11 = vmax.f32 %v3116_v49, %v3121_v53  ;;  %v6563_v58 = vpop.permute.xlu1 %2187  ;;  %v6565_v51 = vpop.permute.xlu0 %1641  ;;  %v8238_v49 = vld [vmem:[#allocation50_spill] sm:$0xff]  ;;  %v1780_v47 = vadd.f32 %v1744_v57, %v1487_v7  ;;  %v2038_v62 = vmul.f32 %v6403_v38, %v8247_v24  ;;  %v8248_v7 = vld [vmem:[#allocation85_spill] sm:$0xff] }
 0x1f2   : > { %v1453_v53 = vmul.f32 %v6359_v48, %v8238_v49  ;;  %v2622_v49 = vmul.f32 %v6436_v61, %v6422_v3 }
 0x1f3   : > { %817 = vperm.xlu1 %5439, %v666_v43   ;;  %3123 = vst.msk [vmem:[#allocation3 + $0xb] sm:$0xff] %vm3061_vm0, %v3122_v11  ;;  %812 = vperm.xlu0 %5438, %v665_v1   ;;  %v1452_v43 = vmul.f32 %v6359_v48, %v8239_v22  ;;  %v1486_v11 = vadd.f32 %v1450_v31, %v1193_v60  ;;  %v8240_v1 = vld [vmem:[#allocation70_spill] sm:$0xff] }
 0x1f4   : > { %v2037_v9 = vmul.f32 %v6403_v38, %v8240_v1  ;;  %v2330_v31 = vmul.f32 %v6420_v12, %v8244_v28  ;;  %v2329_v60 = vmul.f32 %v6420_v12, %v8245_v33  ;;  %v1489_v19 = vadd.f32 %v1453_v53, %v1196_v44  ;;  %v8249_v1 = vld [vmem:[#allocation86_spill] sm:$0xff] }
 0x1f5   : > { %v6590_v50 = vpop.permute.xlu1 %2197  ;;  %v6592_v59 = vpop.permute.xlu0 %2192  ;;  %v1779_v18 = vadd.f32 %v1743_v39, %v1486_v11  ;;  %v1488_v21 = vadd.f32 %v1452_v43, %v1195_v4  ;;  %v2623_v53 = vmul.f32 %v6436_v61, %v6450_v36  ;;  %v2332_v11 = vmul.f32 %v6420_v12, %v8248_v7  ;;  %v1249_v4 = vld [vmem:[%s5858_s23 + $0xda] sm:$0xff] }
 0x1f6   : > { %v2073_v39 = vadd.f32 %v2037_v9, %v1780_v47  ;;  %v1782_v22 = vadd.f32 %v1746_v16, %v1489_v19  ;;  %v2331_v30 = vmul.f32 %v6420_v12, %v8249_v1  ;;  %v2624_v36 = vmul.f32 %v6436_v61, %v6448_v40  ;;  %v2414_v33 = vld [vmem:[%s5858_s23 + $0xb5] sm:$0xff] }
 0x1f7   : > { %827 = vperm.xlu1 %5439, %v668_v2   ;;  %822 = vperm.xlu0 %5438, %v667_v63   ;;  %v2039_v2 = vmul.f32 %v6403_v38, %v8246_v5  ;;  %v2072_v63 = vadd.f32 %v2036_v17, %v1779_v18  ;;  %v1781_v43 = vadd.f32 %v1745_v25, %v1488_v21 }
 0x1f8   : > { %v2366_v9 = vadd.f32 %v2330_v31, %v2073_v39 }
 0x1f9   : > { %v6611_v34 = vpop.permute.xlu1 %2207  ;;  %v6613_v57 = vpop.permute.xlu0 %2202  ;;  %v2365_v17 = vadd.f32 %v2329_v60, %v2072_v63  ;;  %v2075_v44 = vadd.f32 %v2039_v2, %v1782_v22  ;;  %v2074_v3 = vadd.f32 %v2038_v62, %v1781_v43  ;;  %v2415_v43 = vld [vmem:[%s5858_s23 + $0xbd] sm:$0xff] }
 0x1fa   : > { %v2659_v25 = vadd.f32 %v2623_v53, %v2366_v9  ;;  %v2418_v9 = vld [vmem:[%s5858_s23 + $0xd5] sm:$0xff] }
 0x1fb   : > { %1378 = vperm.xlu1 %5439, %v6488_v32   ;;  %832 = vperm.xlu0 %5438, %v669_v8   ;;  %v2625_v32 = vmul.f32 %v6436_v61, %v6474_v6  ;;  %v2658_v13 = vadd.f32 %v2622_v49, %v2365_v17  ;;  %v2368_v28 = vadd.f32 %v2332_v11, %v2075_v44  ;;  %v1250_v8 = vld [vmem:[%s5858_s23 + $0xe2] sm:$0xff] }
 0x1fc   : > { %v2367_v31 = vadd.f32 %v2331_v30, %v2074_v3  ;;  %v2417_v3 = vld [vmem:[%s5858_s23 + $0xcd] sm:$0xff] }
 0x1fd   : > { %v2759_v20 = vpop.permute.xlu1 %2758  ;;  %v2754_v16 = vpop.permute.xlu0 %2753  ;;  %v2661_v19 = vadd.f32 %v2625_v32, %v2368_v28 }
 0x1fe   : > { %v2916_v47 = vmul.f32 %v6463_v37, %v2759_v20  ;;  %v2915_v18 = vmul.f32 %v6463_v37, %v2754_v16  ;;  %v2660_v6 = vadd.f32 %v2624_v36, %v2367_v31 }
 0x1ff   : > { %1388 = vperm.xlu1 %5439, %v1249_v4   ;;  %1383 = vperm.xlu0 %5438, %v6500_v15   ;;  %v2416_v15 = vld [vmem:[%s5858_s23 + $0xc5] sm:$0xff] }
 0x200   : > { %v2952_v60 = vadd.f32 %v2916_v47, %v2659_v25  ;;  %v2951_v40 = vadd.f32 %v2915_v18, %v2658_v13  ;;  %v6661_v47 = vld [vmem:[%s5858_s23 + $0xf2] sm:$0xff]  ;;  %v6664_v18 = vld [vmem:[%s5858_s23 + $0xea] sm:$0xff] }
 0x201   : > { %v2769_v21 = vpop.permute.xlu1 %2768  ;;  %v2764_v5 = vpop.permute.xlu0 %2763 }
 0x202   : > { %v2995_v2 = vadd.f32 %v6485_v29, %v2952_v60  ;;  %v2994_v24 = vadd.f32 %v6485_v29, %v2951_v40  ;;  %v2918_v62 = vmul.f32 %v6463_v37, %v2769_v21  ;;  %v2917_v39 = vmul.f32 %v6463_v37, %v2764_v5 }
 0x203   : > { %2525 = vperm.xlu1 %5439, %v2414_v33   ;;  %1393 = vperm.xlu0 %5438, %v1250_v8  }
 0x204   : > { %v3031_v63 = vmax.f32 %v2995_v2, 0.0  ;;  %v3030_v49 = vmax.f32 %v2994_v24, 0.0  ;;  %v2954_v53 = vadd.f32 %v2918_v62, %v2661_v19  ;;  %v2953_v22 = vadd.f32 %v2917_v39, %v2660_v6  ;;  %v6674_v19 = vld [vmem:[%s5858_s23 + $0xfa] sm:$0xff] }
 0x205   : > { %v6640_v7 = vpop.permute.xlu1 %1358  ;;  %v6642_v11 = vpop.permute.xlu0 %1353  ;;  %v1542_v2 = vld [vmem:[%s5858_s23 + $0xdb] sm:$0xff]  ;;  %v1541_v24 = vld [vmem:[%s5858_s23 + $0xd3] sm:$0xff] }
 0x206   : > { %8250 = vst [vmem:[#allocation48_spill] sm:$0xff] %v6640_v7  ;;  %3068 = vst.msk [vmem:[#allocation2 + $0x30] sm:$0xff] %vm3061_vm0, %v3031_v63  ;;  %v2997_v1 = vadd.f32 %v6485_v29, %v2954_v53  ;;  %v2996_v30 = vadd.f32 %v6485_v29, %v2953_v22  ;;  %v1543_v63 = vld [vmem:[%s5858_s23 + $0xe3] sm:$0xff] }
 0x207   : > { %3067 = vst.msk [vmem:[#allocation2 + $0x28] sm:$0xff] %vm3061_vm0, %v3030_v49  ;;  %2535 = vperm.xlu1 %5439, %v2416_v15   ;;  %2530 = vperm.xlu0 %5438, %v2415_v43   ;;  %v2707_v15 = vld [vmem:[%s5858_s23 + $0xb6] sm:$0xff]  ;;  %v2709_v22 = vld [vmem:[%s5858_s23 + $0xc6] sm:$0xff]  ;;  %v2708_v43 = vld [vmem:[%s5858_s23 + $0xbe] sm:$0xff] }
 0x208   : > { %v3033_v17 = vmax.f32 %v2997_v1, 0.0  ;;  %v3032_v44 = vmax.f32 %v2996_v30, 0.0  ;;  %v8269_v7 = vld [vmem:[#allocation64_spill] sm:$0xff] }
 0x209   : > { %v6650_v36 = vpop.permute.xlu1 %1368  ;;  %v6652_v32 = vpop.permute.xlu0 %1363 }
 0x20a   : > { %8251 = vst [vmem:[#allocation49_spill] sm:$0xff] %v6650_v36  ;;  %8252 = vst [vmem:[#allocation12_spill] sm:$0xff] %v6652_v32 }
 0x20b   : > { %3070 = vst.msk [vmem:[#allocation2 + $0x40] sm:$0xff] %vm3061_vm0, %v3033_v17  ;;  %3069 = vst.msk [vmem:[#allocation2 + $0x38] sm:$0xff] %vm3061_vm0, %v3032_v44  ;;  %2545 = vperm.xlu1 %5439, %v2418_v9   ;;  %2540 = vperm.xlu0 %5438, %v2417_v3   ;;  %v8256_v9 = vld [vmem:[#allocation41_spill] sm:$0xff]  ;;  %v8257_v44 = vld [vmem:[#allocation44_spill] sm:$0xff] }
 0x20c   : > { %v868_v17 = vmul.f32 %v6328_v27, %v8256_v9  ;;  %v870_v3 = vmul.f32 %v6328_v27, %v8257_v44  ;;  %v8264_v9 = vld [vmem:[#allocation47_spill] sm:$0xff] }
 0x20d   : > { %v6656_v20 = vpop.permute.xlu1 %1919  ;;  %v6658_v16 = vpop.permute.xlu0 %1373  ;;  %v871_v44 = vmul.f32 %v6328_v27, %v8264_v9  ;;  %v8271_v9 = vld [vmem:[#allocation54_spill] sm:$0xff] }
 0x20e   : > { %8253 = vst [vmem:[#allocation14_spill] sm:$0xff] %v6658_v16  ;;  %v3125_v13 = vld [vmem:[#allocation2 + $0x24] ss:$2 sm:$0xff]  ;;  %v3127_v25 = vld [vmem:[#allocation2 + $0x25] ss:$2 sm:$0xff] }
 0x20f   : > { %1110 = vperm.xlu1 %5439, %v1250_v8   ;;  %1105 = vperm.xlu0 %5438, %v1249_v4   ;;  %v3128_v40 = vmax.f32 %v3125_v13, %v3127_v25  ;;  %v1540_v4 = vld [vmem:[%s5858_s23 + $0xcb] sm:$0xff]  ;;  %v2711_v13 = vld [vmem:[%s5858_s23 + $0xd6] sm:$0xff] }
 0x210   : > { %v8258_v25 = vld [vmem:[#allocation13_spill] sm:$0xff] }
 0x211   : > { %v6666_v33 = vpop.permute.xlu1 %1929  ;;  %v6668_v60 = vpop.permute.xlu0 %1924 }
 0x212   : > { %v3130_v28 = vld [vmem:[#allocation2 + $0x36] ss:$2 sm:$0xff]  ;;  %v3132_v31 = vld [vmem:[#allocation2 + $0x37] ss:$2 sm:$0xff] }
 0x213   : > { %v3133_v6 = vmax.f32 %v3130_v28, %v3132_v31  ;;  %1120 = vperm.xlu1 %5439, %v6661_v47   ;;  %1115 = vperm.xlu0 %5438, %v6664_v18   ;;  %v575_v28 = vmul.f32 %v6333_v54, %v8258_v25  ;;  %v8259_v31 = vld [vmem:[#allocation45_spill] sm:$0xff] }
 0x215   : > { %v3134_v8 = vmax.f32 %v3128_v40, %v3133_v6  ;;  %v6676_v21 = vpop.permute.xlu1 %2480  ;;  %v6678_v5 = vpop.permute.xlu0 %1934  ;;  %v869_v40 = vmul.f32 %v6328_v27, %v8259_v31  ;;  %v8260_v6 = vld [vmem:[#allocation52_spill] sm:$0xff]  ;;  %v904_v16 = vadd.f32 %v868_v17, %v575_v28 }
 0x217   : > { %1671 = vperm.xlu1 %5439, %v1540_v4   ;;  %3135 = vst.msk [vmem:[#allocation3 + $0x15] sm:$0xff] %vm3061_vm0, %v3134_v8  ;;  %1125 = vperm.xlu0 %5438, %v6674_v19   ;;  %v1161_v4 = vmul.f32 %v6340_v14, %v8260_v6  ;;  %v2710_v8 = vld [vmem:[%s5858_s23 + $0xce] sm:$0xff] }
 0x219   : > { %v6684_v62 = vpop.permute.xlu1 %2490  ;;  %v6686_v39 = vpop.permute.xlu0 %2485  ;;  %v1197_v28 = vadd.f32 %v1161_v4, %v904_v16  ;;  %v8279_v4 = vld [vmem:[#allocation97_spill] sm:$0xff] }
 0x21b   : > { %1681 = vperm.xlu1 %5439, %v1542_v2   ;;  %1676 = vperm.xlu0 %5438, %v1541_v24   ;;  %v8261_v2 = vld [vmem:[#allocation15_spill] sm:$0xff] }
 0x21c   : > { %v577_v24 = vmul.f32 %v6333_v54, %v8261_v2  ;;  %v8268_v2 = vld [vmem:[#allocation53_spill] sm:$0xff] }
 0x21d   : > { %v6690_v49 = vpop.permute.xlu1 %2500  ;;  %v6692_v53 = vpop.permute.xlu0 %2495  ;;  %v1163_v36 = vmul.f32 %v6340_v14, %v8268_v2  ;;  %v1164_v2 = vmul.f32 %v6340_v14, %v8273_v23  ;;  %v8278_v23 = vld [vmem:[#allocation68_spill] sm:$0xff] }
 0x21f   : > { %2818 = vperm.xlu1 %5439, %v2707_v15   ;;  %1686 = vperm.xlu0 %5438, %v1543_v63   ;;  %v8262_v15 = vld [vmem:[#allocation16_spill] sm:$0xff] }
 0x220   : > { %v576_v63 = vmul.f32 %v6333_v54, %v8262_v15  ;;  %v1454_v15 = vmul.f32 %v6359_v48, %v8269_v7  ;;  %v1747_v7 = vmul.f32 %v6384_v0, %v8274_v45  ;;  %v1458_v45 = vmul.f32 %v6359_v48, %v8278_v23  ;;  %v672_v23 = vld [vmem:[%s5858_s23 + $0x111] sm:$0xff] }
 0x221   : > { %v6696_v1 = vpop.permute.xlu1 %1651  ;;  %v6698_v30 = vpop.permute.xlu0 %1646 }
 0x222   : > { %8254 = vst [vmem:[#allocation42_spill] sm:$0xff] %v6696_v1  ;;  %8255 = vst [vmem:[#allocation43_spill] sm:$0xff] %v6698_v30  ;;  %v8267_v1 = vld [vmem:[#allocation17_spill] sm:$0xff]  ;;  %v905_v17 = vadd.f32 %v869_v40, %v576_v63  ;;  %v2040_v63 = vmul.f32 %v6403_v38, %v8279_v4 }
 0x223   : > { %2828 = vperm.xlu1 %5439, %v2709_v22   ;;  %2823 = vperm.xlu0 %5438, %v2708_v43   ;;  %v8263_v22 = vld [vmem:[#allocation46_spill] sm:$0xff]  ;;  %v579_v6 = vmul.f32 %v6333_v54, %v8267_v1  ;;  %v671_v1 = vld [vmem:[%s5858_s23 + $0x109] sm:$0xff] }
 0x224   : > { %v872_v43 = vmul.f32 %v6328_v27, %v8263_v22  ;;  %v8270_v22 = vld [vmem:[#allocation18_spill] sm:$0xff]  ;;  %v906_v27 = vadd.f32 %v870_v3, %v577_v24 }
 0x225   : > { %v6720_v25 = vpop.permute.xlu1 %1661  ;;  %v6722_v31 = vpop.permute.xlu0 %1656  ;;  %v578_v32 = vmul.f32 %v6333_v54, %v8270_v22  ;;  %v8275_v3 = vld [vmem:[#allocation66_spill] sm:$0xff]  ;;  %v8276_v22 = vld [vmem:[#allocation67_spill] sm:$0xff] }
 0x226   : > { %8265 = vst [vmem:[#allocation57_spill] sm:$0xff] %v6720_v25  ;;  %8266 = vst [vmem:[#allocation58_spill] sm:$0xff] %v6722_v31  ;;  %v1162_v25 = vmul.f32 %v6340_v14, %v8271_v9  ;;  %v8272_v31 = vld [vmem:[#allocation55_spill] sm:$0xff]  ;;  %v908_v30 = vadd.f32 %v872_v43, %v579_v6  ;;  %v1456_v24 = vmul.f32 %v6359_v48, %v8275_v3 }
 0x227   : > { %2838 = vperm.xlu1 %5439, %v2711_v13   ;;  %v1165_v26 = vmul.f32 %v6340_v14, %v8272_v31  ;;  %2833 = vperm.xlu0 %5438, %v2710_v8   ;;  %v670_v13 = vld [vmem:[%s5858_s23 + $0x101] sm:$0xff]  ;;  %v907_v54 = vadd.f32 %v871_v44, %v578_v32  ;;  %v1455_v31 = vmul.f32 %v6359_v48, %v8276_v22  ;;  %v8280_v44 = vld [vmem:[#allocation69_spill] sm:$0xff]  ;;  %v673_v22 = vld [vmem:[%s5858_s23 + $0x119] sm:$0x3f] }
 0x228   : > { %v1199_v16 = vadd.f32 %v1163_v36, %v906_v27  ;;  %v1490_v14 = vadd.f32 %v1454_v15, %v1197_v28  ;;  %v1198_v32 = vadd.f32 %v1162_v25, %v905_v17  ;;  %v1457_v6 = vmul.f32 %v6359_v48, %v8280_v44  ;;  %v8281_v9 = vld [vmem:[#allocation79_spill] sm:$0xff]  ;;  %v8282_v15 = vld [vmem:[#allocation80_spill] sm:$0xff] }
 0x229   : > { %v6746_v8 = vpop.permute.xlu1 %2212  ;;  %v6748_v40 = vpop.permute.xlu0 %1666  ;;  %v1201_v43 = vadd.f32 %v1165_v26, %v908_v30  ;;  %v1749_v3 = vmul.f32 %v6384_v0, %v8281_v9  ;;  %v1748_v27 = vmul.f32 %v6384_v0, %v8282_v15  ;;  %v2333_v28 = vmul.f32 %v6420_v12, %v6563_v58  ;;  %v8283_v26 = vld [vmem:[#allocation82_spill] sm:$0xff]  ;;  %v8284_v48 = vld [vmem:[#allocation99_spill] sm:$0xff] }
 0x22a   : > { %8277 = vst [vmem:[#allocation50_spill] sm:$0xff] %v6748_v40  ;;  %v1200_v40 = vadd.f32 %v1164_v2, %v907_v54  ;;  %v1783_v36 = vadd.f32 %v1747_v7, %v1490_v14  ;;  %v1491_v25 = vadd.f32 %v1455_v31, %v1198_v32  ;;  %v1750_v30 = vmul.f32 %v6384_v0, %v8283_v26  ;;  %v8285_v7 = vld [vmem:[#allocation96_spill] sm:$0xff]  ;;  %v8287_v15 = vld [vmem:[#allocation98_spill] sm:$0xff] }
 0x22b   : > { %842 = vperm.xlu1 %5439, %v671_v1   ;;  %837 = vperm.xlu0 %5438, %v670_v13   ;;  %v1492_v1 = vadd.f32 %v1456_v24, %v1199_v16  ;;  %v2042_v17 = vmul.f32 %v6403_v38, %v8284_v48  ;;  %v1494_v2 = vadd.f32 %v1458_v45, %v1201_v43  ;;  %v8286_v16 = vld [vmem:[#allocation81_spill] sm:$0xff] }
 0x22c   : > { %v2041_v54 = vmul.f32 %v6403_v38, %v8285_v7  ;;  %v2076_v14 = vadd.f32 %v2040_v63, %v1783_v36  ;;  %v2626_v58 = vmul.f32 %v6436_v61, %v6676_v21  ;;  %v1493_v24 = vadd.f32 %v1457_v6, %v1200_v40 }
 0x22d   : > { %v6768_v4 = vpop.permute.xlu1 %2222  ;;  %v6770_v13 = vpop.permute.xlu0 %2217  ;;  %v1785_v31 = vadd.f32 %v1749_v3, %v1492_v1  ;;  %v1751_v32 = vmul.f32 %v6384_v0, %v8286_v16  ;;  %v2335_v44 = vmul.f32 %v6420_v12, %v6590_v50  ;;  %v1784_v9 = vadd.f32 %v1748_v27, %v1491_v25 }
 0x22e   : > { %v2043_v45 = vmul.f32 %v6403_v38, %v8287_v15  ;;  %v2369_v43 = vadd.f32 %v2333_v28, %v2076_v14  ;;  %v2334_v63 = vmul.f32 %v6420_v12, %v6592_v59  ;;  %v1786_v36 = vadd.f32 %v1750_v30, %v1493_v24  ;;  %v1255_v24 = vld [vmem:[%s5858_s23 + $0x10a] sm:$0xff] }
 0x22f   : > { %852 = vperm.xlu1 %5439, %v673_v22   ;;  %847 = vperm.xlu0 %5438, %v672_v23   ;;  %v2078_v21 = vadd.f32 %v2042_v17, %v1785_v31  ;;  %v2044_v40 = vmul.f32 %v6403_v38, %v6424_v55  ;;  %v2628_v0 = vmul.f32 %v6436_v61, %v6684_v62  ;;  %v1254_v62 = vld [vmem:[%s5858_s23 + $0x102] sm:$0xff] }
 0x230   : > { %v2077_v3 = vadd.f32 %v2041_v54, %v1784_v9  ;;  %v2662_v22 = vadd.f32 %v2626_v58, %v2369_v43  ;;  %v2627_v27 = vmul.f32 %v6436_v61, %v6686_v39  ;;  %v1787_v59 = vadd.f32 %v1751_v32, %v1494_v2 }
 0x231   : > { %v2774_v6 = vpop.permute.xlu1 %2773  ;;  %v6788_v50 = vpop.permute.xlu0 %2227  ;;  %v2371_v23 = vadd.f32 %v2335_v44, %v2078_v21  ;;  %v2337_v38 = vmul.f32 %v6420_v12, %v6611_v34  ;;  %v2336_v55 = vmul.f32 %v6420_v12, %v6613_v57  ;;  %v2079_v1 = vadd.f32 %v2043_v45, %v1786_v36 }
 0x232   : > { %v2919_v28 = vmul.f32 %v6463_v37, %v2774_v6  ;;  %v2370_v25 = vadd.f32 %v2334_v63, %v2077_v3  ;;  %v2080_v30 = vadd.f32 %v2044_v40, %v1787_v59  ;;  %v2629_v48 = vmul.f32 %v6436_v61, %v6692_v53  ;;  %v1836_v3 = vld [vmem:[%s5858_s23 + $0xe4] sm:$0xff] }
 0x233   : > { %1403 = vperm.xlu1 %5439, %v6661_v47   ;;  %1398 = vperm.xlu0 %5438, %v6664_v18   ;;  %v2664_v39 = vadd.f32 %v2628_v0, %v2371_v23  ;;  %v2630_v47 = vmul.f32 %v6436_v61, %v6690_v49  ;;  %v2372_v54 = vadd.f32 %v2336_v55, %v2079_v1  ;;  %v1544_v55 = vld [vmem:[%s5858_s23 + $0xeb] sm:$0xff]  ;;  %v966_v1 = vld [vmem:[%s5858_s23 + $0x11a] sm:$0x3f] }
 0x234   : > { %v2955_v26 = vadd.f32 %v2919_v28, %v2662_v22  ;;  %v2663_v2 = vadd.f32 %v2627_v27, %v2370_v25  ;;  %v2373_v7 = vadd.f32 %v2337_v38, %v2080_v30  ;;  %v965_v28 = vld [vmem:[%s5858_s23 + $0x112] sm:$0xff] }
 0x235   : > { %v2784_v17 = vpop.permute.xlu1 %2783  ;;  %v2779_v34 = vpop.permute.xlu0 %2778  ;;  %v2665_v53 = vadd.f32 %v2629_v48, %v2372_v54  ;;  %v1546_v48 = vld [vmem:[%s5858_s23 + $0xfb] sm:$0xff] }
 0x236   : > { %v2998_v12 = vadd.f32 %v6485_v29, %v2955_v26  ;;  %v2921_v57 = vmul.f32 %v6463_v37, %v2784_v17  ;;  %v2920_v18 = vmul.f32 %v6463_v37, %v2779_v34  ;;  %v2666_v61 = vadd.f32 %v2630_v47, %v2373_v7  ;;  %v1545_v34 = vld [vmem:[%s5858_s23 + $0xf3] sm:$0xff] }
 0x237   : > { %1413 = vperm.xlu1 %5439, %v1254_v62   ;;  %1408 = vperm.xlu0 %5438, %v6674_v19   ;;  %v1835_v19 = vld [vmem:[%s5858_s23 + $0xdc] sm:$0xff] }
 0x238   : > { %v3034_v14 = vmax.f32 %v2998_v12, 0.0  ;;  %v2957_v49 = vadd.f32 %v2921_v57, %v2664_v39  ;;  %v2956_v58 = vadd.f32 %v2920_v18, %v2663_v2  ;;  %v1548_v57 = vld [vmem:[%s5858_s23 + $0x10b] sm:$0xff]  ;;  %v1547_v18 = vld [vmem:[%s5858_s23 + $0x103] sm:$0xff] }
 0x239   : > { %v2794_v31 = vpop.permute.xlu1 %2793  ;;  %v2789_v16 = vpop.permute.xlu0 %2788 }
 0x23a   : > { %3071 = vst.msk [vmem:[#allocation2 + $0x48] sm:$0xff] %vm3061_vm0, %v3034_v14  ;;  %v3000_v32 = vadd.f32 %v6485_v29, %v2957_v49  ;;  %v2999_v44 = vadd.f32 %v6485_v29, %v2956_v58  ;;  %v2923_v9 = vmul.f32 %v6463_v37, %v2794_v31  ;;  %v2922_v15 = vmul.f32 %v6463_v37, %v2789_v16  ;;  %v6861_v58 = vld [vmem:[%s5858_s23 + $0xf4] sm:$0xff]  ;;  %v6873_v31 = vld [vmem:[%s8119_s1 + $0x1] ss:$0 sm:$0xff] }
 0x23b   : > { %1964 = vperm.xlu1 %5439, %v6523_v46   ;;  %1418 = vperm.xlu0 %5438, %v1255_v24   ;;  %v8289_v16 = vld [vmem:[#allocation63_spill] sm:$0xff] }
 0x23c   : > { %v3036_v45 = vmax.f32 %v3000_v32, 0.0  ;;  %v3035_v43 = vmax.f32 %v2999_v44, 0.0  ;;  %v2959_v63 = vadd.f32 %v2923_v9, %v2666_v61  ;;  %v2958_v36 = vadd.f32 %v2922_v15, %v2665_v53  ;;  %v8290_v44 = vld [vmem:[#allocation61_spill] sm:$0xff]  ;;  %v1257_v15 = vld [vmem:[%s5858_s23 + $0x11a] sm:$0xff] }
 0x23d   : > { %v6816_v21 = vpop.permute.xlu1 %797  ;;  %v6818_v40 = vpop.permute.xlu0 %792  ;;  %v874_v32 = vmul.f32 %v6873_v31, %v8289_v16  ;;  %v873_v9 = vmul.f32 %v6873_v31, %v8290_v44  ;;  %v1259_v16 = vld [vmem:[%s5858_s23 + $0x12a] sm:$0x3f] }
 0x23e   : > { %3073 = vst.msk [vmem:[#allocation2 + $0x58] sm:$0xff] %vm3061_vm0, %v3036_v45  ;;  %3072 = vst.msk [vmem:[#allocation2 + $0x50] sm:$0xff] %vm3061_vm0, %v3035_v43  ;;  %v3002_v37 = vadd.f32 %v6485_v29, %v2959_v63  ;;  %v3001_v46 = vadd.f32 %v6485_v29, %v2958_v36  ;;  %v8291_v45 = vld [vmem:[#allocation19_spill] sm:$0xff]  ;;  %v6892_v63 = vld [vmem:[%s8119_s1 + $0x2] ss:$0 sm:$0xff] }
 0x23f   : > { %1974 = vperm.xlu1 %5439, %v1835_v19   ;;  %1969 = vperm.xlu0 %5438, %v6520_v35   ;;  %v8292_v36 = vld [vmem:[#allocation76_spill] sm:$0xff] }
 0x240   : > { %v3038_v0 = vmax.f32 %v3002_v37, 0.0  ;;  %v3037_v6 = vmax.f32 %v3001_v46, 0.0  ;;  %v1167_v37 = vmul.f32 %v6892_v63, %v8292_v36  ;;  %v8293_v46 = vld [vmem:[#allocation20_spill] sm:$0xff] }
 0x241   : > { %v6826_v22 = vpop.permute.xlu1 %807  ;;  %v6828_v27 = vpop.permute.xlu0 %802 }
 0x242   : > { %3075 = vst.msk [vmem:[#allocation2 + $0x68] sm:$0xff] %vm3061_vm0, %v3038_v0  ;;  %3074 = vst.msk [vmem:[#allocation2 + $0x60] sm:$0xff] %vm3061_vm0, %v3037_v6  ;;  %v8294_v6 = vld [vmem:[#allocation74_spill] sm:$0xff] }
 0x243   : > { %1130 = vperm.xlu1 %5439, %v1254_v62   ;;  %1979 = vperm.xlu0 %5438, %v1836_v3  }
 0x245   : > { %v6833_v59 = vpop.permute.xlu1 %1944  ;;  %v6835_v35 = vpop.permute.xlu0 %1939  ;;  %v3137_v23 = vld [vmem:[#allocation2 + $0x48] ss:$2 sm:$0xff]  ;;  %v3139_v38 = vld [vmem:[#allocation2 + $0x49] ss:$2 sm:$0xff] }
 0x246   : > { %v3140_v39 = vmax.f32 %v3137_v23, %v3139_v38 }
 0x247   : > { %1140 = vperm.xlu1 %5439, %v965_v28   ;;  %1135 = vperm.xlu0 %5438, %v1255_v24   ;;  %v6864_v24 = vld [vmem:[%s5858_s23 + $0xec] sm:$0xff] }
 0x249   : > { %v3142_v25 = vld [vmem:[#allocation2 + $0x5a] ss:$2 sm:$0xff]  ;;  %v3144_v26 = vld [vmem:[#allocation2 + $0x5b] ss:$2 sm:$0xff]  ;;  %v6839_v30 = vpop.permute.xlu1 %1954  ;;  %v6841_v62 = vpop.permute.xlu0 %1949 }
 0x24a   : > { %v3145_v47 = vmax.f32 %v3142_v25, %v3144_v26  ;;  %v6907_v25 = vld [vmem:[%s8119_s1 + $0x3] ss:$0 sm:$0xff] }
 0x24b   : > { %1691 = vperm.xlu1 %5439, %v1544_v55   ;;  %1145 = vperm.xlu0 %5438, %v966_v1   ;;  %v8295_v55 = vld [vmem:[#allocation65_spill] sm:$0xff]  ;;  %v8296_v26 = vld [vmem:[#allocation92_spill] sm:$0xff] }
 0x24c   : > { %v3146_v17 = vmax.f32 %v3140_v39, %v3145_v47  ;;  %v876_v1 = vmul.f32 %v6873_v31, %v8295_v55  ;;  %v1460_v39 = vmul.f32 %v6907_v25, %v8296_v26  ;;  %v8302_v55 = vld [vmem:[#allocation75_spill] sm:$0xff] }
 0x24d   : > { %v6845_v2 = vpop.permute.xlu1 %2505  ;;  %v6847_v12 = vpop.permute.xlu0 %1959  ;;  %v1168_v26 = vmul.f32 %v6892_v63, %v8302_v55  ;;  %v8304_v55 = vld [vmem:[#allocation95_spill] sm:$0xff] }
 0x24e   : > { %3147 = vst.msk [vmem:[#allocation3 + $0x1f] sm:$0xff] %vm3061_vm0, %v3146_v17  ;;  %v8297_v17 = vld [vmem:[#allocation62_spill] sm:$0xff] }
 0x24f   : > { %1701 = vperm.xlu1 %5439, %v1546_v48   ;;  %1696 = vperm.xlu0 %5438, %v1545_v34   ;;  %v875_v34 = vmul.f32 %v6873_v31, %v8297_v17 }
 0x251   : > { %v6852_v7 = vpop.permute.xlu1 %2515  ;;  %v6854_v54 = vpop.permute.xlu0 %2510 }
 0x253   : > { %1711 = vperm.xlu1 %5439, %v1548_v57   ;;  %1706 = vperm.xlu0 %5438, %v1547_v18   ;;  %v8298_v57 = vld [vmem:[#allocation93_spill] sm:$0xff] }
 0x254   : > { %v1459_v18 = vmul.f32 %v6907_v25, %v8298_v57 }
 0x255   : > { %v6856_v14 = vpop.permute.xlu1 %1085  ;;  %v6858_v49 = vpop.permute.xlu0 %2520 }
 0x257   : > { %2262 = vperm.xlu1 %5439, %v1836_v3   ;;  %2257 = vperm.xlu0 %5438, %v1835_v19   ;;  %v6885_v19 = vld [vmem:[%s8119_s1] ss:$0 sm:$0xff]  ;;  %v1166_v3 = vmul.f32 %v6892_v63, %v8294_v6 }
 0x258   : > { %v581_v43 = vmul.f32 %v6885_v19, %v8291_v45  ;;  %v580_v0 = vmul.f32 %v6885_v19, %v8293_v46  ;;  %v1258_v46 = vld [vmem:[%s5858_s23 + $0x122] sm:$0xff] }
 0x259   : > { %v6866_v61 = vpop.permute.xlu1 %1095  ;;  %v6868_v53 = vpop.permute.xlu0 %1090 }
 0x25a   : > { %8288 = vst [vmem:[#allocation51_spill] sm:$0xff] %v6866_v61  ;;  %v910_v38 = vadd.f32 %v874_v32, %v581_v43  ;;  %v909_v48 = vadd.f32 %v873_v9, %v580_v0  ;;  %v8299_v32 = vld [vmem:[#allocation21_spill] sm:$0xff]  ;;  %v8300_v43 = vld [vmem:[#allocation78_spill] sm:$0xff] }
 0x25b   : > { %2272 = vperm.xlu1 %5439, %v6861_v58   ;;  %2267 = vperm.xlu0 %5438, %v6864_v24   ;;  %v583_v44 = vmul.f32 %v6885_v19, %v8299_v32  ;;  %v1169_v36 = vmul.f32 %v6892_v63, %v8300_v43  ;;  %v8301_v0 = vld [vmem:[#allocation22_spill] sm:$0xff] }
 0x25c   : > { %v1203_v45 = vadd.f32 %v1167_v37, %v910_v38  ;;  %v1202_v6 = vadd.f32 %v1166_v3, %v909_v48  ;;  %v8303_v32 = vld [vmem:[#allocation94_spill] sm:$0xff] }
 0x25d   : > { %v912_v17 = vadd.f32 %v876_v1, %v583_v44  ;;  %v1462_v43 = vmul.f32 %v6907_v25, %v8303_v32  ;;  %v1461_v1 = vmul.f32 %v6907_v25, %v8304_v55 }
 0x25e   : > { %v6900_v23 = vpop.permute.xlu1 %2232  ;;  %v6911_v47 = vpop.permute.xlu0 %1100  ;;  %v1496_v57 = vadd.f32 %v1460_v39, %v1203_v45 }
 0x25f   : > { %1428 = vperm.xlu1 %5439, %v1257_v15   ;;  %1423 = vperm.xlu0 %5438, %v965_v28   ;;  %v6925_v15 = vld [vmem:[%s8119_s1 + $0x4] ss:$0 sm:$0xff]  ;;  %v582_v28 = vmul.f32 %v6885_v19, %v8301_v0  ;;  %v1205_v44 = vadd.f32 %v1169_v36, %v912_v17 }
 0x260   : > { %v1753_v9 = vmul.f32 %v6925_v15, %v6543_v52  ;;  %v1752_v37 = vmul.f32 %v6925_v15, %v6535_v10  ;;  %v6943_v52 = vld [vmem:[%s8119_s1 + $0x5] ss:$0 sm:$0xff]  ;;  %v1495_v10 = vadd.f32 %v1459_v18, %v1202_v6  ;;  %v1755_v32 = vmul.f32 %v6925_v15, %v6565_v51 }
 0x261   : > { %v2046_v3 = vmul.f32 %v6943_v52, %v6668_v60  ;;  %v911_v0 = vadd.f32 %v875_v34, %v582_v28  ;;  %v2045_v39 = vmul.f32 %v6943_v52, %v6656_v20  ;;  %v6958_v60 = vld [vmem:[%s8119_s1 + $0x6] ss:$0 sm:$0xff]  ;;  %v1754_v20 = vmul.f32 %v6925_v15, %v6541_v42 }
 0x262   : > { %v6936_v38 = vpop.permute.xlu1 %2242  ;;  %v6947_v48 = vpop.permute.xlu0 %2237  ;;  %v1789_v45 = vadd.f32 %v1753_v9, %v1496_v57  ;;  %v2339_v34 = vmul.f32 %v6958_v60, %v6770_v13  ;;  %v2338_v36 = vmul.f32 %v6958_v60, %v6746_v8  ;;  %v1498_v51 = vadd.f32 %v1462_v43, %v1205_v44  ;;  %v6973_v13 = vld [vmem:[%s8119_s1 + $0x7] ss:$0 sm:$0xff] }
 0x263   : > { %1438 = vperm.xlu1 %5439, %v1259_v16   ;;  %1433 = vperm.xlu0 %5438, %v1258_v46   ;;  %v1204_v18 = vadd.f32 %v1168_v26, %v911_v0  ;;  %v1788_v16 = vadd.f32 %v1752_v37, %v1495_v10  ;;  %v2048_v28 = vmul.f32 %v6943_v52, %v6678_v5  ;;  %v6986_v17 = vld [vmem:[%s5858_s23 + $0x104] sm:$0xff] }
 0x264   : > { %v2082_v46 = vadd.f32 %v2046_v3, %v1789_v45  ;;  %v2632_v6 = vmul.f32 %v6973_v13, %v6854_v54  ;;  %v2047_v37 = vmul.f32 %v6943_v52, %v6666_v33  ;;  %v2631_v5 = vmul.f32 %v6973_v13, %v6845_v2  ;;  %v6991_v3 = vld [vmem:[%s5858_s23 + $0xfc] sm:$0xff] }
 0x265   : > { %v1497_v8 = vadd.f32 %v1461_v1, %v1204_v18  ;;  %v2081_v26 = vadd.f32 %v2045_v39, %v1788_v16  ;;  %v1791_v57 = vadd.f32 %v1755_v32, %v1498_v51  ;;  %v2341_v54 = vmul.f32 %v6958_v60, %v6788_v50  ;;  %v7000_v1 = vld [vmem:[%s8119_s1 + $0x8] ss:$0 sm:$0xff]  ;;  %v1841_v16 = vld [vmem:[%s5858_s23 + $0x10c] sm:$0xff] }
 0x266   : > { %v6966_v9 = vpop.permute.xlu1 %2252  ;;  %v6977_v42 = vpop.permute.xlu0 %2247  ;;  %v2375_v43 = vadd.f32 %v2339_v34, %v2082_v46  ;;  %v2340_v33 = vmul.f32 %v6958_v60, %v6768_v4  ;;  %v2633_v4 = vmul.f32 %v6973_v13, %v6852_v7 }
 0x267   : > { %1989 = vperm.xlu1 %5439, %v6861_v58   ;;  %1984 = vperm.xlu0 %5438, %v6864_v24   ;;  %v1790_v58 = vadd.f32 %v1754_v20, %v1497_v8  ;;  %v2374_v0 = vadd.f32 %v2338_v36, %v2081_v26  ;;  %v2084_v2 = vadd.f32 %v2048_v28, %v1791_v57  ;;  %v7015_v26 = vld [vmem:[%s8120_s2] ss:$0 sm:$0xff]  ;;  %v2421_v57 = vld [vmem:[%s5858_s23 + $0xed] sm:$0xff] }
 0x268   : > { %v2668_v55 = vadd.f32 %v2632_v6, %v2375_v43  ;;  %v2634_v24 = vmul.f32 %v6973_v13, %v6858_v49  ;;  %v2419_v49 = vld [vmem:[%s5858_s23 + $0xdd] sm:$0xff] }
 0x269   : > { %v2083_v44 = vadd.f32 %v2047_v37, %v1790_v58  ;;  %v2667_v45 = vadd.f32 %v2631_v5, %v2374_v0  ;;  %v2377_v34 = vadd.f32 %v2341_v54, %v2084_v2  ;;  %v2420_v54 = vld [vmem:[%s5858_s23 + $0xe5] sm:$0xff] }
 0x26a   : > { %v2804_v10 = vpop.permute.xlu1 %2803  ;;  %v2799_v39 = vpop.permute.xlu0 %2798 }
 0x26b   : > { %v2925_v50 = vmul.f32 %v7000_v1, %v2804_v10  ;;  %1999 = vperm.xlu1 %5439, %v6986_v17   ;;  %v2924_v32 = vmul.f32 %v7000_v1, %v2799_v39  ;;  %1994 = vperm.xlu0 %5438, %v6991_v3   ;;  %v2376_v20 = vadd.f32 %v2340_v33, %v2083_v44  ;;  %v2422_v39 = vld [vmem:[%s5858_s23 + $0xf5] sm:$0xff] }
 0x26c   : > { %v2670_v46 = vadd.f32 %v2634_v24, %v2377_v34  ;;  %v1549_v24 = vld [vmem:[%s5858_s23 + $0x113] sm:$0xff] }
 0x26d   : > { %v2961_v18 = vadd.f32 %v2925_v50, %v2668_v55  ;;  %v2960_v36 = vadd.f32 %v2924_v32, %v2667_v45  ;;  %v2669_v7 = vadd.f32 %v2633_v4, %v2376_v20  ;;  %v1551_v32 = vld [vmem:[%s5858_s23 + $0x123] sm:$0xff] }
 0x26e   : > { %v2814_v51 = vpop.permute.xlu1 %2813  ;;  %v2809_v8 = vpop.permute.xlu0 %2808 }
 0x26f   : > { %v3004_v28 = vadd.f32 %v6485_v29, %v2961_v18  ;;  %v2927_v6 = vmul.f32 %v7000_v1, %v2814_v51  ;;  %2550 = vperm.xlu1 %5439, %v2419_v49   ;;  %v3003_v37 = vadd.f32 %v7015_v26, %v2960_v36  ;;  %v2926_v5 = vmul.f32 %v7000_v1, %v2809_v8  ;;  %v1550_v49 = vld [vmem:[%s5858_s23 + $0x11b] sm:$0xff]  ;;  %v1552_v51 = vld [vmem:[%s5858_s23 + $0x12b] sm:$0x3f] }
 0x270   : > { %2004 = vperm.xlu0 %5438, %v1841_v16  }
 0x271   : > { %v3040_v43 = vmax.f32 %v3004_v28, 0.0  ;;  %v2963_v29 = vadd.f32 %v2927_v6, %v2670_v46  ;;  %v3039_v58 = vmax.f32 %v3003_v37, 0.0  ;;  %v2962_v0 = vadd.f32 %v2926_v5, %v2669_v7 }
 0x272   : > { %v7021_v33 = vpop.permute.xlu1 %817  ;;  %v7025_v2 = vpop.permute.xlu0 %812 }
 0x273   : > { %8305 = vst [vmem:[#allocation70_spill] sm:$0xff] %v7021_v33  ;;  %3077 = vst.msk [vmem:[#allocation2 + $0x78] sm:$0xff] %vm3061_vm0, %v3040_v43  ;;  %v3006_v10 = vadd.f32 %v7015_v26, %v2963_v29  ;;  %2560 = vperm.xlu1 %5439, %v2421_v57   ;;  %v3005_v55 = vadd.f32 %v7015_v26, %v2962_v0  ;;  %v2134_v29 = vld [vmem:[%s5858_s23 + $0x11c] sm:$0xff]  ;;  %v2713_v0 = vld [vmem:[%s5858_s23 + $0xe6] sm:$0xff] }
 0x274   : > { %8306 = vst [vmem:[#allocation71_spill] sm:$0xff] %v7025_v2  ;;  %3076 = vst.msk [vmem:[#allocation2 + $0x70] sm:$0xff] %vm3061_vm0, %v3039_v58  ;;  %2555 = vperm.xlu0 %5438, %v2420_v54   ;;  %v2133_v54 = vld [vmem:[%s5858_s23 + $0x114] sm:$0xff]  ;;  %v8326_v2 = vld [vmem:[#allocation101_spill] sm:$0xff] }
 0x275   : > { %v3042_v50 = vmax.f32 %v3006_v10, 0.0  ;;  %v3041_v44 = vmax.f32 %v3005_v55, 0.0  ;;  %v2712_v10 = vld [vmem:[%s5858_s23 + $0xde] sm:$0xff] }
 0x276   : > { %v7031_v45 = vpop.permute.xlu1 %827  ;;  %v7034_v4 = vpop.permute.xlu0 %822 }
 0x277   : > { %3079 = vst.msk [vmem:[#allocation2 + $0x88] sm:$0xff] %vm3061_vm0, %v3042_v50  ;;  %8307 = vst [vmem:[#allocation59_spill] sm:$0xff] %v7034_v4  ;;  %1716 = vperm.xlu1 %5439, %v1549_v24  }
 0x278   : > { %3078 = vst.msk [vmem:[#allocation2 + $0x80] sm:$0xff] %vm3061_vm0, %v3041_v44  ;;  %2565 = vperm.xlu0 %5438, %v2422_v39   ;;  %v8312_v39 = vld [vmem:[#allocation87_spill] sm:$0xff] }
 0x279   : > { %v877_v44 = vmul.f32 %v6873_v31, %v8312_v39  ;;  %v1463_v39 = vmul.f32 %v6907_v25, %v6642_v11 }
 0x27a   : > { %v7039_v34 = vpop.permute.xlu1 %1378  ;;  %v7041_v18 = vpop.permute.xlu0 %832 }
 0x27b   : > { %8308 = vst [vmem:[#allocation60_spill] sm:$0xff] %v7041_v18  ;;  %1726 = vperm.xlu1 %5439, %v1551_v32   ;;  %v3149_v20 = vld [vmem:[#allocation2 + $0x6c] ss:$2 sm:$0xff]  ;;  %v3151_v36 = vld [vmem:[#allocation2 + $0x6d] ss:$2 sm:$0xff] }
 0x27c   : > { %1721 = vperm.xlu0 %5438, %v1550_v49   ;;  %v3152_v7 = vmax.f32 %v3149_v20, %v3151_v36  ;;  %v8314_v49 = vld [vmem:[#allocation24_spill] sm:$0xff]  ;;  %v8322_v18 = vld [vmem:[#allocation91_spill] sm:$0xff] }
 0x27d   : > { %v584_v20 = vmul.f32 %v6885_v19, %v8314_v49  ;;  %v8315_v36 = vld [vmem:[#allocation88_spill] sm:$0xff] }
 0x27e   : > { %v7044_v46 = vpop.permute.xlu1 %1388  ;;  %v7046_v8 = vpop.permute.xlu0 %1383 }
 0x27f   : > { %8309 = vst [vmem:[#allocation83_spill] sm:$0xff] %v7044_v46  ;;  %v3154_v28 = vld [vmem:[#allocation2 + $0x7e] ss:$2 sm:$0xff]  ;;  %v3156_v6 = vld [vmem:[#allocation2 + $0x7f] ss:$2 sm:$0xff]  ;;  %2277 = vperm.xlu1 %5439, %v6991_v3  }
 0x280   : > { %v3157_v37 = vmax.f32 %v3154_v28, %v3156_v6  ;;  %1731 = vperm.xlu0 %5438, %v1552_v51   ;;  %v879_v51 = vmul.f32 %v6873_v31, %v8315_v36  ;;  %v1170_v28 = vmul.f32 %v6892_v63, %v6511_v56  ;;  %v8316_v6 = vld [vmem:[#allocation89_spill] sm:$0xff]  ;;  %v8320_v56 = vld [vmem:[#allocation23_spill] sm:$0xff] }
 0x281   : > { %v585_v36 = vmul.f32 %v6885_v19, %v8320_v56  ;;  %v7107_v56 = vld [vmem:[%s5858_s23 + $0x124] sm:$0xff] }
 0x282   : > { %v3158_v5 = vmax.f32 %v3152_v7, %v3157_v37  ;;  %v7049_v57 = vpop.permute.xlu1 %2525  ;;  %v7051_v43 = vpop.permute.xlu0 %1393  ;;  %v878_v7 = vmul.f32 %v6873_v31, %v8316_v6  ;;  %v8321_v6 = vld [vmem:[#allocation25_spill] sm:$0xff] }
 0x283   : > { %8310 = vst [vmem:[#allocation84_spill] sm:$0xff] %v7051_v43  ;;  %2287 = vperm.xlu1 %5439, %v1841_v16   ;;  %v2715_v16 = vld [vmem:[%s5858_s23 + $0xf6] sm:$0xff] }
 0x284   : > { %2282 = vperm.xlu0 %5438, %v6986_v17   ;;  %3159 = vst.msk [vmem:[#allocation3 + $0x29] sm:$0xff] %vm3061_vm0, %v3158_v5  ;;  %v2714_v17 = vld [vmem:[%s5858_s23 + $0xee] sm:$0xff] }
 0x285   : > { %v8317_v5 = vld [vmem:[#allocation26_spill] sm:$0xff] }
 0x286   : > { %v7057_v3 = vpop.permute.xlu1 %2535  ;;  %v7059_v58 = vpop.permute.xlu0 %2530 }
 0x287   : > { %2297 = vperm.xlu1 %5439, %v2134_v29  }
 0x288   : > { %2292 = vperm.xlu0 %5438, %v2133_v54  }
 0x28a   : > { %v7063_v55 = vpop.permute.xlu1 %2545  ;;  %v7065_v24 = vpop.permute.xlu0 %2540 }
 0x28b   : > { %2848 = vperm.xlu1 %5439, %v2713_v0   ;;  %v586_v0 = vmul.f32 %v6885_v19, %v8317_v5  ;;  %v880_v5 = vmul.f32 %v6873_v31, %v8322_v18 }
 0x28c   : > { %2843 = vperm.xlu0 %5438, %v2712_v10   ;;  %v913_v10 = vadd.f32 %v877_v44, %v584_v20  ;;  %v1172_v44 = vmul.f32 %v6892_v63, %v6527_v41  ;;  %v1845_v20 = vld [vmem:[%s5858_s23 + $0x12c] sm:$0x3f]  ;;  %v1173_v41 = vmul.f32 %v6892_v63, %v8326_v2  ;;  %v8331_v2 = vld [vmem:[#allocation48_spill] sm:$0xff] }
 0x28d   : > { %v915_v33 = vadd.f32 %v879_v51, %v586_v0  ;;  %v8329_v0 = vld [vmem:[#allocation12_spill] sm:$0xff] }
 0x28e   : > { %v7069_v50 = vpop.permute.xlu1 %1110  ;;  %v7073_v32 = vpop.permute.xlu0 %1105 }
 0x28f   : > { %8311 = vst [vmem:[#allocation72_spill] sm:$0xff] %v7069_v50  ;;  %8313 = vst [vmem:[#allocation73_spill] sm:$0xff] %v7073_v32  ;;  %2858 = vperm.xlu1 %5439, %v2715_v16   ;;  %v8318_v16 = vld [vmem:[#allocation90_spill] sm:$0xff]  ;;  %v587_v50 = vmul.f32 %v6885_v19, %v8321_v6  ;;  %v914_v32 = vadd.f32 %v878_v7, %v585_v36  ;;  %v8325_v6 = vld [vmem:[#allocation100_spill] sm:$0xff]  ;;  %v2049_v7 = vmul.f32 %v6943_v52, %v6835_v35 }
 0x290   : > { %2853 = vperm.xlu0 %5438, %v2714_v17   ;;  %v881_v17 = vmul.f32 %v6873_v31, %v8318_v16  ;;  %v8323_v16 = vld [vmem:[#allocation28_spill] sm:$0xff]  ;;  %v1171_v18 = vmul.f32 %v6892_v63, %v8325_v6  ;;  %v1464_v6 = vmul.f32 %v6907_v25, %v8331_v2  ;;  %v8335_v2 = vld [vmem:[#allocation42_spill] sm:$0xff] }
 0x291   : > { %v588_v11 = vmul.f32 %v6885_v19, %v8323_v16  ;;  %v916_v16 = vadd.f32 %v880_v5, %v587_v50  ;;  %v2342_v50 = vmul.f32 %v6958_v60, %v6900_v23 }
 0x292   : > { %v7083_v37 = vpop.permute.xlu1 %1120  ;;  %v7091_v49 = vpop.permute.xlu0 %1115  ;;  %v1207_v5 = vadd.f32 %v1171_v18, %v914_v32 }
 0x293   : > { %8319 = vst [vmem:[#allocation85_spill] sm:$0xff] %v7091_v49  ;;  %2014 = vperm.xlu1 %5439, %v2134_v29   ;;  %v1206_v49 = vadd.f32 %v1170_v28, %v913_v10  ;;  %v8324_v29 = vld [vmem:[#allocation43_spill] sm:$0xff]  ;;  %v917_v51 = vadd.f32 %v881_v17, %v588_v11  ;;  %v1465_v10 = vmul.f32 %v6907_v25, %v8329_v0  ;;  %v2424_v17 = vld [vmem:[%s5858_s23 + $0x105] sm:$0xff]  ;;  %v8334_v0 = vld [vmem:[#allocation58_spill] sm:$0xff] }
 0x294   : > { %2009 = vperm.xlu0 %5438, %v2133_v54   ;;  %v1756_v4 = vmul.f32 %v6925_v15, %v8324_v29  ;;  %v8327_v54 = vld [vmem:[#allocation102_spill] sm:$0xff]  ;;  %v1208_v29 = vadd.f32 %v1172_v44, %v915_v33  ;;  %v1758_v35 = vmul.f32 %v6925_v15, %v8334_v0  ;;  %v2423_v33 = vld [vmem:[%s5858_s23 + $0xfd] sm:$0xff]  ;;  %v1209_v44 = vadd.f32 %v1173_v41, %v916_v16  ;;  %v8337_v0 = vld [vmem:[#allocation57_spill] sm:$0xff] }
 0x295   : > { %v1174_v46 = vmul.f32 %v6892_v63, %v8327_v54  ;;  %v1499_v28 = vadd.f32 %v1463_v39, %v1206_v49  ;;  %v8332_v54 = vld [vmem:[#allocation49_spill] sm:$0xff]  ;;  %v8333_v39 = vld [vmem:[#allocation14_spill] sm:$0xff]  ;;  %v1500_v32 = vadd.f32 %v1464_v6, %v1207_v5  ;;  %v1759_v6 = vmul.f32 %v6925_v15, %v8337_v0 }
 0x296   : > { %v7115_v43 = vpop.permute.xlu1 %1671  ;;  %v7121_v36 = vpop.permute.xlu0 %1125  ;;  %v1467_v49 = vmul.f32 %v6907_v25, %v8333_v39  ;;  %v1501_v61 = vadd.f32 %v1465_v10, %v1208_v29  ;;  %v2426_v10 = vld [vmem:[%s5858_s23 + $0x115] sm:$0xff] }
 0x297   : > { %8328 = vst [vmem:[#allocation86_spill] sm:$0xff] %v7115_v43  ;;  %8330 = vst [vmem:[#allocation41_spill] sm:$0xff] %v7121_v36  ;;  %2024 = vperm.xlu1 %5439, %v1845_v20   ;;  %v1466_v43 = vmul.f32 %v6907_v25, %v8332_v54  ;;  %v1792_v11 = vadd.f32 %v1756_v4, %v1499_v28  ;;  %v1210_v20 = vadd.f32 %v1174_v46, %v917_v51  ;;  %v8336_v46 = vld [vmem:[#allocation50_spill] sm:$0xff] }
 0x298   : > { %2019 = vperm.xlu0 %5438, %v7107_v56   ;;  %v1757_v54 = vmul.f32 %v6925_v15, %v8335_v2  ;;  %v2051_v4 = vmul.f32 %v6943_v52, %v6841_v62  ;;  %v2635_v28 = vmul.f32 %v6973_v13, %v7049_v57  ;;  %v1760_v41 = vmul.f32 %v6925_v15, %v8336_v46  ;;  %v2425_v57 = vld [vmem:[%s5858_s23 + $0x10d] sm:$0xff] }
 0x299   : > { %v2085_v39 = vadd.f32 %v2049_v7, %v1792_v11  ;;  %v1502_v18 = vadd.f32 %v1466_v43, %v1209_v44  ;;  %v2050_v51 = vmul.f32 %v6943_v52, %v6833_v59  ;;  %v1503_v7 = vadd.f32 %v1467_v49, %v1210_v20 }
 0x29a   : > { %v7138_v36 = vpop.permute.xlu1 %1681  ;;  %v7144_v23 = vpop.permute.xlu0 %1676  ;;  %v1794_v16 = vadd.f32 %v1758_v35, %v1501_v61  ;;  %v2344_v62 = vmul.f32 %v6958_v60, %v6936_v38  ;;  %v1793_v11 = vadd.f32 %v1757_v54, %v1500_v32  ;;  %v2053_v43 = vmul.f32 %v6943_v52, %v6847_v12 }
 0x29b   : > { %2575 = vperm.xlu1 %5439, %v2424_v17   ;;  %v2378_v29 = vadd.f32 %v2342_v50, %v2085_v39  ;;  %v2343_v17 = vmul.f32 %v6958_v60, %v6947_v48  ;;  %v2637_v61 = vmul.f32 %v6973_v13, %v7057_v3  ;;  %v1796_v50 = vadd.f32 %v1760_v41, %v1503_v7  ;;  %v2427_v3 = vld [vmem:[%s5858_s23 + $0x11d] sm:$0xff] }
 0x29c   : > { %2570 = vperm.xlu0 %5438, %v2423_v33   ;;  %v2087_v33 = vadd.f32 %v2051_v4, %v1794_v16  ;;  %v2086_v5 = vadd.f32 %v2050_v51, %v1793_v11  ;;  %v2052_v12 = vmul.f32 %v6943_v52, %v6839_v30  ;;  %v2636_v48 = vmul.f32 %v6973_v13, %v7059_v58 }
 0x29d   : > { %v2671_v49 = vadd.f32 %v2635_v28, %v2378_v29  ;;  %v2346_v20 = vmul.f32 %v6958_v60, %v6966_v9  ;;  %v1795_v54 = vadd.f32 %v1759_v6, %v1502_v18  ;;  %v2089_v39 = vadd.f32 %v2053_v43, %v1796_v50  ;;  %v2136_v29 = vld [vmem:[%s5858_s23 + $0x12c] sm:$0xff] }
 0x29e   : > { %v2819_v59 = vpop.permute.xlu1 %2818  ;;  %v7163_v35 = vpop.permute.xlu0 %1686  ;;  %v2380_v44 = vadd.f32 %v2344_v62, %v2087_v33  ;;  %v2379_v4 = vadd.f32 %v2343_v17, %v2086_v5  ;;  %v2345_v28 = vmul.f32 %v6958_v60, %v6977_v42  ;;  %v2639_v58 = vmul.f32 %v6973_v13, %v7063_v55  ;;  %v2137_v42 = vld [vmem:[%s5858_s23 + $0x134] sm:$0xff] }
 0x29f   : > { %v2928_v38 = vmul.f32 %v7000_v1, %v2819_v59  ;;  %2585 = vperm.xlu1 %5439, %v2426_v10   ;;  %v2088_v18 = vadd.f32 %v2052_v12, %v1795_v54  ;;  %v2638_v10 = vmul.f32 %v6973_v13, %v7065_v24  ;;  %v2382_v7 = vadd.f32 %v2346_v20, %v2089_v39  ;;  %v2716_v59 = vld [vmem:[%s5858_s23 + $0xfe] sm:$0xff] }
 0x2a0   : > { %2580 = vperm.xlu0 %5438, %v2425_v57   ;;  %v2673_v30 = vadd.f32 %v2637_v61, %v2380_v44  ;;  %v2672_v51 = vadd.f32 %v2636_v48, %v2379_v4  ;;  %v2138_v61 = vld [vmem:[%s5858_s23 + $0x13c] sm:$0x3f]  ;;  %v2718_v44 = vld [vmem:[%s5858_s23 + $0x10e] sm:$0xff] }
 0x2a1   : > { %v2964_v2 = vadd.f32 %v2928_v38, %v2671_v49  ;;  %v2381_v62 = vadd.f32 %v2345_v28, %v2088_v18  ;;  %v2675_v0 = vadd.f32 %v2639_v58, %v2382_v7  ;;  %v3584_v39 = vld [vmem:[%s8121_s3 + $0x80] sm:$0xff]  ;;  %v3585_v4 = vld [vmem:[%s8121_s3 + $0x88] sm:$0xff]  ;;  %v3570_v7 = vld [vmem:[%s8121_s3 + $0x10] sm:$0xff] }
 0x2a2   : > { %v2829_v32 = vpop.permute.xlu1 %2828  ;;  %v2824_v9 = vpop.permute.xlu0 %2823  ;;  %v3569_v58 = vld [vmem:[%s8121_s3 + $0x8] sm:$0xff] }
 0x2a3   : > { %v3007_v46 = vadd.f32 %v7015_v26, %v2964_v2  ;;  %v2930_v41 = vmul.f32 %v7000_v1, %v2829_v32  ;;  %2302 = vperm.xlu1 %5439, %v7107_v56   ;;  %v2929_v60 = vmul.f32 %v7000_v1, %v2824_v9  ;;  %v2674_v6 = vadd.f32 %v2638_v10, %v2381_v62  ;;  %v2717_v2 = vld [vmem:[%s5858_s23 + $0x106] sm:$0xff]  ;;  %v2719_v9 = vld [vmem:[%s5858_s23 + $0x116] sm:$0xff] }
 0x2a4   : > { %2590 = vperm.xlu0 %5438, %v2427_v3   ;;  %v5043_v32 = vpack.c.bf16 %v3585_v4, %v3584_v39  ;;  %v3587_v10 = vld [vmem:[%s8121_s3 + $0x98] sm:$0xff]  ;;  %v3574_v4 = vld [vmem:[%s8121_s3 + $0x30] sm:$0xff] }
 0x2a5   : > { %v3043_v16 = vmax.f32 %v3007_v46, 0.0  ;;  %v2966_v55 = vadd.f32 %v2930_v41, %v2673_v30  ;;  %v2965_v57 = vadd.f32 %v2929_v60, %v2672_v51  ;;  %v3568_v30 = vld [vmem:[%s8121_s3] sm:$0xff]  ;;  %v3586_v51 = vld [vmem:[%s8121_s3 + $0x90] sm:$0xff] }
 0x2a6   : > { %v2839_v11 = vpop.permute.xlu1 %2838  ;;  %v2834_v24 = vpop.permute.xlu0 %2833  ;;  %v2720_v46 = vld [vmem:[%s5858_s23 + $0x11e] sm:$0xff]  ;;  %v5045_v41 = vpack.c.bf16 %v3569_v58, %v3568_v30  ;;  %5044 = vmatprep.subr.bf16.mxu0 %v5043_v32  ;;  %v2722_v30 = vld [vmem:[%s5858_s23 + $0x12e] sm:$0xff] }
 0x2a7   : > { %3080 = vst.msk [vmem:[#allocation2 + $0x90] sm:$0xff] %vm3061_vm0, %v3043_v16  ;;  %v3009_v56 = vadd.f32 %v7015_v26, %v2966_v55  ;;  %v2932_v13 = vmul.f32 %v7000_v1, %v2839_v11  ;;  %2312 = vperm.xlu1 %5439, %v2137_v42   ;;  %v3008_v43 = vadd.f32 %v7015_v26, %v2965_v57  ;;  %v2429_v16 = vld [vmem:[%s5858_s23 + $0x12d] sm:$0xff]  ;;  %v3571_v55 = vld [vmem:[%s8121_s3 + $0x18] sm:$0xff]  ;;  %v2428_v57 = vld [vmem:[%s5858_s23 + $0x125] sm:$0xff] }
 0x2a8   : > { %v2931_v17 = vmul.f32 %v7000_v1, %v2834_v24  ;;  %2307 = vperm.xlu0 %5438, %v2136_v29   ;;  %5046 = vmatpush3.bf16.msra.mxu0 %v5045_v41  ;;  %v5047_v42 = vpack.c.bf16 %v3587_v10, %v3586_v51  ;;  %v5049_v11 = vpack.c.bf16 %v3571_v55, %v3570_v7  ;;  %v3575_v32 = vld [vmem:[%s8121_s3 + $0x38] sm:$0xff]  ;;  %v3593_v51 = vld [vmem:[%s8121_s3 + $0xc8] sm:$0xff]  ;;  %v3576_v7 = vld [vmem:[%s8121_s3 + $0x40] sm:$0xff] }
 0x2a9   : > { %v3045_v33 = vmax.f32 %v3009_v56, 0.0  ;;  %v2968_v49 = vadd.f32 %v2932_v13, %v2675_v0  ;;  %v3044_v38 = vmax.f32 %v3008_v43, 0.0  ;;  %v3588_v56 = vld [vmem:[%s8121_s3 + $0xa0] sm:$0xff]  ;;  %v3589_v13 = vld [vmem:[%s8121_s3 + $0xa8] sm:$0xff]  ;;  %v5057_v58 = vpack.c.bf16 %v3575_v32, %v3574_v4  ;;  %v3262_v4 = vld [vmem:[#allocation3 + $0x15] sm:$0xff] }
 0x2aa   : > { %v2967_v50 = vadd.f32 %v2931_v17, %v2674_v6  ;;  %v7191_v5 = vpop.permute.xlu1 %842  ;;  %v7195_v48 = vpop.permute.xlu0 %837  ;;  %5048 = vmatprep.subr.bf16.mxu0 %v5047_v42  ;;  %v5051_v17 = vpack.c.bf16 %v3589_v13, %v3588_v56  ;;  %v2724_v55 = vld [vmem:[%s5858_s23 + $0x13e] sm:$0x3f]  ;;  %v3251_v56 = vld [vmem:[#allocation3 + $0x14] sm:$0xff] }
 0x2ab   : > { %3082 = vst.msk [vmem:[#allocation2 + $0xa0] sm:$0xff] %vm3061_vm0, %v3045_v33  ;;  %v3011_v12 = vadd.f32 %v7015_v26, %v2968_v49  ;;  %2863 = vperm.xlu1 %5439, %v2716_v59   ;;  %3081 = vst.msk [vmem:[#allocation2 + $0x98] sm:$0xff] %vm3061_vm0, %v3044_v38  ;;  %v3572_v59 = vld [vmem:[%s8121_s3 + $0x20] sm:$0xff]  ;;  %v3573_v38 = vld [vmem:[%s8121_s3 + $0x28] sm:$0xff] }
 0x2ac   : > { %v3010_v1 = vadd.f32 %v7015_v26, %v2967_v50  ;;  %2317 = vperm.xlu0 %5438, %v2138_v61   ;;  %5050 = vmatpush3.bf16.msra.mxu0 %v5049_v11  ;;  %v2431_v61 = vld [vmem:[%s5858_s23 + $0x13d] sm:$0x3f]  ;;  %v2430_v50 = vld [vmem:[%s5858_s23 + $0x135] sm:$0xff] }
 0x2ad   : > { %v3047_v20 = vmax.f32 %v3011_v12, 0.0  ;;  %5052 = vmatprep.subr.bf16.mxu0 %v5051_v17  ;;  %v5053_v12 = vpack.c.bf16 %v3573_v38, %v3572_v59  ;;  %v3594_v13 = vld [vmem:[%s8121_s3 + $0xd0] sm:$0xff]  ;;  %v3218_v17 = vld [vmem:[#allocation3 + $0x1] sm:$0xff]  ;;  %v3579_v38 = vld [vmem:[%s8121_s3 + $0x58] sm:$0xff] }
 0x2ae   : > { %v3046_v3 = vmax.f32 %v3010_v1, 0.0  ;;  %v7201_v54 = vpop.permute.xlu1 %852  ;;  %v7210_v28 = vpop.permute.xlu0 %847  ;;  %v3250_v59 = vld [vmem:[#allocation3 + $0xc] sm:$0xff] }
 0x2af   : > { %3084 = vst.msk [vmem:[#allocation2 + $0xb0] sm:$0xff] %vm3061_vm0, %v3047_v20  ;;  %2873 = vperm.xlu1 %5439, %v2718_v44   ;;  %v3590_v20 = vld [vmem:[%s8121_s3 + $0xb0] sm:$0xff] }
 0x2b0   : > { %3083 = vst.msk [vmem:[#allocation2 + $0xa8] sm:$0xff] %vm3061_vm0, %v3046_v3  ;;  %2868 = vperm.xlu0 %5438, %v2717_v2   ;;  %v3591_v2 = vld [vmem:[%s8121_s3 + $0xb8] sm:$0xff]  ;;  %5054 = vmatpush3.bf16.msra.mxu0 %v5053_v12  ;;  %v5440_v12 = vpack.i.bf16 %v3218_v17, %v3250_v59  ;;  %v3582_v17 = vld [vmem:[%s8121_s3 + $0x70] sm:$0xff] }
 0x2b1   : > { %v5055_v39 = vpack.c.bf16 %v3591_v2, %v3590_v20  ;;  %v3596_v20 = vld [vmem:[%s8121_s3 + $0xe0] sm:$0xff]  ;;  %v3597_v2 = vld [vmem:[%s8121_s3 + $0xe8] sm:$0xff]  ;;  %v3583_v59 = vld [vmem:[%s8121_s3 + $0x78] sm:$0xff] }
 0x2b2   : > { %v7221_v18 = vpop.permute.xlu1 %1403  ;;  %v7229_v60 = vpop.permute.xlu0 %1398  ;;  %v3161_v29 = vld [vmem:[#allocation2 + $0x90] ss:$2 sm:$0xff]  ;;  %v3163_v62 = vld [vmem:[#allocation2 + $0x91] ss:$2 sm:$0xff]  ;;  %v5067_v32 = vpack.c.bf16 %v3597_v2, %v3596_v20 }
 0x2b3   : > { %2883 = vperm.xlu1 %5439, %v2720_v46   ;;  %v3164_v33 = vmax.f32 %v3161_v29, %v3163_v62  ;;  %v2721_v46 = vld [vmem:[%s5858_s23 + $0x126] sm:$0xff]  ;;  %5056 = vmatprep.subr.bf16.mxu0 %v5055_v39  ;;  %v2723_v62 = vld [vmem:[%s5858_s23 + $0x136] sm:$0xff]  ;;  %s4906_s23 = sshll.u32 %s5791_s13, 4  ;;  %s5719_s13 = smov [#allocation9]  }
 0x2b4   : > { %2878 = vperm.xlu0 %5438, %v2719_v9   ;;  %v3592_v9 = vld [vmem:[%s8121_s3 + $0xc0] sm:$0xff]  ;;  %5058 = vmatpush3.bf16.msra.mxu0 %v5057_v58  ;;  %v3581_v58 = vld [vmem:[%s8121_s3 + $0x68] sm:$0xff]  ;;  %s8075_s29 = scalar_lea.hbm %s8127_s9, %s4906_s23  ;;  %s5646_s16 = sshll.u32 %s5719_s13, 4  ;;  %s5647_s16 = int_to_ptr.vmem [resolvable:$false] %s5646_s16 }
 0x2b5   : > { %v5059_v42 = vpack.c.bf16 %v3593_v51, %v3592_v9  ;;  %s5648_s17 = scalar_lea.vmem %s5647_s16, 32 }
 0x2b6   : > { %v7239_v0 = vpop.permute.xlu1 %1413  ;;  %v7247_v43 = vpop.permute.xlu0 %1408 }
 0x2b7   : > { %v3166_v24 = vld [vmem:[#allocation2 + $0xa2] ss:$2 sm:$0xff]  ;;  %v3168_v6 = vld [vmem:[#allocation2 + $0xa3] ss:$2 sm:$0xff]  ;;  %2600 = vperm.xlu1 %5439, %v2429_v16   ;;  %5060 = vmatprep.subr.bf16.mxu0 %v5059_v42 }
 0x2b8   : > { %v3169_v49 = vmax.f32 %v3166_v24, %v3168_v6  ;;  %2595 = vperm.xlu0 %5438, %v2428_v57   ;;  %v3577_v16 = vld [vmem:[%s8121_s3 + $0x48] sm:$0xff]  ;;  %v3595_v24 = vld [vmem:[%s8121_s3 + $0xd8] sm:$0xff] }
 0x2b9   : > { %v5061_v29 = vpack.c.bf16 %v3577_v16, %v3576_v7  ;;  %v3228_v57 = vld [vmem:[#allocation3 + $0x2] sm:$0xff]  ;;  %v3229_v42 = vld [vmem:[#allocation3 + $0xa] sm:$0xff] }
 0x2ba   : > { %v3170_v1 = vmax.f32 %v3164_v33, %v3169_v49  ;;  %v7257_v44 = vpop.permute.xlu1 %1964  ;;  %v7265_v3 = vpop.permute.xlu0 %1418  ;;  %v5063_v33 = vpack.c.bf16 %v3595_v24, %v3594_v13  ;;  %v5445_v49 = vpack.i.bf16 %v3228_v57, %v3251_v56  ;;  %v5450_v16 = vpack.i.bf16 %v3229_v42, %v3262_v4  ;;  %v3220_v4 = vld [vmem:[#allocation3 + $0x11] sm:$0xff] }
 0x2bb   : > { %2610 = vperm.xlu1 %5439, %v2431_v61   ;;  %5062 = vmatpush3.bf16.msra.mxu0 %v5061_v29  ;;  %v3578_v61 = vld [vmem:[%s8121_s3 + $0x50] sm:$0xff]  ;;  %v8338_v57 = vmov 0.0  }
 0x2bc   : > { %2605 = vperm.xlu0 %5438, %v2430_v50   ;;  %3171 = vst.msk [vmem:[#allocation3 + $0x33] sm:$0xff] %vm3061_vm0, %v3170_v1  ;;  %5064 = vmatprep.subr.bf16.mxu0 %v5063_v33  ;;  %v5065_v1 = vpack.c.bf16 %v3579_v38, %v3578_v61  ;;  %v3598_v29 = vld [vmem:[%s8121_s3 + $0xf0] sm:$0xff] }
 0x2bd   : > { %3112 = vst.msk [vmem:[#allocation3 + $0x60] sm:$0xf] %vm3111_vm1, %v8338_v57  ;;  %v3230_v33 = vld [vmem:[#allocation3 + $0x12] sm:$0xff] }
 0x2be   : > { %v7276_v41 = vpop.permute.xlu1 %1974  ;;  %v7284_v10 = vpop.permute.xlu0 %1969 }
 0x2bf   : > { %2893 = vperm.xlu1 %5439, %v2722_v30   ;;  %v3580_v30 = vld [vmem:[%s8121_s3 + $0x60] sm:$0xff]  ;;  %5066 = vmatpush3.bf16.msra.mxu0 %v5065_v1 }
 0x2c0   : > { %2888 = vperm.xlu0 %5438, %v2721_v46   ;;  %v3219_v46 = vld [vmem:[#allocation3 + $0x9] sm:$0xff]  ;;  %v5069_v9 = vpack.c.bf16 %v3581_v58, %v3580_v30  ;;  %5068 = vmatprep.subr.bf16.mxu0 %v5067_v32 }
 0x2c1   : > { %v5455_v51 = vpack.i.bf16 %v3219_v46, %v3251_v56  ;;  %v3252_v56 = vld [vmem:[#allocation3 + $0x1c] sm:$0xff]  ;;  %v3253_v1 = vld [vmem:[#allocation3 + $0x24] sm:$0xff] }
 0x2c2   : > { %v7294_v11 = vpop.permute.xlu1 %1130  ;;  %v7302_v6 = vpop.permute.xlu0 %1979  ;;  %v5475_v2 = vpack.i.bf16 %v3230_v33, %v3253_v1  ;;  %v5470_v30 = vpack.i.bf16 %v3220_v4, %v3252_v56  ;;  %v3264_v46 = vld [vmem:[#allocation3 + $0x25] sm:$0xff] }
 0x2c3   : > { %2903 = vperm.xlu1 %5439, %v2724_v55   ;;  %v3263_v55 = vld [vmem:[#allocation3 + $0x1d] sm:$0xff]  ;;  %5070 = vmatpush3.bf16.msra.mxu0 %v5069_v9  ;;  %v3254_v57 = vld [vmem:[#allocation3 + $0x2c] sm:$0xff] }
 0x2c4   : > { %2898 = vperm.xlu0 %5438, %v2723_v62   ;;  %v3599_v62 = vld [vmem:[%s8121_s3 + $0xf8] sm:$0xff]  ;;  %v5465_v61 = vpack.i.bf16 %v3230_v33, %v3263_v55 }
 0x2c5   : > { %v5071_v24 = vpack.c.bf16 %v3599_v62, %v3598_v29  ;;  %v3221_v9 = vld [vmem:[#allocation3 + $0x19] sm:$0xff]  ;;  %v3265_v29 = vld [vmem:[#allocation3 + $0x2d] sm:$0xff] }
 0x2c6   : > { %v7310_v50 = vpop.permute.xlu1 %1140  ;;  %v7318_v39 = vpop.permute.xlu0 %1135  ;;  %v3255_v33 = vld [vmem:[#allocation3 + $0x34] sm:$0xff] }
 0x2c7   : > { %5446 = vrot.lane.b32.xlu1 %v5445_v49, %s5715_s22  ;;  %v5073_v49 = vpack.c.bf16 %v3583_v59, %v3582_v17  ;;  %5072 = vmatprep.subr.bf16.mxu0 %v5071_v24 }
 0x2c8   : > { %5441 = vrot.lane.b32.xlu0 %v5440_v12, %s5716_s24  ;;  %v5460_v12 = vpack.i.bf16 %v3229_v42, %v3252_v56  ;;  %v3231_v42 = vld [vmem:[#allocation3 + $0x1a] sm:$0xff]  ;;  %v3232_v56 = vld [vmem:[#allocation3 + $0x22] sm:$0xff] }
 0x2c9   : > { %5074 = vmatpush3.bf16.msra.mxu0 %v5073_v49  ;;  %v5480_v55 = vpack.i.bf16 %v3231_v42, %v3264_v46  ;;  %v5495_v24 = vpack.i.bf16 %v3232_v56, %v3265_v29  ;;  %v5490_v59 = vpack.i.bf16 %v3231_v42, %v3254_v57  ;;  %v3223_v46 = vld [vmem:[#allocation3 + $0x29] sm:$0xff] }
 0x2ca   : > { %v7328_v7 = vpop.permute.xlu1 %1691  ;;  %v7337_v13 = vpop.permute.xlu0 %1145  ;;  %v7375_v42 = vld [vmem:[#allocation3 + $0x2a] sm:$0xff] }
 0x2cb   : > { %5456 = vrot.lane.b32.xlu1 %v5455_v51, %s5716_s24  ;;  %v5485_v51 = vpack.i.bf16 %v3221_v9, %v3253_v1  ;;  %v889_v9 = vmul.f32 %v6873_v31, %v7031_v45  ;;  %v1475_v45 = vmul.f32 %v6907_v25, %v7239_v0  ;;  %v891_v0 = vmul.f32 %v6873_v31, %v7195_v48 }
 0x2cc   : > { %5451 = vrot.lane.b32.xlu0 %v5450_v16, %s5717_s28 }
 0x2ce   : > { %v7347_v38 = vpop.permute.xlu1 %1701  ;;  %v7349_v20 = vpop.permute.xlu0 %1696 }
 0x2cf   : > { %5466 = vrot.lane.b32.xlu1 %v5465_v61, %s5717_s28  ;;  %v5505_v61 = vpack.i.bf16 %v3232_v56, %v3255_v33  ;;  %v8341_v56 = vld [vmem:[#allocation36_spill] sm:$0xff] }
 0x2d0   : > { %5461 = vrot.lane.b32.xlu0 %v5460_v12, %s5715_s22  ;;  %v3222_v12 = vld [vmem:[#allocation3 + $0x21] sm:$0xff] }
 0x2d2   : > { %v7353_v32 = vpop.permute.xlu1 %1711  ;;  %v1707_v58 = vpop.permute.xlu0 %1706 }
 0x2d3   : > { %5476 = vrot.lane.b32.xlu1 %v5475_v2, %s5715_s22  ;;  %v5500_v2 = vpack.i.bf16 %v3222_v12, %v3254_v57  ;;  %v596_v57 = vmul.f32 %v6885_v19, %v8341_v56 }
 0x2d4   : > { %5471 = vrot.lane.b32.xlu0 %v5470_v30, %s5716_s24  ;;  %v3266_v30 = vld [vmem:[#allocation3 + $0x35] sm:$0xff] }
 0x2d5   : > { %v5510_v29 = vpack.i.bf16 %v7375_v42, %v3266_v30 }
 0x2d6   : > { %v7357_v16 = vpop.permute.xlu1 %2262  ;;  %v7359_v62 = vpop.permute.xlu0 %2257 }
 0x2d7   : > { %5486 = vrot.lane.b32.xlu1 %v5485_v51, %s5716_s24  ;;  %v5515_v51 = vpack.i.bf16 %v3223_v46, %v3255_v33 }
 0x2d8   : > { %5481 = vrot.lane.b32.xlu0 %v5480_v55, %s5717_s28 }
 0x2da   : > { %v7363_v17 = vpop.permute.xlu1 %2272  ;;  %v7365_v49 = vpop.permute.xlu0 %2267 }
 0x2db   : > { %5496 = vrot.lane.b32.xlu1 %v5495_v24, %s5717_s28  ;;  %v1182_v24 = vmul.f32 %v6892_v63, %v7083_v37 }
 0x2dc   : > { %5491 = vrot.lane.b32.xlu0 %v5490_v59, %s5715_s22 }
 0x2de   : > { %v7369_v1 = vpop.permute.xlu1 %1428  ;;  %v1424_v4 = vpop.permute.xlu0 %1423 }
 0x2df   : > { %8339 = vst [vmem:[#allocation44_spill] sm:$0xff] %v7369_v1  ;;  %5506 = vrot.lane.b32.xlu1 %v5505_v61, %s5715_s22  ;;  %v925_v61 = vadd.f32 %v889_v9, %v596_v57  ;;  %v8343_v57 = vld [vmem:[#allocation38_spill] sm:$0xff] }
 0x2e0   : > { %5501 = vrot.lane.b32.xlu0 %v5500_v2, %s5716_s24  ;;  %v1768_v2 = vmul.f32 %v6925_v15, %v1707_v58  ;;  %v598_v58 = vmul.f32 %v6885_v19, %v8343_v57 }
 0x2e1   : > { %v1218_v12 = vadd.f32 %v1182_v24, %v925_v61  ;;  %v1184_v24 = vmul.f32 %v6892_v63, %v7294_v11 }
 0x2e2   : > { %v7377_v55 = vpop.permute.xlu1 %1438  ;;  %v1434_v59 = vpop.permute.xlu0 %1433 }
 0x2e3   : > { %8340 = vst [vmem:[#allocation13_spill] sm:$0xff] %v7377_v55  ;;  %5516 = vrot.lane.b32.xlu1 %v5515_v51, %s5716_s24  ;;  %v1511_v46 = vadd.f32 %v1475_v45, %v1218_v12  ;;  %v1477_v45 = vmul.f32 %v6907_v25, %v1424_v4 }
 0x2e4   : > { %5511 = vrot.lane.b32.xlu0 %v5510_v29, %s5717_s28 }
 0x2e5   : > { %v1804_v55 = vadd.f32 %v1768_v2, %v1511_v46  ;;  %v8344_v2 = vld [vmem:[#allocation40_spill] sm:$0xff] }
 0x2e6   : > { %v7388_v33 = vpop.permute.xlu1 %1989  ;;  %v7391_v30 = vpop.permute.xlu0 %1984  ;;  %v600_v48 = vmul.f32 %v6885_v19, %v8344_v2  ;;  %v7428_v19 = vld [vmem:[%s8119_s1 + $0x1] ss:$0 sm:$0xff] }
 0x2e7   : > { %v8348_v2 = vld [vmem:[#allocation27_spill] sm:$0xff] }
 0x2ea   : > { %v2000_v56 = vpop.permute.xlu1 %1999  ;;  %v7394_v1 = vpop.permute.xlu0 %1994 }
 0x2eb   : > { %v2061_v37 = vmul.f32 %v6943_v52, %v2000_v56  ;;  %v927_v52 = vadd.f32 %v891_v0, %v598_v58  ;;  %v1186_v56 = vmul.f32 %v6892_v63, %v7310_v50  ;;  %v883_v63 = vmul.f32 %v7428_v19, %v6816_v21  ;;  %v7447_v21 = vld [vmem:[%s8119_s1 + $0x2] ss:$0 sm:$0xff] }
 0x2ed   : > { %v7396_v51 = vadd.f32 %v2061_v37, %v1804_v55  ;;  %v893_v55 = vmul.f32 %v6873_v31, %v7210_v28  ;;  %v1220_v46 = vadd.f32 %v1184_v24, %v927_v52  ;;  %v7440_v52 = vld [vmem:[%s8119_s1] ss:$0 sm:$0xff] }
 0x2ee   : > { %v7398_v9 = vpop.permute.xlu1 %2550 }
 0x2ef   : > { %8342 = vst [vmem:[#allocation45_spill] sm:$0xff] %v7396_v51  ;;  %v7402_v29 = vpop.permute.xlu0 %2004  ;;  %v929_v57 = vadd.f32 %v893_v55, %v600_v48  ;;  %v1513_v11 = vadd.f32 %v1477_v45, %v1220_v46  ;;  %v1479_v51 = vmul.f32 %v6907_v25, %v1434_v59  ;;  %v882_v59 = vmul.f32 %v7428_v19, %v6818_v40  ;;  %v8346_v55 = vld [vmem:[#allocation30_spill] sm:$0xff] }
 0x2f0   : > { %v590_v45 = vmul.f32 %v7440_v52, %v8346_v55  ;;  %v589_v40 = vmul.f32 %v7440_v52, %v8348_v2  ;;  %v1175_v48 = vmul.f32 %v7447_v21, %v6856_v14  ;;  %v884_v14 = vmul.f32 %v7428_v19, %v6828_v27  ;;  %v8352_v2 = vld [vmem:[#allocation86_spill] sm:$0xff] }
 0x2f1   : > { %v1222_v31 = vadd.f32 %v1186_v56, %v929_v57  ;;  %v7464_v57 = vld [vmem:[%s8119_s1 + $0x3] ss:$0 sm:$0xff] }
 0x2f2   : > { %v7408_v61 = vpop.permute.xlu1 %2560  ;;  %v919_v56 = vadd.f32 %v883_v63, %v590_v45 }
 0x2f3   : > { %v7413_v12 = vpop.permute.xlu0 %2555  ;;  %v1515_v50 = vadd.f32 %v1479_v51, %v1222_v31  ;;  %v1468_v31 = vmul.f32 %v7464_v57, %v7039_v34  ;;  %v8351_v34 = vld [vmem:[#allocation51_spill] sm:$0xff] }
 0x2f4   : > { %v1177_v45 = vmul.f32 %v7447_v21, %v8351_v34 }
 0x2f6   : > { %v1717_v37 = vpop.permute.xlu1 %1716 }
 0x2f7   : > { %v1770_v0 = vmul.f32 %v6925_v15, %v1717_v37  ;;  %v7421_v58 = vpop.permute.xlu0 %2565  ;;  %v885_v37 = vmul.f32 %v7428_v19, %v6826_v22 }
 0x2f9   : > { %v7423_v28 = vadd.f32 %v1770_v0, %v1513_v11  ;;  %v918_v0 = vadd.f32 %v882_v59, %v589_v40  ;;  %v8350_v59 = vld [vmem:[#allocation29_spill] sm:$0xff] }
 0x2fa   : > { %v1727_v4 = vpop.permute.xlu1 %1726  ;;  %v591_v27 = vmul.f32 %v7440_v52, %v8350_v59 }
 0x2fb   : > { %8345 = vst [vmem:[#allocation52_spill] sm:$0xff] %v7423_v28  ;;  %v1772_v24 = vmul.f32 %v6925_v15, %v1727_v4  ;;  %v7433_v25 = vpop.permute.xlu0 %1721  ;;  %v1176_v15 = vmul.f32 %v7447_v21, %v6868_v53  ;;  %v1469_v53 = vmul.f32 %v7464_v57, %v7046_v8  ;;  %v8349_v4 = vld [vmem:[#allocation32_spill] sm:$0xff]  ;;  %v1211_v55 = vadd.f32 %v1175_v48, %v918_v0 }
 0x2fc   : > { %v592_v22 = vmul.f32 %v7440_v52, %v8349_v4  ;;  %v7481_v8 = vld [vmem:[%s8119_s1 + $0x4] ss:$0 sm:$0xff]  ;;  %v920_v59 = vadd.f32 %v884_v14, %v591_v27 }
 0x2fd   : > { %v7451_v51 = vadd.f32 %v1772_v24, %v1515_v50  ;;  %v1212_v63 = vadd.f32 %v1176_v15, %v919_v56  ;;  %v1178_v50 = vmul.f32 %v7447_v21, %v6911_v47  ;;  %v1762_v24 = vmul.f32 %v7481_v8, %v7144_v23  ;;  %v8353_v4 = vld [vmem:[#allocation84_spill] sm:$0xff] }
 0x2fe   : > { %v7457_v46 = vpop.permute.xlu1 %2277  ;;  %v1761_v15 = vmul.f32 %v7481_v8, %v8352_v2  ;;  %v921_v47 = vadd.f32 %v885_v37, %v592_v22  ;;  %v7498_v23 = vld [vmem:[%s8119_s1 + $0x5] ss:$0 sm:$0xff]  ;;  %v1504_v34 = vadd.f32 %v1468_v31, %v1211_v55  ;;  %v8354_v2 = vld [vmem:[#allocation83_spill] sm:$0xff]  ;;  %v1213_v14 = vadd.f32 %v1177_v45, %v920_v59 }
 0x2ff   : > { %8347 = vst [vmem:[#allocation15_spill] sm:$0xff] %v7451_v51  ;;  %v7468_v11 = vpop.permute.xlu0 %1731  ;;  %v1505_v56 = vadd.f32 %v1469_v53, %v1212_v63  ;;  %v1471_v51 = vmul.f32 %v7464_v57, %v8353_v4  ;;  %v2055_v48 = vmul.f32 %v7498_v23, %v7284_v10  ;;  %v1470_v28 = vmul.f32 %v7464_v57, %v8354_v2  ;;  %v7513_v4 = vld [vmem:[%s8119_s1 + $0x6] ss:$0 sm:$0xff] }
 0x300   : > { %v2054_v37 = vmul.f32 %v7498_v23, %v7257_v44  ;;  %v1214_v53 = vadd.f32 %v1178_v50, %v921_v47  ;;  %v1764_v63 = vmul.f32 %v7481_v8, %v7163_v35  ;;  %v2348_v10 = vmul.f32 %v7513_v4, %v7357_v16  ;;  %v7528_v47 = vld [vmem:[%s8119_s1 + $0x7] ss:$0 sm:$0xff] }
 0x301   : > { %v1798_v22 = vadd.f32 %v1762_v24, %v1505_v56  ;;  %v1797_v31 = vadd.f32 %v1761_v15, %v1504_v34  ;;  %v1763_v27 = vmul.f32 %v7481_v8, %v7138_v36  ;;  %v2347_v44 = vmul.f32 %v7513_v4, %v7359_v62 }
 0x302   : > { %v7491_v40 = vpop.permute.xlu1 %2287  ;;  %v1507_v24 = vadd.f32 %v1471_v51, %v1214_v53  ;;  %v2057_v55 = vmul.f32 %v7498_v23, %v7302_v6  ;;  %v2641_v16 = vmul.f32 %v7528_v47, %v7413_v12  ;;  %v1506_v36 = vadd.f32 %v1470_v28, %v1213_v14 }
 0x303   : > { %v7502_v0 = vpop.permute.xlu0 %2282  ;;  %v2091_v35 = vadd.f32 %v2055_v48, %v1798_v22  ;;  %v2090_v15 = vadd.f32 %v2054_v37, %v1797_v31  ;;  %v2056_v62 = vmul.f32 %v7498_v23, %v7276_v41  ;;  %v2640_v51 = vmul.f32 %v7528_v47, %v7398_v9  ;;  %v7547_v41 = vld [vmem:[%s8119_s1 + $0x8] ss:$0 sm:$0xff] }
 0x304   : > { %v1800_v56 = vadd.f32 %v1764_v63, %v1507_v24  ;;  %v2350_v48 = vmul.f32 %v7513_v4, %v7363_v17  ;;  %v1799_v59 = vadd.f32 %v1763_v27, %v1506_v36  ;;  %v2349_v12 = vmul.f32 %v7513_v4, %v7365_v49 }
 0x305   : > { %v2384_v6 = vadd.f32 %v2348_v10, %v2091_v35  ;;  %v2383_v34 = vadd.f32 %v2347_v44, %v2090_v15  ;;  %v2643_v37 = vmul.f32 %v7528_v47, %v7421_v58  ;;  %v2642_v10 = vmul.f32 %v7528_v47, %v7408_v61 }
 0x306   : > { %v7521_v50 = vpop.permute.xlu1 %2297  ;;  %v2093_v53 = vadd.f32 %v2057_v55, %v1800_v56  ;;  %v2092_v17 = vadd.f32 %v2056_v62, %v1799_v59  ;;  %v7563_v59 = vld [vmem:[%s8120_s2] ss:$0 sm:$0xff] }
 0x307   : > { %v7532_v45 = vpop.permute.xlu0 %2292  ;;  %v2677_v28 = vadd.f32 %v2641_v16, %v2384_v6  ;;  %v2676_v63 = vadd.f32 %v2640_v51, %v2383_v34 }
 0x308   : > { %v2386_v14 = vadd.f32 %v2350_v48, %v2093_v53  ;;  %v2385_v27 = vadd.f32 %v2349_v12, %v2092_v17 }
 0x30a   : > { %v2849_v2 = vpop.permute.xlu1 %2848  ;;  %v2679_v24 = vadd.f32 %v2643_v37, %v2386_v14  ;;  %v2678_v36 = vadd.f32 %v2642_v10, %v2385_v27  ;;  %v8359_v10 = vld [vmem:[#allocation31_spill] sm:$0xff]  ;;  %v8360_v14 = vld [vmem:[#allocation73_spill] sm:$0xff] }
 0x30b   : > { %v2934_v9 = vmul.f32 %v7547_v41, %v2849_v2  ;;  %v2844_v22 = vpop.permute.xlu0 %2843 }
 0x30c   : > { %v2933_v49 = vmul.f32 %v7547_v41, %v2844_v22  ;;  %v8358_v22 = vld [vmem:[#allocation71_spill] sm:$0xff] }
 0x30d   : > { %v2970_v31 = vadd.f32 %v2934_v9, %v2677_v28  ;;  %v886_v17 = vmul.f32 %v7428_v19, %v8358_v22  ;;  %v8366_v22 = vld [vmem:[#allocation60_spill] sm:$0xff] }
 0x30e   : > { %v2969_v44 = vadd.f32 %v2933_v49, %v2676_v63  ;;  %v2859_v58 = vpop.permute.xlu1 %2858  ;;  %v593_v49 = vmul.f32 %v7440_v52, %v8359_v10  ;;  %v890_v10 = vmul.f32 %v7428_v19, %v8366_v22 }
 0x30f   : > { %v3013_v35 = vadd.f32 %v7015_v26, %v2970_v31  ;;  %v2936_v55 = vmul.f32 %v7547_v41, %v2859_v58  ;;  %v2854_v16 = vpop.permute.xlu0 %2853  ;;  %v1179_v31 = vmul.f32 %v7447_v21, %v8360_v14  ;;  %v8361_v58 = vld [vmem:[#allocation33_spill] sm:$0xff] }
 0x310   : > { %v3012_v15 = vadd.f32 %v7015_v26, %v2969_v44  ;;  %v2935_v62 = vmul.f32 %v7547_v41, %v2854_v16  ;;  %v8363_v16 = vld [vmem:[#allocation59_spill] sm:$0xff]  ;;  %v8367_v14 = vld [vmem:[#allocation85_spill] sm:$0xff] }
 0x311   : > { %v3049_v51 = vmax.f32 %v3013_v35, 0.0  ;;  %v2972_v61 = vadd.f32 %v2936_v55, %v2679_v24  ;;  %v595_v24 = vmul.f32 %v7440_v52, %v8361_v58  ;;  %v8362_v35 = vld [vmem:[#allocation34_spill] sm:$0xff]  ;;  %v1181_v58 = vmul.f32 %v7447_v21, %v8367_v14 }
 0x312   : > { %v3048_v56 = vmax.f32 %v3012_v15, 0.0  ;;  %v2971_v6 = vadd.f32 %v2935_v62, %v2678_v36  ;;  %v7557_v48 = vpop.permute.xlu1 %2014  ;;  %v594_v55 = vmul.f32 %v7440_v52, %v8362_v35  ;;  %v888_v36 = vmul.f32 %v7428_v19, %v8363_v16  ;;  %v8364_v62 = vld [vmem:[#allocation35_spill] sm:$0xff] }
 0x313   : > { %3086 = vst.msk [vmem:[#allocation2 + $0xc0] sm:$0xff] %vm3061_vm0, %v3049_v51  ;;  %v3015_v34 = vadd.f32 %v7563_v59, %v2972_v61  ;;  %v7566_v12 = vpop.permute.xlu0 %2009  ;;  %v597_v51 = vmul.f32 %v7440_v52, %v8364_v62  ;;  %v8365_v61 = vld [vmem:[#allocation70_spill] sm:$0xff]  ;;  %v1474_v14 = vmul.f32 %v7464_v57, %v7247_v43  ;;  %v1476_v43 = vmul.f32 %v7464_v57, %v7265_v3  ;;  %v3600_v3 = vld [vmem:[%s8121_s3 + $0x100] sm:$0xff] }
 0x314   : > { %8355 = vst [vmem:[#allocation16_spill] sm:$0xff] %v7566_v12  ;;  %3085 = vst.msk [vmem:[#allocation2 + $0xb8] sm:$0xff] %vm3061_vm0, %v3048_v56  ;;  %v3014_v26 = vadd.f32 %v7563_v59, %v2971_v6  ;;  %v887_v56 = vmul.f32 %v7428_v19, %v8365_v61  ;;  %v922_v6 = vadd.f32 %v886_v17, %v593_v49  ;;  %v8369_v61 = vld [vmem:[#allocation72_spill] sm:$0xff]  ;;  %v8370_v12 = vld [vmem:[#allocation41_spill] sm:$0xff] }
 0x315   : > { %v3051_v2 = vmax.f32 %v3015_v34, 0.0  ;;  %v1472_v34 = vmul.f32 %v7464_v57, %v7229_v60  ;;  %v1180_v17 = vmul.f32 %v7447_v21, %v8369_v61  ;;  %v1765_v60 = vmul.f32 %v7481_v8, %v7328_v7 }
 0x316   : > { %v3050_v53 = vmax.f32 %v3014_v26, 0.0  ;;  %v7570_v28 = vpop.permute.xlu1 %2024  ;;  %v1215_v49 = vadd.f32 %v1179_v31, %v922_v6  ;;  %v1183_v22 = vmul.f32 %v7447_v21, %v8370_v12  ;;  %v2058_v31 = vmul.f32 %v7498_v23, %v7391_v30 }
 0x317   : > { %8356 = vst [vmem:[#allocation46_spill] sm:$0xff] %v7570_v28  ;;  %3088 = vst.msk [vmem:[#allocation2 + $0xd0] sm:$0xff] %vm3061_vm0, %v3051_v2  ;;  %v7573_v37 = vpop.permute.xlu0 %2019  ;;  %v924_v28 = vadd.f32 %v888_v36, %v595_v24  ;;  %v926_v24 = vadd.f32 %v890_v10, %v597_v51  ;;  %v1473_v12 = vmul.f32 %v7464_v57, %v7221_v18 }
 0x318   : > { %8357 = vst [vmem:[#allocation47_spill] sm:$0xff] %v7573_v37  ;;  %3087 = vst.msk [vmem:[#allocation2 + $0xc8] sm:$0xff] %vm3061_vm0, %v3050_v53  ;;  %v8368_v37 = vld [vmem:[#allocation37_spill] sm:$0xff]  ;;  %v1508_v61 = vadd.f32 %v1472_v34, %v1215_v49  ;;  %v1769_v18 = vmul.f32 %v7481_v8, %v7353_v32  ;;  %v892_v32 = vmul.f32 %v7428_v19, %v7191_v5 }
 0x319   : > { %v7604_v62 = vmul.f32 %v7440_v52, %v8368_v37  ;;  %v1217_v36 = vadd.f32 %v1181_v58, %v924_v28  ;;  %v1219_v30 = vadd.f32 %v1183_v22, %v926_v24  ;;  %v1766_v28 = vmul.f32 %v7481_v8, %v7349_v20 }
 0x31a   : > { %v7576_v9 = vpop.permute.xlu1 %2575  ;;  %v2059_v49 = vmul.f32 %v7498_v23, %v7388_v33  ;;  %v2062_v5 = vmul.f32 %v7498_v23, %v7402_v29 }
 0x31b   : > { %v2571_v63 = vpop.permute.xlu0 %2570  ;;  %v3173_v27 = vld [vmem:[#allocation2 + $0xb4] ss:$2 sm:$0xff]  ;;  %v3175_v44 = vld [vmem:[#allocation2 + $0xb5] ss:$2 sm:$0xff]  ;;  %v2645_v29 = vmul.f32 %v7528_v47, %v7576_v9 }
 0x31c   : > { %v3176_v35 = vmax.f32 %v3173_v27, %v3175_v44  ;;  %v2644_v10 = vmul.f32 %v7528_v47, %v2571_v63 }
 0x31e   : > { %v7590_v15 = vpop.permute.xlu1 %2585 }
 0x31f   : > { %v3178_v26 = vld [vmem:[#allocation2 + $0xc6] ss:$2 sm:$0xff]  ;;  %v3180_v2 = vld [vmem:[#allocation2 + $0xc7] ss:$2 sm:$0xff]  ;;  %v2581_v53 = vpop.permute.xlu0 %2580 }
 0x320   : > { %v3181_v16 = vmax.f32 %v3178_v26, %v3180_v2  ;;  %v8371_v26 = vld [vmem:[#allocation39_spill] sm:$0xff]  ;;  %v923_v2 = vadd.f32 %v887_v56, %v594_v55  ;;  %v2351_v55 = vmul.f32 %v7513_v4, %v7457_v46  ;;  %v1510_v56 = vadd.f32 %v1474_v14, %v1217_v36 }
 0x321   : > { %v7618_v37 = vmul.f32 %v7440_v52, %v8371_v26  ;;  %v1767_v52 = vmul.f32 %v7481_v8, %v7347_v38  ;;  %v3601_v38 = vld [vmem:[%s8121_s3 + $0x108] sm:$0xff]  ;;  %v2060_v46 = vmul.f32 %v7498_v23, %v7394_v1  ;;  %v2353_v1 = vmul.f32 %v7513_v4, %v7491_v40  ;;  %v7667_v40 = vld [vmem:[#allocation3 + $0x32] sm:$0xff] }
 0x322   : > { %v3182_v27 = vmax.f32 %v3176_v35, %v3181_v16  ;;  %v7614_v44 = vpop.permute.xlu1 %2302  ;;  %v1216_v6 = vadd.f32 %v1180_v17, %v923_v2  ;;  %v1801_v35 = vadd.f32 %v1765_v60, %v1508_v61  ;;  %v7648_v58 = vpack.c.bf16 %v3601_v38, %v3600_v3 }
 0x323   : > { %v2591_v7 = vpop.permute.xlu0 %2590  ;;  %v1512_v17 = vadd.f32 %v1476_v43, %v1219_v30  ;;  %v894_v60 = vmul.f32 %v7428_v19, %v7201_v54  ;;  %v1803_v22 = vadd.f32 %v1767_v52, %v1510_v56  ;;  %v2352_v26 = vmul.f32 %v7513_v4, %v7502_v0 }
 0x324   : > { %3183 = vst.msk [vmem:[#allocation3 + $0x3d] sm:$0xff] %vm3061_vm0, %v3182_v27  ;;  %v2094_v34 = vadd.f32 %v2058_v31, %v1801_v35  ;;  %v1509_v16 = vadd.f32 %v1473_v12, %v1216_v6  ;;  %5076 = vmatprep.subr.bf16.mxu0 %v7648_v58  ;;  %v2646_v54 = vmul.f32 %v7528_v47, %v2581_v53 }
 0x325   : > { %v1805_v27 = vadd.f32 %v1769_v18, %v1512_v17  ;;  %v2096_v33 = vadd.f32 %v2060_v46, %v1803_v22  ;;  %v1185_v6 = vmul.f32 %v7447_v21, %v7318_v39  ;;  %v2355_v35 = vmul.f32 %v7513_v4, %v7521_v50  ;;  %v3224_v50 = vld [vmem:[#allocation3 + $0x31] sm:$0xff] }
 0x326   : > { %v7635_v51 = vpop.permute.xlu1 %2312  ;;  %v2387_v14 = vadd.f32 %v2351_v55, %v2094_v34  ;;  %v1802_v63 = vadd.f32 %v1766_v28, %v1509_v16  ;;  %v2354_v56 = vmul.f32 %v7513_v4, %v7532_v45  ;;  %v2647_v34 = vmul.f32 %v7528_v47, %v7590_v15  ;;  %v8373_v15 = vld [vmem:[#allocation44_spill] sm:$0xff] }
 0x327   : > { %v7646_v20 = vpop.permute.xlu0 %2307  ;;  %v2389_v53 = vadd.f32 %v2353_v1, %v2096_v33  ;;  %v2098_v55 = vadd.f32 %v2062_v5, %v1805_v27  ;;  %v1187_v22 = vmul.f32 %v7447_v21, %v7337_v13  ;;  %v1478_v5 = vmul.f32 %v7464_v57, %v8373_v15  ;;  %v8374_v33 = vld [vmem:[#allocation13_spill] sm:$0xff] }
 0x328   : > { %v2680_v61 = vadd.f32 %v2644_v10, %v2387_v14  ;;  %v2095_v12 = vadd.f32 %v2059_v49, %v1802_v63  ;;  %v928_v10 = vadd.f32 %v892_v32, %v7604_v62  ;;  %v8372_v14 = vld [vmem:[#allocation45_spill] sm:$0xff] }
 0x329   : > { %v2682_v28 = vadd.f32 %v2646_v54, %v2389_v53  ;;  %v2391_v16 = vadd.f32 %v2355_v35, %v2098_v55  ;;  %v2390_v1 = vadd.f32 %v2354_v56, %v8372_v14  ;;  %v1771_v54 = vmul.f32 %v7481_v8, %v7433_v25 }
 0x32a   : > { %v2864_v2 = vpop.permute.xlu1 %2863  ;;  %v2388_v30 = vadd.f32 %v2352_v26, %v2095_v12 }
 0x32b   : > { %v2937_v19 = vmul.f32 %v7547_v41, %v2864_v2  ;;  %v7665_v31 = vpop.permute.xlu0 %2317  ;;  %v3267_v24 = vld [vmem:[#allocation3 + $0x3d] sm:$0xff]  ;;  %v2683_v2 = vadd.f32 %v2647_v34, %v2390_v1 }
 0x32c   : > { %v3256_v36 = vld [vmem:[#allocation3 + $0x3c] sm:$0xff]  ;;  %v5525_v43 = vpack.i.bf16 %v7667_v40, %v3267_v24  ;;  %v2681_v38 = vadd.f32 %v2645_v29, %v2388_v30 }
 0x32d   : > { %v5520_v0 = vpack.i.bf16 %v7375_v42, %v3256_v36  ;;  %v2973_v52 = vadd.f32 %v2937_v19, %v2680_v61  ;;  %v2648_v42 = vmul.f32 %v7528_v47, %v2591_v7  ;;  %v5530_v46 = vpack.i.bf16 %v3224_v50, %v3256_v36 }
 0x32e   : > { %5526 = vrot.lane.b32.xlu1 %v5525_v43, %s5717_s28  ;;  %v2874_v9 = vpop.permute.xlu1 %2873  ;;  %v930_v7 = vadd.f32 %v894_v60, %v7618_v37  ;;  %v1221_v60 = vadd.f32 %v1185_v6, %v928_v10  ;;  %v1480_v61 = vmul.f32 %v7464_v57, %v8374_v33  ;;  %v2064_v6 = vmul.f32 %v7498_v23, %v7557_v48 }
 0x32f   : > { %5521 = vrot.lane.b32.xlu0 %v5520_v0, %s5715_s22  ;;  %v3016_v39 = vadd.f32 %v7563_v59, %v2973_v52  ;;  %v2939_v18 = vmul.f32 %v7547_v41, %v2874_v9  ;;  %v2869_v3 = vpop.permute.xlu0 %2868  ;;  %v2684_v26 = vadd.f32 %v2648_v42, %v2391_v16  ;;  %v1773_v57 = vmul.f32 %v7481_v8, %v7468_v11  ;;  %v8375_v52 = vld [vmem:[#allocation16_spill] sm:$0xff] }
 0x330   : > { %v2938_v45 = vmul.f32 %v7547_v41, %v2869_v3  ;;  %v1223_v43 = vadd.f32 %v1187_v22, %v930_v7  ;;  %v1514_v0 = vadd.f32 %v1478_v5, %v1221_v60  ;;  %v2063_v25 = vmul.f32 %v7498_v23, %v8375_v52 }
 0x331   : > { %v3052_v17 = vmax.f32 %v3016_v39, 0.0  ;;  %v2975_v49 = vadd.f32 %v2939_v18, %v2682_v28  ;;  %v2357_v48 = vmul.f32 %v7513_v4, %v7646_v20  ;;  %v8376_v28 = vld [vmem:[#allocation46_spill] sm:$0xff]  ;;  %v8377_v39 = vld [vmem:[#allocation47_spill] sm:$0xff]  ;;  %v2356_v11 = vmul.f32 %v7513_v4, %v7614_v44  ;;  %v8378_v20 = vld [vmem:[#allocation52_spill] sm:$0xff] }
 0x332   : > { %v2974_v63 = vadd.f32 %v2938_v45, %v2681_v38  ;;  %v2884_v27 = vpop.permute.xlu1 %2883  ;;  %v1516_v30 = vadd.f32 %v1480_v61, %v1223_v43  ;;  %v1807_v56 = vadd.f32 %v1771_v54, %v1514_v0  ;;  %v2066_v42 = vmul.f32 %v7498_v23, %v8376_v28 }
 0x333   : > { %5531 = vrot.lane.b32.xlu0 %v5530_v46, %s5716_s24  ;;  %3089 = vst.msk [vmem:[#allocation2 + $0xd8] sm:$0xff] %vm3061_vm0, %v3052_v17  ;;  %v3018_v62 = vadd.f32 %v7563_v59, %v2975_v49  ;;  %v2941_v32 = vmul.f32 %v7547_v41, %v2884_v27  ;;  %v2879_v37 = vpop.permute.xlu0 %2878  ;;  %v2065_v18 = vmul.f32 %v7498_v23, %v8377_v39  ;;  %v8379_v49 = vld [vmem:[#allocation15_spill] sm:$0xff] }
 0x334   : > { %v3017_v13 = vadd.f32 %v7563_v59, %v2974_v63  ;;  %v2940_v21 = vmul.f32 %v7547_v41, %v2879_v37  ;;  %v2100_v50 = vadd.f32 %v2064_v6, %v1807_v56  ;;  %v1809_v45 = vadd.f32 %v1773_v57, %v1516_v30 }
 0x335   : > { %v3054_v19 = vmax.f32 %v3018_v62, 0.0  ;;  %v2977_v24 = vadd.f32 %v2941_v32, %v2684_v26  ;;  %v2099_v46 = vadd.f32 %v2063_v25, %v8378_v20  ;;  %v2358_v23 = vmul.f32 %v7513_v4, %v7635_v51 }
 0x336   : > { %v3053_v36 = vmax.f32 %v3017_v13, 0.0  ;;  %v2976_v12 = vadd.f32 %v2940_v21, %v2683_v2  ;;  %v2601_v29 = vpop.permute.xlu1 %2600  ;;  %v2393_v16 = vadd.f32 %v2357_v48, %v2100_v50  ;;  %v2359_v44 = vmul.f32 %v7513_v4, %v7665_v31 }
 0x337   : > { %3091 = vst.msk [vmem:[#allocation2 + $0xe8] sm:$0xff] %vm3061_vm0, %v3054_v19  ;;  %v3020_v53 = vadd.f32 %v7563_v59, %v2977_v24  ;;  %v2596_v35 = vpop.permute.xlu0 %2595  ;;  %v2650_v38 = vmul.f32 %v7528_v47, %v2601_v29  ;;  %v2102_v17 = vadd.f32 %v2066_v42, %v1809_v45  ;;  %v2101_v7 = vadd.f32 %v2065_v18, %v8379_v49  ;;  %v3240_v42 = vld [vmem:[#allocation3 + $0xb] sm:$0xff]  ;;  %v7752_v49 = vld [vmem:[#allocation3 + $0x3a] sm:$0xff] }
 0x338   : > { %3090 = vst.msk [vmem:[#allocation2 + $0xe0] sm:$0xff] %vm3061_vm0, %v3053_v36  ;;  %v3019_v55 = vadd.f32 %v7563_v59, %v2976_v12  ;;  %v2649_v10 = vmul.f32 %v7528_v47, %v2596_v35  ;;  %v2392_v22 = vadd.f32 %v2356_v11, %v2099_v46 }
 0x339   : > { %v3056_v9 = vmax.f32 %v3020_v53, 0.0  ;;  %v2686_v1 = vadd.f32 %v2650_v38, %v2393_v16  ;;  %v2394_v62 = vadd.f32 %v2358_v23, %v2101_v7  ;;  %v2395_v32 = vadd.f32 %v2359_v44, %v2102_v17 }
 0x33a   : > { %v3055_v8 = vmax.f32 %v3019_v55, 0.0  ;;  %v2611_v3 = vpop.permute.xlu1 %2610  ;;  %v2685_v26 = vadd.f32 %v2649_v10, %v2392_v22  ;;  %v3208_v55 = vld [vmem:[#allocation3] sm:$0xff] }
 0x33b   : > { %3093 = vst.msk [vmem:[#allocation2 + $0xf8] sm:$0xff] %vm3061_vm0, %v3056_v9  ;;  %v2606_v34 = vpop.permute.xlu0 %2605  ;;  %v2652_v63 = vmul.f32 %v7528_v47, %v2611_v3 }
 0x33c   : > { %3092 = vst.msk [vmem:[#allocation2 + $0xf0] sm:$0xff] %vm3061_vm0, %v3055_v8  ;;  %v2651_v27 = vmul.f32 %v7528_v47, %v2606_v34 }
 0x33d   : > { %v2688_v33 = vadd.f32 %v2652_v63, %v2395_v32 }
 0x33e   : > { %v2894_v14 = vpop.permute.xlu1 %2893  ;;  %v2687_v61 = vadd.f32 %v2651_v27, %v2394_v62  ;;  %v3241_v27 = vld [vmem:[#allocation3 + $0x13] sm:$0xff] }
 0x33f   : > { %v2943_v15 = vmul.f32 %v7547_v41, %v2894_v14  ;;  %v2889_v5 = vpop.permute.xlu0 %2888  ;;  %v3185_v37 = vld [vmem:[#allocation2 + $0xd8] ss:$2 sm:$0xff]  ;;  %v3187_v4 = vld [vmem:[#allocation2 + $0xd9] ss:$2 sm:$0xff] }
 0x340   : > { %v2942_v51 = vmul.f32 %v7547_v41, %v2889_v5  ;;  %v3188_v24 = vmax.f32 %v3185_v37, %v3187_v4 }
 0x341   : > { %v2979_v31 = vadd.f32 %v2943_v15, %v2686_v1  ;;  %v3209_v15 = vld [vmem:[#allocation3 + $0x8] sm:$0xff] }
 0x342   : > { %v2978_v60 = vadd.f32 %v2942_v51, %v2685_v26  ;;  %v2904_v2 = vpop.permute.xlu1 %2903 }
 0x343   : > { %v3190_v13 = vld [vmem:[#allocation2 + $0xea] ss:$2 sm:$0xff]  ;;  %v3192_v21 = vld [vmem:[#allocation2 + $0xeb] ss:$2 sm:$0xff]  ;;  %v3022_v54 = vadd.f32 %v7563_v59, %v2979_v31  ;;  %v2945_v47 = vmul.f32 %v7547_v41, %v2904_v2  ;;  %v2899_v19 = vpop.permute.xlu0 %2898 }
 0x344   : > { %v3193_v36 = vmax.f32 %v3190_v13, %v3192_v21  ;;  %v3021_v12 = vadd.f32 %v7563_v59, %v2978_v60  ;;  %v2944_v29 = vmul.f32 %v7547_v41, %v2899_v19  ;;  %v3210_v19 = vld [vmem:[#allocation3 + $0x10] sm:$0xff] }
 0x345   : > { %v3058_v43 = vmax.f32 %v3022_v54, 0.0  ;;  %v2981_v0 = vadd.f32 %v2945_v47, %v2688_v33  ;;  %v3225_v47 = vld [vmem:[#allocation3 + $0x39] sm:$0xff] }
 0x346   : > { %v3194_v6 = vmax.f32 %v3188_v24, %v3193_v36  ;;  %v3057_v53 = vmax.f32 %v3021_v12, 0.0  ;;  %v2980_v35 = vadd.f32 %v2944_v29, %v2687_v61  ;;  %v5447_v57 = vpop.permute.xlu1 %5446  ;;  %v3242_v29 = vld [vmem:[#allocation3 + $0x1b] sm:$0xff] }
 0x347   : > { %3095 = vst.msk [vmem:[#allocation2 + $0x108] sm:$0xff] %vm3061_vm0, %v3058_v43  ;;  %v3024_v52 = vadd.f32 %v7563_v59, %v2981_v0  ;;  %v5442_v25 = vpop.permute.xlu0 %5441  ;;  %v5449_v9 = vunpack.i.h.bf16 %v5447_v57  ;;  %v5448_v28 = vunpack.i.l.bf16 %v5447_v57  ;;  %v3602_v43 = vld [vmem:[%s8121_s3 + $0x110] sm:$0xff]  ;;  %v3603_v0 = vld [vmem:[%s8121_s3 + $0x118] sm:$0xff] }
 0x348   : > { %3195 = vst.msk [vmem:[#allocation3 + $0x47] sm:$0xff] %vm3061_vm0, %v3194_v6  ;;  %3094 = vst.msk [vmem:[#allocation2 + $0x100] sm:$0xff] %vm3061_vm0, %v3057_v53  ;;  %v3023_v30 = vadd.f32 %v7563_v59, %v2980_v35  ;;  %v5444_v41 = vunpack.i.h.bf16 %v5442_v25  ;;  %v5443_v56 = vunpack.i.l.bf16 %v5442_v25 }
 0x349   : > { %v3060_v48 = vmax.f32 %v3024_v52, 0.0  ;;  %v5079_v52 = vpack.c.bf16 %v3603_v0, %v3602_v43  ;;  %v3271_v43 = vld [vmem:[#allocation3 + $0x5d] sm:$0x3f] }
 0x34a   : > { %v3059_v39 = vmax.f32 %v3023_v30, 0.0  ;;  %v5457_v18 = vpop.permute.xlu1 %5456  ;;  %v3538_v11 = vsel %vm3061_vm0, %v3240_v42, %v5443_v56  ;;  %v3506_v8 = vsel %vm3061_vm0, %v3208_v55, %v5444_v41 }
 0x34b   : > { %3098 = vst.msk [vmem:[#allocation2 + $0x118] sm:$0x3f] %vm3097_vm2, %v3060_v48  ;;  %v5452_v3 = vpop.permute.xlu0 %5451  ;;  %v5459_v38 = vunpack.i.h.bf16 %v5457_v18  ;;  %v5458_v34 = vunpack.i.l.bf16 %v5457_v18  ;;  %v3548_v45 = vsel %vm3516_vm3, %v3538_v11, %v5448_v28  ;;  %v3517_v20 = vsel %vm3516_vm3, %v3506_v8, %v5449_v9 }
 0x34c   : > { %3096 = vst.msk [vmem:[#allocation2 + $0x110] sm:$0xff] %vm3061_vm0, %v3059_v39  ;;  %v5454_v50 = vunpack.i.h.bf16 %v5452_v3  ;;  %v5453_v59 = vunpack.i.l.bf16 %v5452_v3 }
 0x34d   : > { %v3539_v62 = vsel %vm3061_vm0, %v3241_v27, %v5458_v34  ;;  %v3507_v32 = vsel %vm3061_vm0, %v3209_v15, %v5459_v38  ;;  %v3211_v38 = vld [vmem:[#allocation3 + $0x18] sm:$0xff] }
 0x34e   : > { %v5467_v46 = vpop.permute.xlu1 %5466  ;;  %v3558_v10 = vsel %vm3527_vm4, %v3548_v45, %v5453_v59  ;;  %v3528_v23 = vsel %vm3527_vm4, %v3517_v20, %v5454_v50  ;;  %v3243_v59 = vld [vmem:[#allocation3 + $0x23] sm:$0xff] }
 0x34f   : > { %v5469_v16 = vunpack.i.h.bf16 %v5467_v46  ;;  %v5468_v44 = vunpack.i.l.bf16 %v5467_v46  ;;  %v5462_v17 = vpop.permute.xlu0 %5461  ;;  %3705 = vmatprep.mubr.f32.mxu0 %v3558_v10  ;;  %v3268_v7 = vld [vmem:[#allocation3 + $0x45] sm:$0xff] }
 0x350   : > { %v5464_v22 = vunpack.i.h.bf16 %v5462_v17  ;;  %v5463_v14 = vunpack.i.l.bf16 %v5462_v17  ;;  %3706 = vmatmul.mubr.f32.vlgmr.msra.gmra.mrb[0].mxu0 %v3528_v23  ;;  %v5540_v1 = vpack.i.bf16 %v7752_v49, %v3268_v7  ;;  %v3257_v63 = vld [vmem:[#allocation3 + $0x44] sm:$0xff] }
 0x351   : > { %v3197_v5 = vld [vmem:[#allocation2 + $0xfc] ss:$2 sm:$0xff]  ;;  %v3199_v26 = vld [vmem:[#allocation2 + $0xfd] ss:$2 sm:$0xff]  ;;  %v5535_v51 = vpack.i.bf16 %v7667_v40, %v3257_v63  ;;  %5078 = vmatpush3.bf16.msra.mxu0 %v7648_v58  ;;  %v5545_v12 = vpack.i.bf16 %v3225_v47, %v3257_v63 }
 0x352   : > { %5541 = vrot.lane.b32.xlu0 %v5540_v1, %s5717_s28  ;;  %v5477_v37 = vpop.permute.xlu1 %5476  ;;  %v3549_v4 = vsel %vm3516_vm3, %v3539_v62, %v5463_v14  ;;  %v3518_v31 = vsel %vm3516_vm3, %v3507_v32, %v5464_v22  ;;  %v3200_v33 = vmax.f32 %v3197_v5, %v3199_v26  ;;  %5080 = vmatprep.subr.bf16.mxu0 %v5079_v52  ;;  %v3236_v17 = vld [vmem:[#allocation3 + $0x42] sm:$0xff]  ;;  %v3237_v0 = vld [vmem:[#allocation3 + $0x4a] sm:$0x3f] }
 0x353   : > { %v3202_v60 = vld [vmem:[#allocation2 + $0x10e] ss:$2 sm:$0xff]  ;;  %v3204_v2 = vld [vmem:[#allocation2 + $0x10f] ss:$2 sm:$0xff]  ;;  %5536 = vrot.lane.b32.xlu1 %v5535_v51, %s5715_s22  ;;  %v5472_v13 = vpop.permute.xlu0 %5471  ;;  %v3559_v40 = vsel %vm3527_vm4, %v3549_v4, %v5468_v44  ;;  %v3529_v21 = vsel %vm3527_vm4, %v3518_v31, %v5469_v16  ;;  %v5479_v24 = vunpack.i.h.bf16 %v5477_v37  ;;  %v5478_v36 = vunpack.i.l.bf16 %v5477_v37  ;;  %v3212_v62 = vld [vmem:[#allocation3 + $0x20] sm:$0xff] }
 0x354   : > { %v3205_v61 = vmax.f32 %v3202_v60, %v3204_v2  ;;  %v5474_v54 = vunpack.i.h.bf16 %v5472_v13  ;;  %v5473_v58 = vunpack.i.l.bf16 %v5472_v13  ;;  %3710 = vmatprep.mubr.f32.mxu0 %v3559_v40  ;;  %v3244_v51 = vld [vmem:[#allocation3 + $0x2b] sm:$0xff]  ;;  %v3226_v31 = vld [vmem:[#allocation3 + $0x41] sm:$0xff] }
 0x355   : > { %3711 = vmatmul.mubr.f32.gmra.mrb[2].mxu0 %v3529_v21 }
 0x356   : > { %v3206_v6 = vmax.f32 %v3200_v33, %v3205_v61  ;;  %v5487_v53 = vpop.permute.xlu1 %5486  ;;  %v3540_v35 = vsel %vm3061_vm0, %v3242_v29, %v5473_v58  ;;  %v3508_v57 = vsel %vm3061_vm0, %v3210_v19, %v5474_v54  ;;  %5082 = vmatpush3.bf16.msra.mxu0 %v5079_v52  ;;  %v3227_v19 = vld [vmem:[#allocation3 + $0x49] sm:$0x3f] }
 0x357   : > { %5546 = vrot.lane.b32.xlu1 %v5545_v12, %s5716_s24  ;;  %v5482_v25 = vpop.permute.xlu0 %5481  ;;  %v5489_v41 = vunpack.i.h.bf16 %v5487_v53  ;;  %v5488_v56 = vunpack.i.l.bf16 %v5487_v53  ;;  %v3550_v48 = vsel %vm3516_vm3, %v3540_v35, %v5478_v36  ;;  %v3519_v9 = vsel %vm3516_vm3, %v3508_v57, %v5479_v24  ;;  %v3261_v12 = vld [vmem:[#allocation3 + $0x5c] sm:$0x3f] }
 0x358   : > { %3207 = vst.msk [vmem:[#allocation3 + $0x51] sm:$0xff] %vm3061_vm0, %v3206_v6  ;;  %v5484_v55 = vunpack.i.h.bf16 %v5482_v25  ;;  %v5483_v30 = vunpack.i.l.bf16 %v5482_v25  ;;  %v5580_v53 = vpack.i.bf16 %v3237_v0, %v3261_v12  ;;  %v3216_v12 = vld [vmem:[#allocation3 + $0x40] sm:$0xff] }
 0x359   : > { %v3541_v34 = vsel %vm3061_vm0, %v3243_v59, %v5488_v56  ;;  %v3509_v45 = vsel %vm3061_vm0, %v3211_v38, %v5489_v41 }
 0x35a   : > { %v5497_v28 = vpop.permute.xlu1 %5496  ;;  %v3560_v42 = vsel %vm3527_vm4, %v3550_v48, %v5483_v30  ;;  %v3530_v39 = vsel %vm3527_vm4, %v3519_v9, %v5484_v55  ;;  %v3245_v9 = vld [vmem:[#allocation3 + $0x33] sm:$0xff] }
 0x35b   : > { %v5499_v18 = vunpack.i.h.bf16 %v5497_v28  ;;  %v5498_v11 = vunpack.i.l.bf16 %v5497_v28  ;;  %v5492_v8 = vpop.permute.xlu0 %5491  ;;  %3715 = vmatprep.mubr.f32.mxu0 %v3560_v42  ;;  %v3213_v28 = vld [vmem:[#allocation3 + $0x28] sm:$0xff] }
 0x35c   : > { %v5494_v3 = vunpack.i.h.bf16 %v5492_v8  ;;  %v5493_v50 = vunpack.i.l.bf16 %v5492_v8  ;;  %3716 = vmatmul.mubr.f32.gmra.mrb[4].mxu0 %v3530_v39 }
 0x35e   : > { %v5507_v20 = vpop.permute.xlu1 %5506  ;;  %v3551_v46 = vsel %vm3516_vm3, %v3541_v34, %v5493_v50  ;;  %v3520_v10 = vsel %vm3516_vm3, %v3509_v45, %v5494_v3 }
 0x35f   : > { %v5502_v23 = vpop.permute.xlu0 %5501  ;;  %v3561_v16 = vsel %vm3527_vm4, %v3551_v46, %v5498_v11  ;;  %v3531_v44 = vsel %vm3527_vm4, %v3520_v10, %v5499_v18  ;;  %v3269_v7 = vld [vmem:[#allocation3 + $0x4d] sm:$0xff]  ;;  %v5509_v15 = vunpack.i.h.bf16 %v5507_v20  ;;  %v5508_v5 = vunpack.i.l.bf16 %v5507_v20  ;;  %v3270_v54 = vld [vmem:[#allocation3 + $0x55] sm:$0xff] }
 0x360   : > { %v3258_v22 = vld [vmem:[#allocation3 + $0x4c] sm:$0xff]  ;;  %v5504_v14 = vunpack.i.h.bf16 %v5502_v23  ;;  %v5503_v1 = vunpack.i.l.bf16 %v5502_v23  ;;  %3720 = vmatprep.mubr.f32.mxu0 %v3561_v16  ;;  %v5555_v63 = vpack.i.bf16 %v3236_v17, %v3269_v7  ;;  %v3260_v26 = vld [vmem:[#allocation3 + $0x54] sm:$0xff] }
 0x361   : > { %v5550_v27 = vpack.i.bf16 %v7752_v49, %v3258_v22  ;;  %3721 = vmatmul.mubr.f32.gmra.mrb[6].mxu0 %v3531_v44  ;;  %v5565_v13 = vpack.i.bf16 %v3236_v17, %v3260_v26  ;;  %v5560_v49 = vpack.i.bf16 %v3226_v31, %v3258_v22  ;;  %v3259_v33 = vld [vmem:[#allocation3 + $0x54] sm:$0x3f]  ;;  %v3238_v61 = vld [vmem:[#allocation3 + $0x4a] sm:$0xff]  ;;  %v3246_v16 = vld [vmem:[#allocation3 + $0x3b] sm:$0xff] }
 0x362   : > { %5556 = vrot.lane.b32.xlu1 %v5555_v63, %s5717_s28  ;;  %v3542_v32 = vsel %vm3061_vm0, %v3244_v51, %v5503_v1  ;;  %v3510_v37 = vsel %vm3061_vm0, %v3212_v62, %v5504_v14  ;;  %v5575_v24 = vpack.i.bf16 %v3227_v19, %v3259_v33  ;;  %v5570_v36 = vpack.i.bf16 %v3238_v61, %v3270_v54  ;;  %v3239_v29 = vld [vmem:[#allocation3 + $0x52] sm:$0x3f]  ;;  %v5517_v35 = vpop.permute.xlu1 %5516  ;;  %v3247_v31 = vld [vmem:[#allocation3 + $0x43] sm:$0xff] }
 0x363   : > { %5551 = vrot.lane.b32.xlu0 %v5550_v27, %s5715_s22  ;;  %v5512_v4 = vpop.permute.xlu0 %5511  ;;  %v3552_v40 = vsel %vm3516_vm3, %v3542_v32, %v5508_v5  ;;  %v3521_v21 = vsel %vm3516_vm3, %v3510_v37, %v5509_v15  ;;  %v5585_v6 = vpack.i.bf16 %v3239_v29, %v3271_v43  ;;  %v5519_v57 = vunpack.i.h.bf16 %v5517_v35  ;;  %v3214_v44 = vld [vmem:[#allocation3 + $0x30] sm:$0xff] }
 0x364   : > { %v5514_v60 = vunpack.i.h.bf16 %v5512_v4  ;;  %v5513_v2 = vunpack.i.l.bf16 %v5512_v4  ;;  %v5518_v52 = vunpack.i.l.bf16 %v5517_v35 }
 0x365   : > { %v3511_v39 = vsel %vm3061_vm0, %v3213_v28, %v5519_v57 }
 0x366   : > { %5566 = vrot.lane.b32.xlu1 %v5565_v13, %s5715_s22  ;;  %v3562_v58 = vsel %vm3527_vm4, %v3552_v40, %v5513_v2  ;;  %v3532_v47 = vsel %vm3527_vm4, %v3521_v21, %v5514_v60  ;;  %v3543_v42 = vsel %vm3061_vm0, %v3245_v9, %v5518_v52  ;;  %v3215_v60 = vld [vmem:[#allocation3 + $0x38] sm:$0xff] }
 0x367   : > { %5561 = vrot.lane.b32.xlu0 %v5560_v49, %s5716_s24  ;;  %3725 = vmatprep.mubr.f32.mxu0 %v3562_v58 }
 0x368   : > { %3726 = vmatmul.mubr.f32.gmra.mrb[8].mxu0 %v3532_v47 }
 0x36a   : > { %5576 = vrot.lane.b32.xlu1 %v5575_v24, %s5716_s24  ;;  %s339_s24 = scalar_lea.vmem [#allocation9], %s338_s26 }
 0x36b   : > { %5571 = vrot.lane.b32.xlu0 %v5570_v36, %s5717_s28  ;;  %v3248_v36 = vld [vmem:[#allocation3 + $0x4b] sm:$0xff] }
 0x36e   : > { %5586 = vrot.lane.b32.xlu1 %v5585_v6, %s5717_s28  ;;  %s4811_s28 = sshll.u32 %s339_s24, 4  ;;  %s8077_s28 = int_to_ptr.vmem [resolvable:$true] %s4811_s28 }
 0x36f   : > { %5581 = vrot.lane.b32.xlu0 %v5580_v53, %s5715_s22  ;;  %s5642_s21 = scalar_lea.vmem %s8077_s28, 16  ;;  %p5649_p2 = scmp.lt.s32.totalorder %s8077_s28, %s5647_s16 }
 0x370   : > { %p5643_p6 = scmp.ne.s32.totalorder %s8077_s28, %s5642_s21  ;;  %p5650_p3 = scmp.lt.s32.totalorder %s5648_s17, %s5642_s21 }
 0x372   : > { %p5644_p10 = pnand %p5643_p6, %p8384_p9  ;;  %p5651_p4 = por %p5650_p3, %p5649_p2 }
 0x374   : > { %p5645_p12 = pneg %p5644_p10 }
 0x376   : > { %p5652_p7 = pnand %p5651_p4, %p5645_p12 }
 0x3a0   : > { %v5527_v25 = vpop.permute.xlu1 %5526 }
 0x3a1   : > { %v5522_v55 = vpop.permute.xlu0 %5521  ;;  %v5529_v30 = vunpack.i.h.bf16 %v5527_v25  ;;  %v5528_v41 = vunpack.i.l.bf16 %v5527_v25 }
 0x3a2   : > { %v5524_v56 = vunpack.i.h.bf16 %v5522_v55  ;;  %v5523_v48 = vunpack.i.l.bf16 %v5522_v55 }
 0x3a4   : > { %v3553_v18 = vsel %vm3516_vm3, %v3543_v42, %v5523_v48  ;;  %v3522_v11 = vsel %vm3516_vm3, %v3511_v39, %v5524_v56 }
 0x3a5   : > { %v3563_v8 = vsel %vm3527_vm4, %v3553_v18, %v5528_v41  ;;  %v3533_v3 = vsel %vm3527_vm4, %v3522_v11, %v5529_v30  ;;  %v5532_v50 = vpop.permute.xlu0 %5531  ;;  %v3249_v18 = vld [vmem:[#allocation3 + $0x53] sm:$0x3f]  ;;  %v3217_v11 = vld [vmem:[#allocation3 + $0x48] sm:$0x3f] }
 0x3a6   : > { %3730 = vmatprep.mubr.f32.mxu0 %v3563_v8  ;;  %v5534_v59 = vunpack.i.h.bf16 %v5532_v50  ;;  %v5533_v38 = vunpack.i.l.bf16 %v5532_v50 }
 0x3a7   : > { %3731 = vmatmul.mubr.f32.gmra.mrb[10].mxu0 %v3533_v3 }
 0x3a8   : > { %v3544_v17 = vsel %vm3061_vm0, %v3246_v16, %v5533_v38  ;;  %v3512_v7 = vsel %vm3061_vm0, %v3214_v44, %v5534_v59  ;;  %v3277_v16 = vld [vmem:[#allocation3 + $0x3e] sm:$0xff]  ;;  %v3278_v44 = vld [vmem:[#allocation3 + $0x46] sm:$0xff] }
 0x3c4   : > { %v5542_v34 = vpop.permute.xlu0 %5541 }
 0x3c5   : > { %v5537_v45 = vpop.permute.xlu1 %5536  ;;  %v5544_v20 = vunpack.i.h.bf16 %v5542_v34  ;;  %v5543_v46 = vunpack.i.l.bf16 %v5542_v34 }
 0x3c6   : > { %v5539_v10 = vunpack.i.h.bf16 %v5537_v45  ;;  %v5538_v23 = vunpack.i.l.bf16 %v5537_v45  ;;  %v3272_v45 = vld [vmem:[#allocation3 + $0x16] sm:$0xff] }
 0x3c8   : > { %v3554_v22 = vsel %vm3516_vm3, %v3544_v17, %v5538_v23  ;;  %v3523_v14 = vsel %vm3516_vm3, %v3512_v7, %v5539_v10  ;;  %v3275_v10 = vld [vmem:[#allocation3 + $0x2e] sm:$0xff]  ;;  %v3276_v23 = vld [vmem:[#allocation3 + $0x36] sm:$0xff] }
 0x3c9   : > { %v3564_v1 = vsel %vm3527_vm4, %v3554_v22, %v5543_v46  ;;  %v3534_v63 = vsel %vm3527_vm4, %v3523_v14, %v5544_v20  ;;  %v5547_v27 = vpop.permute.xlu1 %5546  ;;  %v3273_v20 = vld [vmem:[#allocation3 + $0x1e] sm:$0xff]  ;;  %v3274_v46 = vld [vmem:[#allocation3 + $0x26] sm:$0xff]  ;;  %v3279_v17 = vld [vmem:[#allocation3 + $0x4e] sm:$0xff] }
 0x3ca   : > { %3735 = vmatprep.mubr.f32.mxu0 %v3564_v1  ;;  %v5549_v15 = vunpack.i.h.bf16 %v5547_v27  ;;  %v5548_v5 = vunpack.i.l.bf16 %v5547_v27  ;;  %v3280_v7 = vld [vmem:[#allocation3 + $0x56] sm:$0xff]  ;;  %v3281_v22 = vld [vmem:[#allocation3 + $0x5e] sm:$0x3f] }
 0x3cb   : > { %3736 = vmatmul.mubr.f32.gmra.mrb[12].mxu0 %v3534_v63 }
 0x3cc   : > { %v3545_v2 = vsel %vm3061_vm0, %v3247_v31, %v5548_v5  ;;  %v3513_v13 = vsel %vm3061_vm0, %v3215_v60, %v5549_v15 }
 0x3d4   : > { %v5557_v26 = vpop.permute.xlu1 %5556 }
 0x3d5   : > { %v5552_v51 = vpop.permute.xlu0 %5551  ;;  %v5559_v62 = vunpack.i.h.bf16 %v5557_v26  ;;  %v5558_v32 = vunpack.i.l.bf16 %v5557_v26 }
 0x3d6   : > { %v5554_v37 = vunpack.i.h.bf16 %v5552_v51  ;;  %v5553_v4 = vunpack.i.l.bf16 %v5552_v51 }
 0x3d8   : > { %v3555_v49 = vsel %vm3516_vm3, %v3545_v2, %v5553_v4  ;;  %v3524_v40 = vsel %vm3516_vm3, %v3513_v13, %v5554_v37  ;;  %v5567_v21 = vpop.permute.xlu1 %5566  ;;  %v4152_v13 = vld [vmem:[#allocation6 + $0x208] sm:$0xff] }
 0x3d9   : > { %v5562_v33 = vpop.permute.xlu0 %5561  ;;  %v3565_v61 = vsel %vm3527_vm4, %v3555_v49, %v5558_v32  ;;  %v3535_v54 = vsel %vm3527_vm4, %v3524_v40, %v5559_v62  ;;  %v5569_v19 = vunpack.i.h.bf16 %v5567_v21  ;;  %v5568_v24 = vunpack.i.l.bf16 %v5567_v21  ;;  %v4154_v49 = vld [vmem:[#allocation6 + $0x218] sm:$0xff]  ;;  %v4088_v40 = vld [vmem:[#allocation6 + $0x8] sm:$0xff] }
 0x3da   : > { %v5564_v58 = vunpack.i.h.bf16 %v5562_v33  ;;  %v5563_v47 = vunpack.i.l.bf16 %v5562_v33  ;;  %3740 = vmatprep.mubr.f32.mxu0 %v3565_v61  ;;  %v5147_v21 = vpack.c.bf16 %v4154_v49, %v4152_v13  ;;  %v4090_v33 = vld [vmem:[#allocation6 + $0x18] sm:$0xff]  ;;  %v4151_v61 = vld [vmem:[#allocation6 + $0x200] sm:$0xff]  ;;  %v4108_v49 = vld [vmem:[#allocation6 + $0xa8] sm:$0xff] }
 0x3db   : > { %3741 = vmatmul.mubr.f32.gmra.mrb[14].mxu0 %v3535_v54  ;;  %v4153_v54 = vld [vmem:[#allocation6 + $0x210] sm:$0xff]  ;;  %v4174_v13 = vld [vmem:[#allocation6 + $0x2b8] sm:$0xff] }
 0x3dc   : > { %v3546_v29 = vsel %vm3061_vm0, %v3248_v36, %v5563_v47  ;;  %v3514_v43 = vsel %vm3061_vm0, %v3216_v12, %v5564_v58  ;;  %v5577_v0 = vpop.permute.xlu1 %5576  ;;  %v5083_v58 = vpack.c.bf16 %v4090_v33, %v4088_v40  ;;  %v5149_v47 = vpack.c.bf16 %v4153_v54, %v4151_v61  ;;  %v4156_v36 = vld [vmem:[#allocation6 + $0x228] sm:$0xff]  ;;  %5148 = vmatprep.subr.bf16.mxu1 %v5147_v21  ;;  %v4110_v40 = vld [vmem:[#allocation6 + $0xb8] sm:$0xff] }
 0x3dd   : > { %v5572_v6 = vpop.permute.xlu0 %5571  ;;  %v5579_v57 = vunpack.i.h.bf16 %v5577_v0  ;;  %v5578_v52 = vunpack.i.l.bf16 %v5577_v0  ;;  %v3556_v25 = vsel %vm3516_vm3, %v3546_v29, %v5568_v24  ;;  %v3525_v55 = vsel %vm3516_vm3, %v3514_v43, %v5569_v19  ;;  %v4087_v19 = vld [vmem:[#allocation6] sm:$0xff]  ;;  %v4089_v24 = vld [vmem:[#allocation6 + $0x10] sm:$0xff]  ;;  %v4158_v29 = vld [vmem:[#allocation6 + $0x238] sm:$0xff] }
 0x3de   : > { %v5574_v53 = vunpack.i.h.bf16 %v5572_v6  ;;  %v5573_v35 = vunpack.i.l.bf16 %v5572_v6  ;;  %v5085_v12 = vpack.c.bf16 %v4089_v24, %v4087_v19  ;;  %v4092_v43 = vld [vmem:[#allocation6 + $0x28] sm:$0xff]  ;;  %v4094_v0 = vld [vmem:[#allocation6 + $0x38] sm:$0xff]  ;;  %5084 = vmatprep.subr.bf16.mxu0 %v5083_v58  ;;  %5150 = vmatpush1.bf16.msra.mxu1 %v5149_v47  ;;  %v5151_v6 = vpack.c.bf16 %v4158_v29, %v4156_v36  ;;  %v4171_v58 = vld [vmem:[#allocation6 + $0x2a0] sm:$0xff] }
 0x3df   : > { %v3547_v8 = vsel %vm3061_vm0, %v3249_v18, %v5578_v52  ;;  %v3515_v3 = vsel %vm3061_vm0, %v3217_v11, %v5579_v57  ;;  %v4157_v57 = vld [vmem:[#allocation6 + $0x230] sm:$0xff]  ;;  %v4091_v52 = vld [vmem:[#allocation6 + $0x20] sm:$0xff]  ;;  %v5103_v36 = vpack.c.bf16 %v4110_v40, %v4108_v49  ;;  %v4176_v29 = vld [vmem:[#allocation6 + $0x2c8] sm:$0xff] }
 0x3e0   : > { %v3566_v30 = vsel %vm3527_vm4, %v3556_v25, %v5573_v35  ;;  %v3536_v41 = vsel %vm3527_vm4, %v3525_v55, %v5574_v53  ;;  %v5587_v56 = vpop.permute.xlu1 %5586  ;;  %v5087_v53 = vpack.c.bf16 %v4094_v0, %v4092_v43  ;;  %v4155_v35 = vld [vmem:[#allocation6 + $0x220] sm:$0xff]  ;;  %v4093_v55 = vld [vmem:[#allocation6 + $0x30] sm:$0xff]  ;;  %5152 = vmatprep.subr.bf16.mxu1 %v5151_v6  ;;  %v4178_v43 = vld [vmem:[#allocation6 + $0x2d8] sm:$0xff] }
 0x3e1   : > { %v5582_v48 = vpop.permute.xlu0 %5581  ;;  %3745 = vmatprep.mubr.f32.mxu0 %v3566_v30  ;;  %v5589_v9 = vunpack.i.h.bf16 %v5587_v56  ;;  %v5588_v28 = vunpack.i.l.bf16 %v5587_v56  ;;  %v5153_v25 = vpack.c.bf16 %v4157_v57, %v4155_v35  ;;  %v4160_v30 = vld [vmem:[#allocation6 + $0x248] sm:$0xff]  ;;  %v5089_v56 = vpack.c.bf16 %v4093_v55, %v4091_v52  ;;  %v4161_v18 = vld [vmem:[#allocation6 + $0x250] sm:$0xff]  ;;  %v4095_v11 = vld [vmem:[#allocation6 + $0x40] sm:$0xff] }
 0x3e2   : > { %v5584_v42 = vunpack.i.h.bf16 %v5582_v48  ;;  %v5583_v39 = vunpack.i.l.bf16 %v5582_v48  ;;  %3746 = vmatmul.mubr.f32.gmra.mrb[16].mxu0 %v3536_v41  ;;  %v4162_v41 = vld [vmem:[#allocation6 + $0x258] sm:$0xff]  ;;  %v4173_v47 = vld [vmem:[#allocation6 + $0x2b0] sm:$0xff]  ;;  %v4107_v19 = vld [vmem:[#allocation6 + $0xa0] sm:$0xff]  ;;  %v5171_v52 = vpack.c.bf16 %v4178_v43, %v4176_v29 }
 0x3e3   : > { %v5155_v48 = vpack.c.bf16 %v4162_v41, %v4160_v30  ;;  %5154 = vmatpush1.bf16.msra.mxu1 %v5153_v25  ;;  %v4112_v6 = vld [vmem:[#allocation6 + $0xc8] sm:$0xff]  ;;  %v5169_v35 = vpack.c.bf16 %v4173_v47, %v4171_v58  ;;  %v4175_v25 = vld [vmem:[#allocation6 + $0x2c0] sm:$0xff]  ;;  %v4177_v55 = vld [vmem:[#allocation6 + $0x2d0] sm:$0xff] }
 0x3e4   : > { %v3557_v50 = vsel %vm3516_vm3, %v3547_v8, %v5583_v39  ;;  %v3526_v59 = vsel %vm3516_vm3, %v3515_v3, %v5584_v42  ;;  %v4159_v42 = vld [vmem:[#allocation6 + $0x240] sm:$0xff]  ;;  %v4097_v8 = vld [vmem:[#allocation6 + $0x50] sm:$0xff] }
 0x3e5   : > { %v3567_v38 = vsel %vm3527_vm4, %v3557_v50, %v5588_v28  ;;  %v3537_v34 = vsel %vm3527_vm4, %v3526_v59, %v5589_v9  ;;  %v4096_v9 = vld [vmem:[#allocation6 + $0x48] sm:$0xff]  ;;  %v4098_v28 = vld [vmem:[#allocation6 + $0x58] sm:$0xff]  ;;  %v5157_v3 = vpack.c.bf16 %v4161_v18, %v4159_v42  ;;  %5156 = vmatprep.subr.bf16.mxu1 %v5155_v48  ;;  %v4111_v30 = vld [vmem:[#allocation6 + $0xc0] sm:$0xff] }
 0x3e6   : > { %3750 = vmatprep.mubr.f32.mxu0 %v3567_v38  ;;  %v5091_v39 = vpack.c.bf16 %v4098_v28, %v4096_v9  ;;  %v4164_v50 = vld [vmem:[#allocation6 + $0x268] sm:$0xff]  ;;  %v4166_v59 = vld [vmem:[#allocation6 + $0x278] sm:$0xff]  ;;  %v4123_v49 = vld [vmem:[#allocation6 + $0x120] sm:$0xff] }
 0x3e7   : > { %3751 = vmatmul.mubr.f32.gmra.mrb[18].mxu0 %v3537_v34  ;;  %v4100_v38 = vld [vmem:[#allocation6 + $0x68] sm:$0xff]  ;;  %v5093_v34 = vpack.c.bf16 %v4097_v8, %v4095_v11  ;;  %5158 = vmatpush1.bf16.msra.mxu1 %v5157_v3  ;;  %v4182_v9 = vld [vmem:[#allocation6 + $0x2f8] sm:$0xff]  ;;  %v4179_v8 = vld [vmem:[#allocation6 + $0x2e0] sm:$0xff] }
 0x3e8   : > { %5028 = vmatprep.mubr.msk.f32.mxu0 %vm3061_vm0, %v3272_v45  ;;  %v5159_v45 = vpack.c.bf16 %v4166_v59, %v4164_v50  ;;  %v4180_v48 = vld [vmem:[#allocation6 + $0x2e8] sm:$0xff]  ;;  %v4118_v42 = vld [vmem:[#allocation6 + $0xf8] sm:$0xff]  ;;  %v4181_v3 = vld [vmem:[#allocation6 + $0x2f0] sm:$0xff] }
 0x3e9   : > { %v4116_v28 = vld [vmem:[#allocation6 + $0xe8] sm:$0xff]  ;;  %v5175_v11 = vpack.c.bf16 %v4182_v9, %v4180_v48  ;;  %v4115_v50 = vld [vmem:[#allocation6 + $0xe0] sm:$0xff]  ;;  %v4125_v40 = vld [vmem:[#allocation6 + $0x130] sm:$0xff] }
 0x3ea   : > { %5160 = vmatprep.subr.bf16.mxu1 %v5159_v45  ;;  %v5111_v59 = vpack.c.bf16 %v4118_v42, %v4116_v28  ;;  %v4186_v45 = vld [vmem:[#allocation6 + $0x318] sm:$0xff] }
 0x3eb   : > { %5029 = vmatmul.mubr.msk.f32.vlgmr.msra.gmra.mrb[20].mxu0 %vm3061_vm0, %v3273_v20  ;;  %v4102_v20 = vld [vmem:[#allocation6 + $0x78] sm:$0xff] }
 0x3ec   : > { %5031 = vmatprep.mubr.msk.f32.mxu0 %vm3061_vm0, %v3274_v46  ;;  %5086 = vmatpush1.bf16.msra.mxu0 %v5085_v12  ;;  %v4163_v46 = vld [vmem:[#allocation6 + $0x260] sm:$0xff]  ;;  %v4109_v12 = vld [vmem:[#allocation6 + $0xb0] sm:$0xff] }
 0x3ed   : > { %5088 = vmatprep.subr.bf16.mxu0 %v5087_v53  ;;  %v4114_v53 = vld [vmem:[#allocation6 + $0xd8] sm:$0xff]  ;;  %v5105_v57 = vpack.c.bf16 %v4109_v12, %v4107_v19 }
 0x3ee   : > { %v5107_v41 = vpack.c.bf16 %v4114_v53, %v4112_v6  ;;  %v4895_v53 = vld [vmem:[%s8122_s4] ss:$0 sm:$0xff] }
 0x3ef   : > { %5032 = vmatmul.mubr.msk.f32.gmra.mrb[22].mxu0 %vm3061_vm0, %v3275_v10  ;;  %v4165_v10 = vld [vmem:[#allocation6 + $0x270] sm:$0xff] }
 0x3f0   : > { %5034 = vmatprep.mubr.msk.f32.mxu0 %vm3061_vm0, %v3276_v23  ;;  %5090 = vmatpush1.bf16.msra.mxu0 %v5089_v56  ;;  %v5095_v23 = vpack.c.bf16 %v4102_v20, %v4100_v38  ;;  %v4113_v56 = vld [vmem:[#allocation6 + $0xd0] sm:$0xff]  ;;  %v4120_v20 = vld [vmem:[#allocation6 + $0x108] sm:$0xff] }
 0x3f1   : > { %5092 = vmatprep.subr.bf16.mxu0 %v5091_v39  ;;  %v5173_v39 = vpack.c.bf16 %v4177_v55, %v4175_v25  ;;  %v5109_v18 = vpack.c.bf16 %v4113_v56, %v4111_v30  ;;  %v4117_v38 = vld [vmem:[#allocation6 + $0xf0] sm:$0xff] }
 0x3f3   : > { %5035 = vmatmul.mubr.msk.f32.gmra.mrb[24].mxu0 %vm3061_vm0, %v3277_v16  ;;  %v4099_v16 = vld [vmem:[#allocation6 + $0x60] sm:$0xff] }
 0x3f4   : > { %5037 = vmatprep.mubr.msk.f32.mxu0 %vm3061_vm0, %v3278_v44  ;;  %v4101_v44 = vld [vmem:[#allocation6 + $0x70] sm:$0xff]  ;;  %5094 = vmatpush1.bf16.msra.mxu0 %v5093_v34  ;;  %v4184_v34 = vld [vmem:[#allocation6 + $0x308] sm:$0xff] }
 0x3f5   : > { %5096 = vmatprep.subr.bf16.mxu0 %v5095_v23  ;;  %v5113_v23 = vpack.c.bf16 %v4117_v38, %v4115_v50 }
 0x3f7   : > { %5038 = vmatmul.mubr.msk.f32.gmra.mrb[26].mxu0 %vm3061_vm0, %v3279_v17  ;;  %v4168_v17 = vld [vmem:[#allocation6 + $0x288] sm:$0xff] }
 0x3f8   : > { %5040 = vmatprep.mubr.msk.f32.mxu0 %vm3061_vm0, %v3280_v7  ;;  %v4170_v7 = vld [vmem:[#allocation6 + $0x298] sm:$0xff] }
 0x3fb   : > { %5041 = vmatmul.mubr.msk.f32.gmra.mrb[28].mxu0 %vm3061_vm0, %v3281_v22  ;;  %v4104_v22 = vld [vmem:[#allocation6 + $0x88] sm:$0xff] }
 0x423   : > { %v4941_v14 = vpop.f32.mrb[0].mxu0 }
 0x424   : > { %v4942_v1 = vpop.f32.mrb[1].mxu0 }
 0x425   : > { %v7840_v63 = vadd.f32 %v4942_v1, %v4941_v14  ;;  %v4106_v14 = vld [vmem:[#allocation6 + $0x98] sm:$0xff]  ;;  %v5161_v1 = vpack.c.bf16 %v4165_v10, %v4163_v46  ;;  %v5177_v10 = vpack.c.bf16 %v4181_v3, %v4179_v8 }
 0x426   : > { %v4122_v46 = vld [vmem:[#allocation6 + $0x118] sm:$0xff] }
 0x427   : > { %5162 = vmatpush1.bf16.msra.mxu1 %v5161_v1  ;;  %v4188_v1 = vld [vmem:[#allocation6 + $0x328] sm:$0xff]  ;;  %v3708_v25 = vadd.f32 %v7840_v63, %v4895_v53 }
 0x428   : > { %v4944_v27 = vpop.f32.mrb[2].mxu0 }
 0x429   : > { %v4945_v15 = vpop.f32.mrb[3].mxu0 }
 0x42a   : > { %v7842_v5 = vadd.f32 %v4945_v15, %v4944_v27  ;;  %v5097_v27 = vpack.c.bf16 %v4101_v44, %v4099_v16  ;;  %v5163_v15 = vpack.c.bf16 %v4170_v7, %v4168_v17  ;;  %v5179_v16 = vpack.c.bf16 %v4186_v45, %v4184_v34  ;;  %v4183_v44 = vld [vmem:[#allocation6 + $0x300] sm:$0xff]  ;;  %v4185_v17 = vld [vmem:[#allocation6 + $0x310] sm:$0xff] }
 0x42b   : > { %v4119_v7 = vld [vmem:[#allocation6 + $0x100] sm:$0xff]  ;;  %v3902_v45 = vlaneseq }
 0x42c   : > { %5098 = vmatpush1.bf16.msra.mxu0 %v5097_v27  ;;  %5164 = vmatprep.subr.bf16.mxu1 %v5163_v15  ;;  %v4190_v27 = vld [vmem:[#allocation6 + $0x338] sm:$0xff]  ;;  %v4124_v15 = vld [vmem:[#allocation6 + $0x128] sm:$0xff] }
 0x42d   : > { %vm7876_vm6 = vcmp.lt.s32.totalorder %v3902_v45, 64  ;;  %vm3933_vm7 = vcmp.ge.s32.totalorder %v3902_v45, 64  ;;  %vm3934_vm8 = vcmp.lt.s32.totalorder %v3902_v45, 128 }
 0x42e   : > { %vm7920_vm9 = vmand %vm3933_vm7, %vm3934_vm8 }
 0x42f   : > { %v4947_v26 = vpop.f32.mrb[4].mxu0 }
 0x430   : > { %v4948_v51 = vpop.f32.mrb[5].mxu0 }
 0x431   : > { %v7844_v62 = vadd.f32 %v4948_v51, %v4947_v26  ;;  %v4167_v26 = vld [vmem:[#allocation6 + $0x280] sm:$0xff]  ;;  %v4169_v51 = vld [vmem:[#allocation6 + $0x290] sm:$0xff] }
 0x432   : > { %v5165_v21 = vpack.c.bf16 %v4169_v51, %v4167_v26  ;;  %v4126_v26 = vld [vmem:[#allocation6 + $0x138] sm:$0xff]  ;;  %v5181_v51 = vpack.c.bf16 %v4185_v17, %v4183_v44 }
 0x433   : > { %v3718_v42 = vadd.f32 %v7844_v62, %v4895_v53 }
 0x434   : > { %v4950_v32 = vpop.f32.mrb[6].mxu0  ;;  %5166 = vmatpush1.bf16.msra.mxu1 %v5165_v21 }
 0x435   : > { %v4951_v37 = vpop.f32.mrb[7].mxu0 }
 0x436   : > { %v7846_v4 = vadd.f32 %v4951_v37, %v4950_v32  ;;  %v4103_v32 = vld [vmem:[#allocation6 + $0x80] sm:$0xff]  ;;  %v5099_v37 = vpack.c.bf16 %v4106_v14, %v4104_v22  ;;  %v5115_v22 = vpack.c.bf16 %v4122_v46, %v4120_v20  ;;  %v4121_v14 = vld [vmem:[#allocation6 + $0x110] sm:$0xff]  ;;  %v5718_v20 = vmov 1966171168  }
 0x437   : > { %v3909_v46 = vunpack.c.l.s4 %v5718_v20 }
 0x438   : > { %5100 = vmatprep.subr.bf16.mxu0 %v5099_v37  ;;  %v5183_v37 = vpack.c.bf16 %v4190_v27, %v4188_v1  ;;  %v3723_v48 = vadd.f32 %v7846_v4, %v4895_v53  ;;  %v7868_v27 = vshrl.u32 %v3902_v45, 7 }
 0x439   : > { %v3910_v1 = vunpack.c.0.s8 %v3909_v46 }
 0x43b   : > { %v4953_v31 = vpop.f32.mrb[8].mxu0 }
 0x43c   : > { %v4954_v60 = vpop.f32.mrb[9].mxu0 }
 0x43d   : > { %v7848_v2 = vadd.f32 %v4954_v60, %v4953_v31  ;;  %v4105_v31 = vld [vmem:[#allocation6 + $0x90] sm:$0xff]  ;;  %v4172_v60 = vld [vmem:[#allocation6 + $0x2a8] sm:$0xff] }
 0x43e   : > { %v5101_v61 = vpack.c.bf16 %v4105_v31, %v4103_v32  ;;  %v5167_v54 = vpack.c.bf16 %v4174_v13, %v4172_v60  ;;  %v5117_v32 = vpack.c.bf16 %v4121_v14, %v4119_v7  ;;  %v4187_v31 = vld [vmem:[#allocation6 + $0x320] sm:$0xff]  ;;  %v4189_v60 = vld [vmem:[#allocation6 + $0x330] sm:$0xff]  ;;  %v5119_v13 = vpack.c.bf16 %v4126_v26, %v4124_v15 }
 0x43f   : > { %v5185_v21 = vpack.c.bf16 %v4189_v60, %v4187_v31  ;;  %v3728_v50 = vadd.f32 %v7848_v2, %v4895_v53  ;;  %v4128_v31 = vld [vmem:[#allocation6 + $0x148] sm:$0xff] }
 0x440   : > { %5102 = vmatpush1.bf16.msra.mxu0 %v5101_v61  ;;  %5168 = vmatprep.subr.bf16.mxu1 %v5167_v54 }
 0x441   : > { %5104 = vmatprep.subr.bf16.mxu0 %v5103_v36  ;;  %5170 = vmatpush1.bf16.msra.mxu1 %v5169_v35 }
 0x442   : > { %5172 = vmatprep.subr.bf16.mxu1 %v5171_v52 }
 0x444   : > { %5106 = vmatpush1.bf16.msra.mxu0 %v5105_v57  ;;  %v3713_v57 = vadd.f32 %v7842_v5, %v4895_v53 }
 0x445   : > { %5108 = vmatprep.subr.bf16.mxu0 %v5107_v41  ;;  %5174 = vmatpush1.bf16.msra.mxu1 %v5173_v39 }
 0x446   : > { %5176 = vmatprep.subr.bf16.mxu1 %v5175_v11 }
 0x448   : > { %5110 = vmatpush1.bf16.msra.mxu0 %v5109_v18 }
 0x449   : > { %5112 = vmatprep.subr.bf16.mxu0 %v5111_v59  ;;  %5178 = vmatpush1.bf16.msra.mxu1 %v5177_v10 }
 0x44a   : > { %5180 = vmatprep.subr.bf16.mxu1 %v5179_v16 }
 0x44c   : > { %5114 = vmatpush1.bf16.msra.mxu0 %v5113_v23 }
 0x44d   : > { %5116 = vmatprep.subr.bf16.mxu0 %v5115_v22  ;;  %5182 = vmatpush1.bf16.msra.mxu1 %v5181_v51 }
 0x44e   : > { %5184 = vmatprep.subr.bf16.mxu1 %v5183_v37  ;;  %v4194_v37 = vld [vmem:[#allocation6 + $0x358] sm:$0xff] }
 0x450   : > { %5118 = vmatpush1.bf16.msra.mxu0 %v5117_v32  ;;  %v4192_v32 = vld [vmem:[#allocation6 + $0x348] sm:$0xff] }
 0x451   : > { %5120 = vmatprep.subr.bf16.mxu0 %v5119_v13  ;;  %5186 = vmatpush1.bf16.msra.mxu1 %v5185_v21  ;;  %v4130_v21 = vld [vmem:[#allocation6 + $0x158] sm:$0xff] }
 0x47a   : > { %v4956_v33 = vpop.f32.mrb[10].mxu0 }
 0x47b   : > { %v4957_v24 = vpop.f32.mrb[11].mxu0 }
 0x47c   : > { %v7850_v0 = vadd.f32 %v4957_v24, %v4956_v33  ;;  %v5121_v33 = vpack.c.bf16 %v4125_v40, %v4123_v49  ;;  %v5187_v40 = vpack.c.bf16 %v4194_v37, %v4192_v32  ;;  %v4201_v32 = vld [vmem:[#allocation6 + $0x390] sm:$0xff]  ;;  %v4135_v37 = vld [vmem:[#allocation6 + $0x180] sm:$0xff] }
 0x47e   : > { %5122 = vmatpush1.bf16.msra.mxu0 %v5121_v33  ;;  %v3733_v63 = vadd.f32 %v7850_v0, %v4895_v53  ;;  %v4191_v33 = vld [vmem:[#allocation6 + $0x340] sm:$0xff]  ;;  %5188 = vmatprep.subr.bf16.mxu1 %v5187_v40  ;;  %v4137_v40 = vld [vmem:[#allocation6 + $0x190] sm:$0xff] }
 0x49e   : > { %v4959_v61 = vpop.f32.mrb[12].mxu0 }
 0x49f   : > { %v4960_v54 = vpop.f32.mrb[13].mxu0 }
 0x4a0   : > { %v4961_v58 = vadd.f32 %v4960_v54, %v4959_v61 }
 0x4a2   : > { %v3738_v16 = vadd.f32 %v4961_v58, %v4895_v53 }
 0x4ae   : > { %v4962_v47 = vpop.f32.mrb[14].mxu0 }
 0x4af   : > { %v4963_v19 = vpop.f32.mrb[15].mxu0 }
 0x4b0   : > { %v4964_v24 = vadd.f32 %v4963_v19, %v4962_v47  ;;  %v5123_v47 = vpack.c.bf16 %v4130_v21, %v4128_v31  ;;  %v4204_v21 = vld [vmem:[#allocation6 + $0x3a8] sm:$0xff] }
 0x4b2   : > { %v3743_v34 = vadd.f32 %v4964_v24, %v4895_v53  ;;  %5124 = vmatprep.subr.bf16.mxu0 %v5123_v47  ;;  %v5133_v47 = vpack.c.bf16 %v4137_v40, %v4135_v37  ;;  %v4149_v37 = vld [vmem:[#allocation6 + $0x1f0] sm:$0xff]  ;;  %v4216_v40 = vld [vmem:[#allocation6 + $0x408] sm:$0xff] }
 0x4b5   : > { %v4965_v36 = vpop.f32.mrb[16].mxu0 }
 0x4b6   : > { %v4966_v12 = vpop.f32.mrb[17].mxu0 }
 0x4b7   : > { %v4967_v29 = vadd.f32 %v4966_v12, %v4965_v36  ;;  %v7873_v12 = vsub.s32 %v3910_v1, %v7868_v27 }
 0x4b9   : > { %v3748_v51 = vadd.f32 %v4967_v29, %v4895_v53 }
 0x4ba   : > { %v4968_v43 = vpop.f32.mrb[18].mxu0 }
 0x4bb   : > { %v4969_v6 = vpop.f32.mrb[19].mxu0 }
 0x4bc   : > { %v4970_v35 = vadd.f32 %v4969_v6, %v4968_v43  ;;  %v4193_v43 = vld [vmem:[#allocation6 + $0x350] sm:$0xff]  ;;  %v4127_v6 = vld [vmem:[#allocation6 + $0x140] sm:$0xff] }
 0x4be   : > { %v5030_v52 = vpop.f32.mrb[20].mxu0  ;;  %v3753_v22 = vadd.f32 %v4970_v35, %v4895_v53 }
 0x4bf   : > { %v3828_v55 = vadd.f32 %v5030_v52, %v3713_v57  ;;  %v3822_v30 = vpop.f32.mrb[21].mxu0  ;;  %v5189_v57 = vpack.c.bf16 %v4193_v43, %v4191_v33  ;;  %v4129_v52 = vld [vmem:[#allocation6 + $0x150] sm:$0xff]  ;;  %v4206_v33 = vld [vmem:[#allocation6 + $0x3b8] sm:$0xff] }
 0x4c0   : > { %v3823_v41 = vadd.f32 %v3822_v30, %v3708_v25  ;;  %v4196_v25 = vld [vmem:[#allocation6 + $0x368] sm:$0xff] }
 0x4c1   : > { %v3872_v56 = vmax.f32 %v3828_v55, 0.0  ;;  %5190 = vmatpush1.bf16.msra.mxu1 %v5189_v57 }
 0x4c2   : > { %v3871_v9 = vmax.f32 %v3823_v41, 0.0  ;;  %v5033_v28 = vpop.f32.mrb[22].mxu0 }
 0x4c3   : > { %3882 = vst.msk [vmem:[#allocation4 + $0x8] sm:$0xff] %vm3516_vm3, %v3872_v56  ;;  %v3838_v39 = vadd.f32 %v5033_v28, %v3723_v48  ;;  %v3832_v18 = vpop.f32.mrb[23].mxu0  ;;  %v5125_v48 = vpack.c.bf16 %v4129_v52, %v4127_v6  ;;  %v4140_v52 = vld [vmem:[#allocation6 + $0x1a8] sm:$0xff] }
 0x4c4   : > { %3881 = vst.msk [vmem:[#allocation4] sm:$0xff] %vm3516_vm3, %v3871_v9  ;;  %v3833_v5 = vadd.f32 %v3832_v18, %v3718_v42  ;;  %v4132_v18 = vld [vmem:[#allocation6 + $0x168] sm:$0xff] }
 0x4c5   : > { %v3874_v11 = vmax.f32 %v3838_v39, 0.0  ;;  %v4198_v39 = vld [vmem:[#allocation6 + $0x378] sm:$0xff]  ;;  %5126 = vmatpush1.bf16.msra.mxu0 %v5125_v48  ;;  %v4205_v48 = vld [vmem:[#allocation6 + $0x3b0] sm:$0xff] }
 0x4c6   : > { %v3873_v8 = vmax.f32 %v3833_v5, 0.0  ;;  %v5036_v3 = vpop.f32.mrb[24].mxu0 }
 0x4c7   : > { %3884 = vst.msk [vmem:[#allocation4 + $0x18] sm:$0xff] %vm3516_vm3, %v3874_v11  ;;  %v3848_v4 = vadd.f32 %v5036_v3, %v3733_v63  ;;  %v3842_v59 = vpop.f32.mrb[25].mxu0  ;;  %v5191_v11 = vpack.c.bf16 %v4198_v39, %v4196_v25  ;;  %v4134_v63 = vld [vmem:[#allocation6 + $0x178] sm:$0xff]  ;;  %v4197_v3 = vld [vmem:[#allocation6 + $0x370] sm:$0xff] }
 0x4c8   : > { %3883 = vst.msk [vmem:[#allocation4 + $0x10] sm:$0xff] %vm3516_vm3, %v3873_v8  ;;  %v3843_v62 = vadd.f32 %v3842_v59, %v3728_v50  ;;  %v4195_v8 = vld [vmem:[#allocation6 + $0x360] sm:$0xff]  ;;  %v4142_v25 = vld [vmem:[#allocation6 + $0x1b8] sm:$0xff] }
 0x4c9   : > { %v3876_v38 = vmax.f32 %v3848_v4, 0.0  ;;  %v5127_v4 = vpack.c.bf16 %v4134_v63, %v4132_v18  ;;  %v5193_v59 = vpack.c.bf16 %v4197_v3, %v4195_v8  ;;  %5192 = vmatprep.subr.bf16.mxu1 %v5191_v11  ;;  %v5135_v39 = vpack.c.bf16 %v4142_v25, %v4140_v52  ;;  %v4208_v11 = vld [vmem:[#allocation6 + $0x3c8] sm:$0xff]  ;;  %v4210_v63 = vld [vmem:[#allocation6 + $0x3d8] sm:$0xff]  ;;  %v4217_v52 = vld [vmem:[#allocation6 + $0x410] sm:$0xff] }
 0x4ca   : > { %v3875_v10 = vmax.f32 %v3843_v62, 0.0  ;;  %v5039_v23 = vpop.f32.mrb[26].mxu0  ;;  %v4131_v62 = vld [vmem:[#allocation6 + $0x160] sm:$0xff]  ;;  %v4144_v8 = vld [vmem:[#allocation6 + $0x1c8] sm:$0xff]  ;;  %v4367_v25 = vsub.s32 5, %v7868_v27 }
 0x4cb   : > { %3886 = vst.msk [vmem:[#allocation4 + $0x28] sm:$0xff] %vm3516_vm3, %v3876_v38  ;;  %v3858_v0 = vadd.f32 %v5039_v23, %v3743_v34  ;;  %v3852_v44 = vpop.f32.mrb[27].mxu0  ;;  %v3892_v17 = vld [vmem:[#allocation4] ss:$2 sm:$0xf]  ;;  %v4133_v38 = vld [vmem:[#allocation6 + $0x170] sm:$0xff]  ;;  %5128 = vmatprep.subr.bf16.mxu0 %v5127_v4  ;;  %5194 = vmatpush1.bf16.msra.mxu1 %v5193_v59  ;;  %v5203_v4 = vpack.c.bf16 %v4210_v63, %v4208_v11 }
 0x4cc   : > { %3885 = vst.msk [vmem:[#allocation4 + $0x20] sm:$0xff] %vm3516_vm3, %v3875_v10  ;;  %v3853_v2 = vadd.f32 %v3852_v44, %v3738_v16  ;;  %v3894_v14 = vld [vmem:[#allocation4 + $0x1] ss:$2 sm:$0xf]  ;;  %v5129_v16 = vpack.c.bf16 %v4133_v38, %v4131_v62  ;;  %v4146_v59 = vld [vmem:[#allocation6 + $0x1d8] sm:$0xff]  ;;  %v4207_v62 = vld [vmem:[#allocation6 + $0x3c0] sm:$0xff] }
 0x4cd   : > { %v3878_v7 = vmax.f32 %v3858_v0, 0.0  ;;  %v3895_v24 = vmax.f32 %v3892_v17, %v3894_v14  ;;  %v4200_v34 = vld [vmem:[#allocation6 + $0x388] sm:$0xff]  ;;  %v4202_v17 = vld [vmem:[#allocation6 + $0x398] sm:$0xff]  ;;  %v4209_v38 = vld [vmem:[#allocation6 + $0x3d0] sm:$0xff] }
 0x4ce   : > { %v3877_v15 = vmax.f32 %v3853_v2, 0.0  ;;  %v5042_v26 = vpop.f32.mrb[28].mxu0  ;;  %5130 = vmatpush1.bf16.msra.mxu0 %v5129_v16  ;;  %v4224_v63 = vld [vmem:[#allocation6 + $0x448] sm:$0xff] }
 0x4cf   : > { %3888 = vst.msk [vmem:[#allocation4 + $0x38] sm:$0xff] %vm3516_vm3, %v3878_v7  ;;  %v3868_v60 = vadd.f32 %v5042_v26, %v3753_v22  ;;  %v3862_v13 = vpop.f32.mrb[29].mxu0  ;;  %v3897_v49 = vld [vmem:[#allocation4 + $0xa] ss:$2 sm:$0xf]  ;;  %v4136_v7 = vld [vmem:[#allocation6 + $0x188] sm:$0xff] }
 0x4d0   : > { %3887 = vst.msk [vmem:[#allocation4 + $0x30] sm:$0xff] %vm3516_vm3, %v3877_v15  ;;  %v3863_v61 = vadd.f32 %v3862_v13, %v3748_v51  ;;  %v3899_v54 = vld [vmem:[#allocation4 + $0xb] ss:$2 sm:$0xf]  ;;  %v5195_v15 = vpack.c.bf16 %v4202_v17, %v4200_v34  ;;  %v4199_v51 = vld [vmem:[#allocation6 + $0x380] sm:$0xff]  ;;  %v4148_v17 = vld [vmem:[#allocation6 + $0x1e8] sm:$0xff] }
 0x4d1   : > { %v3946_v58 = vld [vmem:[#allocation4 + $0x14] ss:$2 sm:$0xf]  ;;  %v3880_v19 = vmax.f32 %v3868_v60, 0.0  ;;  %v3900_v36 = vmax.f32 %v3897_v49, %v3899_v54  ;;  %v5197_v49 = vpack.c.bf16 %v4201_v32, %v4199_v51 }
 0x4d2   : > { %v3948_v29 = vld [vmem:[#allocation4 + $0x15] ss:$2 sm:$0xf]  ;;  %v3879_v53 = vmax.f32 %v3863_v61, 0.0  ;;  %5196 = vmatprep.subr.bf16.mxu1 %v5195_v15 }
 0x4d3   : > { %3891 = vst.msk [vmem:[#allocation4 + $0x48] sm:$0x3f] %vm3890_vm5, %v3880_v19  ;;  %v3901_v55 = vmax.f32 %v3895_v24, %v3900_v36  ;;  %v3951_v30 = vld [vmem:[#allocation4 + $0x1e] ss:$2 sm:$0xf]  ;;  %v3949_v9 = vmax.f32 %v3946_v58, %v3948_v29  ;;  %v4138_v22 = vld [vmem:[#allocation6 + $0x198] sm:$0xff]  ;;  %v5199_v19 = vpack.c.bf16 %v4206_v33, %v4204_v21  ;;  %5198 = vmatpush1.bf16.msra.mxu1 %v5197_v49 }
 0x4d4   : > { %v3953_v41 = vld [vmem:[#allocation4 + $0x1f] ss:$2 sm:$0xf]  ;;  %v3993_v56 = vld [vmem:[#allocation4 + $0x28] ss:$2 sm:$0xf]  ;;  %v5131_v26 = vpack.c.bf16 %v4138_v22, %v4136_v7 }
 0x4d5   : > { %3889 = vst.msk [vmem:[#allocation4 + $0x40] sm:$0xff] %vm3516_vm3, %v3879_v53  ;;  %v3954_v28 = vmax.f32 %v3951_v30, %v3953_v41  ;;  %v3995_v42 = vld [vmem:[#allocation4 + $0x29] ss:$2 sm:$0xf]  ;;  %v3914_v5 = vrot.slane %v3901_v55, %v7873_v12  ;;  %5200 = vmatprep.subr.bf16.mxu1 %v5199_v19  ;;  %v4150_v7 = vld [vmem:[#allocation6 + $0x1f8] sm:$0xff]  ;;  %v4211_v15 = vld [vmem:[#allocation6 + $0x3e0] sm:$0xff] }
 0x4d6   : > { %3906 = vst.msk [vmem:[#allocation5] sm:$0x1] %vm7876_vm6, %v3901_v55  ;;  %v3996_v44 = vmax.f32 %v3993_v56, %v3995_v42  ;;  %5132 = vmatprep.subr.bf16.mxu0 %v5131_v26  ;;  %v4203_v55 = vld [vmem:[#allocation6 + $0x3a0] sm:$0xff]  ;;  %v4213_v26 = vld [vmem:[#allocation6 + $0x3f0] sm:$0xff]  ;;  %v5143_v32 = vpack.c.bf16 %v4150_v7, %v4148_v17  ;;  %v4218_v21 = vld [vmem:[#allocation6 + $0x418] sm:$0xff] }
 0x4d7   : > { %v3955_v50 = vmax.f32 %v3949_v9, %v3954_v28  ;;  %v3915_v20 = vcombine.high %v3914_v5, %v3914_v5  ;;  %v3998_v46 = vld [vmem:[#allocation4 + $0x32] ss:$2 sm:$0xf]  ;;  %v4000_v10 = vld [vmem:[#allocation4 + $0x33] ss:$2 sm:$0xf]  ;;  %v3922_v23 = vrot.slane %v3914_v5, %v7873_v12  ;;  %5134 = vmatpush1.bf16.msra.mxu0 %v5133_v47  ;;  %v5201_v18 = vpack.c.bf16 %v4205_v48, %v4203_v55 }
 0x4d8   : > { %v4001_v2 = vmax.f32 %v3998_v46, %v4000_v10  ;;  %v4139_v9 = vld [vmem:[#allocation6 + $0x1a0] sm:$0xff]  ;;  %v4141_v28 = vld [vmem:[#allocation6 + $0x1b0] sm:$0xff]  ;;  %5136 = vmatprep.subr.bf16.mxu0 %v5135_v39  ;;  %v4220_v55 = vld [vmem:[#allocation6 + $0x428] sm:$0xff] }
 0x4d9   : > { %v3964_v0 = vrot.slane %v3955_v50, %v7873_v12  ;;  %3956 = vst.msk [vmem:[#allocation5 + $0x2] sm:$0x1] %vm7876_vm6, %v3955_v50  ;;  %v3929_v14 = vrot.slane %v3915_v20, %v7873_v12  ;;  %v3937_v1 = vcombine.high %v3922_v23, %v3922_v23  ;;  %v5137_v5 = vpack.c.bf16 %v4141_v28, %v4139_v9  ;;  %v4143_v46 = vld [vmem:[#allocation6 + $0x1c0] sm:$0xff]  ;;  %v4145_v10 = vld [vmem:[#allocation6 + $0x1d0] sm:$0xff]  ;;  %v4212_v23 = vld [vmem:[#allocation6 + $0x3e8] sm:$0xff] }
 0x4da   : > { %v4002_v60 = vmax.f32 %v3996_v44, %v4001_v2  ;;  %v5139_v20 = vpack.c.bf16 %v4146_v59, %v4144_v8  ;;  %5202 = vmatpush1.bf16.msra.mxu1 %v5201_v18  ;;  %v5141_v44 = vpack.c.bf16 %v4145_v10, %v4143_v46  ;;  %v4214_v2 = vld [vmem:[#allocation6 + $0x3f8] sm:$0xff]  ;;  %v4147_v51 = vld [vmem:[#allocation6 + $0x1e0] sm:$0xff]  ;;  %v4225_v59 = vld [vmem:[#allocation6 + $0x450] sm:$0xff] }
 0x4db   : > { %v3965_v31 = vcombine.high %v3964_v0, %v3964_v0  ;;  %v3972_v13 = vrot.slane %v3964_v0, %v7873_v12  ;;  %3930 = vrot.lane.b32.xlu0 %v3929_v14, %s5715_s22  ;;  %v3940_v61 = vcombine.high %v3929_v14, %v3929_v14  ;;  %3939 = vst.msk [vmem:[#allocation5 + $0x1] sm:$0x1] %vm7876_vm6, %v3937_v1  ;;  %v4219_v18 = vld [vmem:[#allocation6 + $0x420] sm:$0xff]  ;;  %v4226_v8 = vld [vmem:[#allocation6 + $0x458] sm:$0xff]  ;;  %v4229_v10 = vld [vmem:[#allocation6 + $0x470] sm:$0xff] }
 0x4dc   : > { %v4040_v54 = vld [vmem:[#allocation4 + $0x3c] ss:$2 sm:$0xf]  ;;  %v4042_v58 = vld [vmem:[#allocation4 + $0x3d] ss:$2 sm:$0xf]  ;;  %v4011_v36 = vrot.slane %v4002_v60, %v7873_v12  ;;  %5138 = vmatpush1.bf16.msra.mxu0 %v5137_v5  ;;  %v5205_v0 = vpack.c.bf16 %v4209_v38, %v4207_v62  ;;  %5204 = vmatprep.subr.bf16.mxu1 %v5203_v4  ;;  %v5207_v1 = vpack.c.bf16 %v4214_v2, %v4212_v23 }
 0x4dd   : > { %v3979_v24 = vrot.slane %v3965_v31, %v7873_v12  ;;  %v4043_v29 = vmax.f32 %v4040_v54, %v4042_v58  ;;  %v4045_v43 = vld [vmem:[#allocation4 + $0x46] ss:$2 sm:$0xf]  ;;  %v4047_v6 = vld [vmem:[#allocation4 + $0x47] ss:$2 sm:$0xf]  ;;  %v3984_v53 = vcombine.high %v3972_v13, %v3972_v13  ;;  %3941 = vrot.lane.b32.xlu1 %v3940_v61, %s5715_s22  ;;  %5140 = vmatprep.subr.bf16.mxu0 %v5139_v20 }
 0x4de   : > { %4003 = vst.msk [vmem:[#allocation5 + $0x4] sm:$0x1] %vm7876_vm6, %v4002_v60  ;;  %v4048_v57 = vmax.f32 %v4045_v43, %v4047_v6  ;;  %v4012_v41 = vcombine.high %v4011_v36, %v4011_v36  ;;  %v4019_v56 = vrot.slane %v4011_v36, %v7873_v12  ;;  %5206 = vmatpush1.bf16.msra.mxu1 %v5205_v0  ;;  %v4359_v43 = vsub.s32 3, %v7868_v27  ;;  %v4221_v5 = vld [vmem:[#allocation6 + $0x430] sm:$0xff]  ;;  %v4223_v4 = vld [vmem:[#allocation6 + $0x440] sm:$0xff]  ;;  %v4228_v62 = vld [vmem:[#allocation6 + $0x468] sm:$0xff] }
 0x4df   : > { %v3987_v30 = vcombine.high %v3979_v24, %v3979_v24  ;;  %3986 = vst.msk [vmem:[#allocation5 + $0x3] sm:$0x1] %vm7876_vm6, %v3984_v53  ;;  %3980 = vrot.lane.b32.xlu0 %v3979_v24, %s5715_s22  ;;  %v5209_v13 = vpack.c.bf16 %v4213_v26, %v4211_v15  ;;  %v5145_v49 = vpack.c.bf16 %v4149_v37, %v4147_v51  ;;  %v4347_v6 = vsub.s32 0, %v7868_v27  ;;  %v4230_v38 = vld [vmem:[#allocation6 + $0x478] sm:$0xff]  ;;  %v4227_v46 = vld [vmem:[#allocation6 + $0x460] sm:$0xff]  ;;  %v4232_v23 = vld [vmem:[#allocation6 + $0x488] sm:$0xff] }
 0x4e0   : > { %v4049_v42 = vmax.f32 %v4043_v29, %v4048_v57  ;;  %v4026_v3 = vrot.slane %v4012_v41, %v7873_v12  ;;  %v4031_v50 = vcombine.high %v4019_v56, %v4019_v56  ;;  %5142 = vmatpush1.bf16.msra.mxu0 %v5141_v44  ;;  %5208 = vmatprep.subr.bf16.mxu1 %v5207_v1  ;;  %v4351_v29 = vsub.s32 1, %v7868_v27  ;;  %v4215_v57 = vld [vmem:[#allocation6 + $0x400] sm:$0xff]  ;;  %v4233_v17 = vld [vmem:[#allocation6 + $0x490] sm:$0xff]  ;;  %v4236_v7 = vld [vmem:[#allocation6 + $0x4a8] sm:$0xff] }
 0x4e1   : > { %3988 = vrot.lane.b32.xlu1 %v3987_v30, %s5715_s22  ;;  %v5211_v61 = vpack.c.bf16 %v4218_v21, %v4216_v40  ;;  %5144 = vmatprep.subr.bf16.mxu0 %v5143_v32  ;;  %v4355_v53 = vsub.s32 2, %v7868_v27  ;;  %v4222_v30 = vld [vmem:[#allocation6 + $0x438] sm:$0xff]  ;;  %v5213_v56 = vpack.c.bf16 %v4217_v52, %v4215_v57  ;;  %v5223_v20 = vpack.c.bf16 %v4230_v38, %v4228_v62  ;;  %v4231_v2 = vld [vmem:[#allocation6 + $0x480] sm:$0xff]  ;;  %v4237_v26 = vld [vmem:[#allocation6 + $0x4b0] sm:$0xff] }
 0x4e2   : > { %v4058_v34 = vrot.slane %v4049_v42, %v7873_v12  ;;  %4050 = vst.msk [vmem:[#allocation5 + $0x6] sm:$0x1] %vm7876_vm6, %v4049_v42  ;;  %v4034_v16 = vcombine.high %v4026_v3, %v4026_v3  ;;  %4033 = vst.msk [vmem:[#allocation5 + $0x5] sm:$0x1] %vm7876_vm6, %v4031_v50  ;;  %5210 = vmatpush1.bf16.msra.mxu1 %v5209_v13  ;;  %v5215_v39 = vpack.c.bf16 %v4222_v30, %v4220_v55  ;;  %v4235_v15 = vld [vmem:[#allocation6 + $0x4a0] sm:$0xff]  ;;  %v4240_v51 = vld [vmem:[#allocation6 + $0x4c8] sm:$0xff] }
 0x4e3   : > { %4027 = vrot.lane.b32.xlu0 %v4026_v3, %s5715_s22  ;;  %5212 = vmatprep.subr.bf16.mxu1 %v5211_v61  ;;  %v5217_v3 = vpack.c.bf16 %v4221_v5, %v4219_v18  ;;  %v5219_v50 = vpack.c.bf16 %v4226_v8, %v4224_v63  ;;  %v5225_v0 = vpack.c.bf16 %v4229_v10, %v4227_v46  ;;  %v4242_v32 = vld [vmem:[#allocation6 + $0x4d8] sm:$0xff]  ;;  %v4241_v13 = vld [vmem:[#allocation6 + $0x4d0] sm:$0xff]  ;;  %v4243_v61 = vld [vmem:[#allocation6 + $0x4e0] sm:$0xff] }
 0x4e4   : > { %v4059_v22 = vcombine.high %v4058_v34, %v4058_v34  ;;  %v4066_v14 = vrot.slane %v4058_v34, %v7873_v12  ;;  %5146 = vmatpush1.bf16.msra.mxu0 %v5145_v49  ;;  %v5221_v34 = vpack.c.bf16 %v4225_v59, %v4223_v4  ;;  %v5233_v37 = vpack.c.bf16 %v4237_v26, %v4235_v15  ;;  %v4244_v49 = vld [vmem:[#allocation6 + $0x4e8] sm:$0xff]  ;;  %v4246_v40 = vld [vmem:[#allocation6 + $0x4f8] sm:$0xff]  ;;  %v4251_v57 = vld [vmem:[#allocation6 + $0x520] sm:$0xff] }
 0x4e5   : > { %4035 = vrot.lane.b32.xlu1 %v4034_v16, %s5715_s22  ;;  %v4234_v16 = vld [vmem:[#allocation6 + $0x498] sm:$0xff]  ;;  %v4253_v52 = vld [vmem:[#allocation6 + $0x530] sm:$0xff]  ;;  %v4259_v5 = vld [vmem:[#allocation6 + $0x560] sm:$0xff] }
 0x4e6   : > { %v4073_v31 = vrot.slane %v4059_v22, %v7873_v12  ;;  %v4078_v60 = vcombine.high %v4066_v14, %v4066_v14  ;;  %v5227_v44 = vpack.c.bf16 %v4234_v16, %v4232_v23  ;;  %v4238_v22 = vld [vmem:[#allocation6 + $0x4b8] sm:$0xff]  ;;  %v5229_v14 = vpack.c.bf16 %v4233_v17, %v4231_v2  ;;  %v4245_v12 = vld [vmem:[#allocation6 + $0x4f0] sm:$0xff]  ;;  %v4264_v63 = vld [vmem:[#allocation6 + $0x588] sm:$0xff] }
 0x4e7   : > { %v5231_v1 = vpack.c.bf16 %v4238_v22, %v4236_v7  ;;  %v4258_v55 = vld [vmem:[#allocation6 + $0x558] sm:$0xff]  ;;  %v5249_v30 = vpack.c.bf16 %v4253_v52, %v4251_v57  ;;  %v4263_v4 = vld [vmem:[#allocation6 + $0x580] sm:$0xff]  ;;  %v4265_v59 = vld [vmem:[#allocation6 + $0x590] sm:$0xff] }
 0x4e8   : > { %4074 = vrot.lane.b32.xlu0 %v4073_v31, %s5715_s22  ;;  %v4081_v33 = vcombine.high %v4073_v31, %v4073_v31  ;;  %4080 = vst.msk [vmem:[#allocation5 + $0x7] sm:$0x1] %vm7876_vm6, %v4078_v60  ;;  %v5235_v31 = vpack.c.bf16 %v4242_v32, %v4240_v51  ;;  %v4239_v60 = vld [vmem:[#allocation6 + $0x4c0] sm:$0xff]  ;;  %v4266_v8 = vld [vmem:[#allocation6 + $0x598] sm:$0xff]  ;;  %v4268_v62 = vld [vmem:[#allocation6 + $0x5a8] sm:$0xff] }
 0x4e9   : > { %v5237_v21 = vpack.c.bf16 %v4241_v13, %v4239_v60  ;;  %v4270_v38 = vld [vmem:[#allocation6 + $0x5b8] sm:$0xff]  ;;  %v4267_v46 = vld [vmem:[#allocation6 + $0x5a0] sm:$0xff]  ;;  %v4269_v10 = vld [vmem:[#allocation6 + $0x5b0] sm:$0xff] }
 0x4ea   : > { %4082 = vrot.lane.b32.xlu1 %v4081_v33, %s5715_s22  ;;  %v5239_v33 = vpack.c.bf16 %v4246_v40, %v4244_v49  ;;  %v4272_v23 = vld [vmem:[#allocation6 + $0x5c8] sm:$0xff]  ;;  %v4274_v16 = vld [vmem:[#allocation6 + $0x5d8] sm:$0xff]  ;;  %v4271_v2 = vld [vmem:[#allocation6 + $0x5c0] sm:$0xff]  ;;  %v4375_v40 = vsub.s32 7, %v7868_v27 }
 0x4eb   : > { %v4273_v17 = vld [vmem:[#allocation6 + $0x5d0] sm:$0xff]  ;;  %v4276_v7 = vld [vmem:[#allocation6 + $0x5e8] sm:$0xff]  ;;  %v4278_v22 = vld [vmem:[#allocation6 + $0x5f8] sm:$0xff] }
 0x4ec   : > { %v4275_v15 = vld [vmem:[#allocation6 + $0x5e0] sm:$0xff]  ;;  %v4277_v26 = vld [vmem:[#allocation6 + $0x5f0] sm:$0xff]  ;;  %v4280_v51 = vld [vmem:[#allocation6 + $0x608] sm:$0xff] }
 0x4ed   : > { %v4282_v32 = vld [vmem:[#allocation6 + $0x618] sm:$0xff]  ;;  %v4279_v13 = vld [vmem:[#allocation6 + $0x600] sm:$0xff]  ;;  %v4281_v49 = vld [vmem:[#allocation6 + $0x610] sm:$0xff] }
 0x4ee   : > { %v5275_v60 = vpack.c.bf16 %v4282_v32, %v4280_v51  ;;  %v4292_v57 = vld [vmem:[#allocation6 + $0x668] sm:$0xff]  ;;  %v4294_v52 = vld [vmem:[#allocation6 + $0x678] sm:$0xff] }
 0x4ef   : > { %v4701_v51 = vld [vmem:[%s8125_s7 + $0x98] sm:$0xff] }
 0x54d   : > { %v3931_v54 = vpop.permute.xlu0 %3930 }
 0x54e   : > { %3936 = vst.msk [vmem:[#allocation5] sm:$0x1] %vm7920_vm9, %v3931_v54  ;;  %v4248_v54 = vld [vmem:[#allocation6 + $0x508] sm:$0xff] }
 0x54f   : > { %v3942_v35 = vpop.permute.xlu1 %3941 }
 0x550   : > { %3944 = vst.msk [vmem:[#allocation5 + $0x1] sm:$0x1] %vm7920_vm9, %v3942_v35  ;;  %v4250_v35 = vld [vmem:[#allocation6 + $0x518] sm:$0xff] }
 0x551   : > { %v3981_v58 = vpop.permute.xlu0 %3980 }
 0x552   : > { %3983 = vst.msk [vmem:[#allocation5 + $0x2] sm:$0x1] %vm7920_vm9, %v3981_v58  ;;  %v5241_v58 = vpack.c.bf16 %v4245_v12, %v4243_v61  ;;  %v5277_v61 = vpack.c.bf16 %v4281_v49, %v4279_v13  ;;  %v4702_v13 = vld [vmem:[%s8125_s7 + $0xa0] sm:$0xff]  ;;  %v4703_v49 = vld [vmem:[%s8125_s7 + $0xa8] sm:$0xff] }
 0x553   : > { %v3989_v47 = vpop.permute.xlu1 %3988 }
 0x554   : > { %3991 = vst.msk [vmem:[#allocation5 + $0x3] sm:$0x1] %vm7920_vm9, %v3989_v47  ;;  %v5243_v47 = vpack.c.bf16 %v4250_v35, %v4248_v54  ;;  %v4283_v35 = vld [vmem:[#allocation6 + $0x620] sm:$0xff] }
 0x555   : > { %v4028_v45 = vpop.permute.xlu0 %4027 }
 0x556   : > { %4030 = vst.msk [vmem:[#allocation5 + $0x4] sm:$0x1] %vm7920_vm9, %v4028_v45  ;;  %v4247_v45 = vld [vmem:[#allocation6 + $0x500] sm:$0xff] }
 0x557   : > { %v4036_v19 = vpop.permute.xlu1 %4035 }
 0x558   : > { %4038 = vst.msk [vmem:[#allocation5 + $0x5] sm:$0x1] %vm7920_vm9, %v4036_v19  ;;  %v4249_v19 = vld [vmem:[#allocation6 + $0x510] sm:$0xff] }
 0x55a   : > { %v4075_v24 = vpop.permute.xlu0 %4074 }
 0x55b   : > { %4077 = vst.msk [vmem:[#allocation5 + $0x6] sm:$0x1] %vm7920_vm9, %v4075_v24  ;;  %v4252_v24 = vld [vmem:[#allocation6 + $0x528] sm:$0xff] }
 0x55c   : > { %v4083_v36 = vpop.permute.xlu1 %4082 }
 0x55d   : > { %4085 = vst.msk [vmem:[#allocation5 + $0x7] sm:$0x1] %vm7920_vm9, %v4083_v36  ;;  %v4254_v36 = vld [vmem:[#allocation6 + $0x538] sm:$0xff] }
 0x564   : > { %v7945_v41 = vld [vmem:[#allocation5] sm:$0xff] }
 0x565   : > { %v4352_v48 = vrot.slane %v7945_v41, %v4351_v29  ;;  %v4360_v9 = vrot.slane %v7945_v41, %v4359_v43  ;;  %v4348_v28 = vrot.slane %v7945_v41, %v4347_v6  ;;  %v4356_v42 = vrot.slane %v7945_v41, %v4355_v53 }
 0x566   : > { %v4368_v11 = vrot.slane %v7945_v41, %v4367_v25  ;;  %v5245_v43 = vpack.c.bf16 %v4249_v19, %v4247_v45  ;;  %v5247_v53 = vpack.c.bf16 %v4254_v36, %v4252_v24  ;;  %v4256_v25 = vld [vmem:[#allocation6 + $0x548] sm:$0xff]  ;;  %v4290_v19 = vld [vmem:[#allocation6 + $0x658] sm:$0xff] }
 0x567   : > { %4460 = vmatprep.mubr.f32.mxu0 %v4352_v48  ;;  %4531 = vmatprep.mubr.f32.mxu1 %v4360_v9  ;;  %v4255_v48 = vld [vmem:[#allocation6 + $0x540] sm:$0xff]  ;;  %v4257_v9 = vld [vmem:[#allocation6 + $0x550] sm:$0xff]  ;;  %v4288_v45 = vld [vmem:[#allocation6 + $0x648] sm:$0xff] }
 0x568   : > { %4461 = vmatmul.mubr.f32.vlgmr.msra.gmra.mrb[30].mxu0 %v4348_v28  ;;  %4532 = vmatmul.mubr.f32.vlgmr.msra.gmra.mrb[0].mxu1 %v4356_v42  ;;  %v4260_v28 = vld [vmem:[#allocation6 + $0x568] sm:$0xff]  ;;  %v4262_v42 = vld [vmem:[#allocation6 + $0x578] sm:$0xff]  ;;  %v5283_v36 = vpack.c.bf16 %v4290_v19, %v4288_v45  ;;  %v4704_v19 = vld [vmem:[%s8125_s7 + $0xb0] sm:$0xff] }
 0x569   : > { %5214 = vmatpush1.bf16.msra.mxu1 %v5213_v56  ;;  %4602 = vmatprep.mubr.f32.mxu1 %v4368_v11  ;;  %v5251_v56 = vpack.c.bf16 %v4258_v55, %v4256_v25  ;;  %v5255_v18 = vpack.c.bf16 %v4262_v42, %v4260_v28  ;;  %v4261_v11 = vld [vmem:[#allocation6 + $0x570] sm:$0xff]  ;;  %v5287_v55 = vpack.c.bf16 %v4294_v52, %v4292_v57  ;;  %v4318_v45 = vld [vmem:[#allocation6 + $0x738] sm:$0xff] }
 0x56a   : > { %5216 = vmatprep.subr.bf16.mxu1 %v5215_v39  ;;  %v5253_v39 = vpack.c.bf16 %v4257_v9, %v4255_v48  ;;  %v4296_v48 = vld [vmem:[#allocation6 + $0x688] sm:$0xff]  ;;  %v4298_v9 = vld [vmem:[#allocation6 + $0x698] sm:$0xff] }
 0x56b   : > { %v5291_v42 = vpack.c.bf16 %v4298_v9, %v4296_v48  ;;  %v4322_v48 = vld [vmem:[#allocation6 + $0x758] sm:$0xff]  ;;  %v4706_v9 = vld [vmem:[%s8125_s7 + $0xc0] sm:$0xff] }
 0x56d   : > { %5218 = vmatpush1.bf16.msra.mxu1 %v5217_v3  ;;  %v5257_v3 = vpack.c.bf16 %v4261_v11, %v4259_v5  ;;  %v4300_v5 = vld [vmem:[#allocation6 + $0x6a8] sm:$0xff]  ;;  %v4302_v11 = vld [vmem:[#allocation6 + $0x6b8] sm:$0xff] }
 0x56e   : > { %5220 = vmatprep.subr.bf16.mxu1 %v5219_v50  ;;  %v5259_v50 = vpack.c.bf16 %v4266_v8, %v4264_v63  ;;  %v5295_v8 = vpack.c.bf16 %v4302_v11, %v4300_v5 }
 0x571   : > { %5222 = vmatpush1.bf16.msra.mxu1 %v5221_v34  ;;  %v5261_v34 = vpack.c.bf16 %v4265_v59, %v4263_v4  ;;  %v4304_v4 = vld [vmem:[#allocation6 + $0x6c8] sm:$0xff]  ;;  %v4306_v59 = vld [vmem:[#allocation6 + $0x6d8] sm:$0xff] }
 0x572   : > { %5224 = vmatprep.subr.bf16.mxu1 %v5223_v20  ;;  %v5263_v20 = vpack.c.bf16 %v4270_v38, %v4268_v62  ;;  %v5299_v38 = vpack.c.bf16 %v4306_v59, %v4304_v4  ;;  %v4326_v4 = vld [vmem:[#allocation6 + $0x778] sm:$0xff]  ;;  %v4708_v59 = vld [vmem:[%s8125_s7 + $0xd0] sm:$0xff] }
 0x575   : > { %5226 = vmatpush1.bf16.msra.mxu1 %v5225_v0  ;;  %v5265_v0 = vpack.c.bf16 %v4269_v10, %v4267_v46  ;;  %v4308_v46 = vld [vmem:[#allocation6 + $0x6e8] sm:$0xff]  ;;  %v4310_v10 = vld [vmem:[#allocation6 + $0x6f8] sm:$0xff] }
 0x576   : > { %5228 = vmatprep.subr.bf16.mxu1 %v5227_v44  ;;  %v5267_v44 = vpack.c.bf16 %v4274_v16, %v4272_v23  ;;  %v4307_v23 = vld [vmem:[#allocation6 + $0x6e0] sm:$0xff]  ;;  %v4309_v16 = vld [vmem:[#allocation6 + $0x6f0] sm:$0xff] }
 0x579   : > { %5230 = vmatpush1.bf16.msra.mxu1 %v5229_v14  ;;  %v5269_v14 = vpack.c.bf16 %v4273_v17, %v4271_v2  ;;  %v4314_v2 = vld [vmem:[#allocation6 + $0x718] sm:$0xff]  ;;  %v4698_v17 = vld [vmem:[%s8125_s7 + $0x80] sm:$0xff] }
 0x57a   : > { %5232 = vmatprep.subr.bf16.mxu1 %v5231_v1  ;;  %v5271_v1 = vpack.c.bf16 %v4278_v22, %v4276_v7  ;;  %v4699_v7 = vld [vmem:[%s8125_s7 + $0x88] sm:$0xff]  ;;  %v4682_v22 = vld [vmem:[%s8125_s7] sm:$0xff] }
 0x57d   : > { %5234 = vmatpush1.bf16.msra.mxu1 %v5233_v37  ;;  %v5273_v37 = vpack.c.bf16 %v4277_v26, %v4275_v15  ;;  %v4683_v15 = vld [vmem:[%s8125_s7 + $0x8] sm:$0xff]  ;;  %v4700_v26 = vld [vmem:[%s8125_s7 + $0x90] sm:$0xff] }
 0x57e   : > { %5236 = vmatprep.subr.bf16.mxu1 %v5235_v31  ;;  %v4363_v31 = vsub.s32 4, %v7868_v27  ;;  %v5341_v32 = vpack.c.bf16 %v4683_v15, %v4682_v22  ;;  %v4327_v15 = vld [vmem:[#allocation6 + $0x780] sm:$0xff] }
 0x580   : > { %v4364_v12 = vrot.slane %v7945_v41, %v4363_v31  ;;  %v4684_v31 = vld [vmem:[%s8125_s7 + $0x10] sm:$0xff] }
 0x581   : > { %5238 = vmatpush1.bf16.msra.mxu1 %v5237_v21  ;;  %v4284_v21 = vld [vmem:[#allocation6 + $0x628] sm:$0xff] }
 0x582   : > { %5240 = vmatprep.subr.bf16.mxu1 %v5239_v33  ;;  %v4286_v33 = vld [vmem:[#allocation6 + $0x638] sm:$0xff] }
 0x583   : > { %v5279_v54 = vpack.c.bf16 %v4286_v33, %v4284_v21  ;;  %v4311_v21 = vld [vmem:[#allocation6 + $0x700] sm:$0xff]  ;;  %v4313_v33 = vld [vmem:[#allocation6 + $0x710] sm:$0xff] }
 0x585   : > { %5242 = vmatpush1.bf16.msra.mxu1 %v5241_v58  ;;  %v4285_v58 = vld [vmem:[#allocation6 + $0x630] sm:$0xff] }
 0x586   : > { %5244 = vmatprep.subr.bf16.mxu1 %v5243_v47  ;;  %v4376_v47 = vrot.slane %v7945_v41, %v4375_v40  ;;  %v5281_v24 = vpack.c.bf16 %v4285_v58, %v4283_v35  ;;  %v5305_v40 = vpack.c.bf16 %v4309_v16, %v4307_v23  ;;  %v5347_v35 = vpack.c.bf16 %v4703_v49, %v4702_v13  ;;  %v4686_v58 = vld [vmem:[%s8125_s7 + $0x20] sm:$0xff]  ;;  %v4328_v23 = vld [vmem:[#allocation6 + $0x788] sm:$0xff]  ;;  %v4333_v49 = vld [vmem:[#allocation6 + $0x7b0] sm:$0xff] }
 0x587   : > { %v4331_v13 = vld [vmem:[#allocation6 + $0x7a0] sm:$0xff] }
 0x589   : > { %5246 = vmatpush1.bf16.msra.mxu1 %v5245_v43  ;;  %v4287_v43 = vld [vmem:[#allocation6 + $0x640] sm:$0xff] }
 0x58a   : > { %5248 = vmatprep.subr.bf16.mxu1 %v5247_v53  ;;  %v4289_v53 = vld [vmem:[#allocation6 + $0x650] sm:$0xff] }
 0x58b   : > { %v5285_v25 = vpack.c.bf16 %v4289_v53, %v4287_v43  ;;  %v4315_v43 = vld [vmem:[#allocation6 + $0x720] sm:$0xff]  ;;  %v4317_v53 = vld [vmem:[#allocation6 + $0x730] sm:$0xff] }
 0x58d   : > { %5250 = vmatpush1.bf16.msra.mxu1 %v5249_v30  ;;  %v4291_v30 = vld [vmem:[#allocation6 + $0x660] sm:$0xff] }
 0x58e   : > { %5252 = vmatprep.subr.bf16.mxu1 %v5251_v56  ;;  %v4293_v56 = vld [vmem:[#allocation6 + $0x670] sm:$0xff] }
 0x58f   : > { %v5289_v28 = vpack.c.bf16 %v4293_v56, %v4291_v30  ;;  %v4688_v30 = vld [vmem:[%s8125_s7 + $0x30] sm:$0xff]  ;;  %v4689_v56 = vld [vmem:[%s8125_s7 + $0x38] sm:$0xff] }
 0x590   : > { %v5353_v5 = vpack.c.bf16 %v4689_v56, %v4688_v30 }
 0x591   : > { %5254 = vmatpush1.bf16.msra.mxu1 %v5253_v39  ;;  %v4295_v39 = vld [vmem:[#allocation6 + $0x680] sm:$0xff] }
 0x592   : > { %5256 = vmatprep.subr.bf16.mxu1 %v5255_v18  ;;  %v4297_v18 = vld [vmem:[#allocation6 + $0x690] sm:$0xff] }
 0x593   : > { %v5293_v63 = vpack.c.bf16 %v4297_v18, %v4295_v39  ;;  %v4319_v39 = vld [vmem:[#allocation6 + $0x740] sm:$0xff]  ;;  %v4321_v18 = vld [vmem:[#allocation6 + $0x750] sm:$0xff] }
 0x595   : > { %5258 = vmatpush1.bf16.msra.mxu1 %v5257_v3  ;;  %v4299_v3 = vld [vmem:[#allocation6 + $0x6a0] sm:$0xff] }
 0x596   : > { %5260 = vmatprep.subr.bf16.mxu1 %v5259_v50  ;;  %v4301_v50 = vld [vmem:[#allocation6 + $0x6b0] sm:$0xff] }
 0x597   : > { %v5297_v62 = vpack.c.bf16 %v4301_v50, %v4299_v3  ;;  %v4690_v3 = vld [vmem:[%s8125_s7 + $0x40] sm:$0xff]  ;;  %v4691_v50 = vld [vmem:[%s8125_s7 + $0x48] sm:$0xff] }
 0x599   : > { %5262 = vmatpush1.bf16.msra.mxu1 %v5261_v34  ;;  %v4303_v34 = vld [vmem:[#allocation6 + $0x6c0] sm:$0xff] }
 0x59a   : > { %5264 = vmatprep.subr.bf16.mxu1 %v5263_v20  ;;  %v4305_v20 = vld [vmem:[#allocation6 + $0x6d0] sm:$0xff] }
 0x59d   : > { %5266 = vmatpush1.bf16.msra.mxu1 %v5265_v0  ;;  %v5301_v0 = vpack.c.bf16 %v4305_v20, %v4303_v34  ;;  %v4323_v34 = vld [vmem:[#allocation6 + $0x760] sm:$0xff]  ;;  %v4325_v20 = vld [vmem:[#allocation6 + $0x770] sm:$0xff] }
 0x59e   : > { %5268 = vmatprep.subr.bf16.mxu1 %v5267_v44  ;;  %v4312_v44 = vld [vmem:[#allocation6 + $0x708] sm:$0xff]  ;;  %v5321_v22 = vpack.c.bf16 %v4325_v20, %v4323_v34 }
 0x5a1   : > { %5270 = vmatpush1.bf16.msra.mxu1 %v5269_v14  ;;  %v5303_v14 = vpack.c.bf16 %v4310_v10, %v4308_v46  ;;  %v5357_v46 = vpack.c.bf16 %v4691_v50, %v4690_v3 }
 0x5a2   : > { %5272 = vmatprep.subr.bf16.mxu1 %v5271_v1  ;;  %v5339_v1 = vpack.c.bf16 %v4699_v7, %v4698_v17  ;;  %v4710_v17 = vld [vmem:[%s8125_s7 + $0xe0] sm:$0xff]  ;;  %v4711_v7 = vld [vmem:[%s8125_s7 + $0xe8] sm:$0xff] }
 0x5a4   : > { %5340 = vmatprep.subr.bf16.mxu0 %v5339_v1 }
 0x5a5   : > { %5274 = vmatpush1.bf16.msra.mxu1 %v5273_v37  ;;  %v5343_v37 = vpack.c.bf16 %v4701_v51, %v4700_v26  ;;  %5342 = vmatpush3.bf16.msra.mxu0 %v5341_v32  ;;  %v4329_v26 = vld [vmem:[#allocation6 + $0x790] sm:$0xff]  ;;  %v5363_v51 = vpack.c.bf16 %v4711_v7, %v4710_v17  ;;  %v4332_v32 = vld [vmem:[#allocation6 + $0x7a8] sm:$0xff] }
 0x5a6   : > { %5276 = vmatprep.subr.bf16.mxu1 %v5275_v60  ;;  %v4685_v60 = vld [vmem:[%s8125_s7 + $0x18] sm:$0xff] }
 0x5a7   : > { %5344 = vmatprep.subr.bf16.mxu0 %v5343_v37  ;;  %v4334_v37 = vld [vmem:[#allocation6 + $0x7b8] sm:$0xff] }
 0x5a8   : > { %4603 = vmatmul.mubr.f32.vlgmr.msra.gmra.mrb[0].mxu1 %v4364_v12  ;;  %v5307_v12 = vpack.c.bf16 %v4314_v2, %v4312_v44  ;;  %v4693_v44 = vld [vmem:[%s8125_s7 + $0x58] sm:$0xff] }
 0x5a9   : > { %5278 = vmatpush1.bf16.msra.mxu1 %v5277_v61  ;;  %4673 = vmatprep.mubr.f32.mxu1 %v4376_v47  ;;  %v5345_v61 = vpack.c.bf16 %v4685_v60, %v4684_v31  ;;  %v4687_v47 = vld [vmem:[%s8125_s7 + $0x28] sm:$0xff]  ;;  %v4330_v2 = vld [vmem:[#allocation6 + $0x798] sm:$0xff]  ;;  %v5325_v31 = vpack.c.bf16 %v4329_v26, %v4327_v15  ;;  %v5327_v60 = vpack.c.bf16 %v4334_v37, %v4332_v32 }
 0x5aa   : > { %5280 = vmatprep.subr.bf16.mxu1 %v5279_v54  ;;  %v4316_v54 = vld [vmem:[#allocation6 + $0x728] sm:$0xff]  ;;  %v5349_v57 = vpack.c.bf16 %v4687_v47, %v4686_v58  ;;  %v5323_v1 = vpack.c.bf16 %v4330_v2, %v4328_v23  ;;  %v4342_v58 = vld [vmem:[#allocation6 + $0x7f8] sm:$0xff] }
 0x5ab   : > { %5346 = vmatpush3.bf16.msra.mxu0 %v5345_v61  ;;  %v5311_v52 = vpack.c.bf16 %v4318_v45, %v4316_v54  ;;  %v4337_v54 = vld [vmem:[#allocation6 + $0x7d0] sm:$0xff] }
 0x5ac   : > { %5348 = vmatprep.subr.bf16.mxu0 %v5347_v35  ;;  %v4340_v35 = vld [vmem:[#allocation6 + $0x7e8] sm:$0xff] }
 0x5ad   : > { %5282 = vmatpush1.bf16.msra.mxu1 %v5281_v24  ;;  %v4705_v24 = vld [vmem:[%s8125_s7 + $0xb8] sm:$0xff]  ;;  %v5335_v45 = vpack.c.bf16 %v4342_v58, %v4340_v35 }
 0x5ae   : > { %5284 = vmatprep.subr.bf16.mxu1 %v5283_v36  ;;  %v5309_v36 = vpack.c.bf16 %v4313_v33, %v4311_v21  ;;  %v4338_v21 = vld [vmem:[#allocation6 + $0x7d8] sm:$0xff]  ;;  %v5329_v33 = vpack.c.bf16 %v4333_v49, %v4331_v13 }
 0x5af   : > { %5350 = vmatpush3.bf16.msra.mxu0 %v5349_v57  ;;  %v4343_v57 = vld [vmem:[%s8124_s6] sm:$0x3] }
 0x5b1   : > { %5286 = vmatpush1.bf16.msra.mxu1 %v5285_v25  ;;  %v4320_v25 = vld [vmem:[#allocation6 + $0x748] sm:$0xff] }
 0x5b2   : > { %5288 = vmatprep.subr.bf16.mxu1 %v5287_v55  ;;  %v5351_v55 = vpack.c.bf16 %v4705_v24, %v4704_v19  ;;  %v5315_v11 = vpack.c.bf16 %v4322_v48, %v4320_v25  ;;  %v4339_v19 = vld [vmem:[#allocation6 + $0x7e0] sm:$0xff]  ;;  %v4341_v24 = vld [vmem:[#allocation6 + $0x7f0] sm:$0xff] }
 0x5b3   : > { %v4694_v25 = vld [vmem:[%s8125_s7 + $0x60] sm:$0xff] }
 0x5b4   : > { %5352 = vmatprep.subr.bf16.mxu0 %v5351_v55  ;;  %v4695_v55 = vld [vmem:[%s8125_s7 + $0x68] sm:$0xff] }
 0x5b5   : > { %5290 = vmatpush1.bf16.msra.mxu1 %v5289_v28  ;;  %v4707_v28 = vld [vmem:[%s8125_s7 + $0xc8] sm:$0xff]  ;;  %5354 = vmatpush3.bf16.msra.mxu0 %v5353_v5  ;;  %v5365_v56 = vpack.c.bf16 %v4695_v55, %v4694_v25  ;;  %v4393_v5 = vrot.slane %v4343_v57, %v4351_v29 }
 0x5b6   : > { %5292 = vmatprep.subr.bf16.mxu1 %v5291_v42  ;;  %v5313_v42 = vpack.c.bf16 %v4317_v53, %v4315_v43  ;;  %v4371_v43 = vsub.s32 6, %v7868_v27 }
 0x5b8   : > { %v4372_v53 = vrot.slane %v7945_v41, %v4371_v43 }
 0x5b9   : > { %5294 = vmatpush1.bf16.msra.mxu1 %v5293_v63  ;;  %v4324_v63 = vld [vmem:[#allocation6 + $0x768] sm:$0xff] }
 0x5ba   : > { %5296 = vmatprep.subr.bf16.mxu1 %v5295_v8  ;;  %v5355_v8 = vpack.c.bf16 %v4707_v28, %v4706_v9  ;;  %v5319_v10 = vpack.c.bf16 %v4326_v4, %v4324_v63  ;;  %v4712_v9 = vld [vmem:[%s8125_s7 + $0xf0] sm:$0xff] }
 0x5bc   : > { %5356 = vmatprep.subr.bf16.mxu0 %v5355_v8 }
 0x5bd   : > { %5298 = vmatpush1.bf16.msra.mxu1 %v5297_v62  ;;  %v4709_v62 = vld [vmem:[%s8125_s7 + $0xd8] sm:$0xff]  ;;  %5358 = vmatpush3.bf16.msra.mxu0 %v5357_v46 }
 0x5be   : > { %5300 = vmatprep.subr.bf16.mxu1 %v5299_v38  ;;  %v5317_v38 = vpack.c.bf16 %v4321_v18, %v4319_v39  ;;  %v5359_v16 = vpack.c.bf16 %v4709_v62, %v4708_v59  ;;  %v4697_v39 = vld [vmem:[%s8125_s7 + $0x78] sm:$0xff] }
 0x5c0   : > { %5360 = vmatprep.subr.bf16.mxu0 %v5359_v16 }
 0x5c1   : > { %5302 = vmatpush1.bf16.msra.mxu1 %v5301_v0  ;;  %v4692_v0 = vld [vmem:[%s8125_s7 + $0x50] sm:$0xff] }
 0x5c2   : > { %5304 = vmatprep.subr.bf16.mxu1 %v5303_v14  ;;  %v5361_v14 = vpack.c.bf16 %v4693_v44, %v4692_v0 }
 0x5c4   : > { %5362 = vmatpush3.bf16.msra.mxu0 %v5361_v14 }
 0x5c5   : > { %5306 = vmatpush1.bf16.msra.mxu1 %v5305_v40  ;;  %5364 = vmatprep.subr.bf16.mxu0 %v5363_v51  ;;  %v4336_v40 = vld [vmem:[#allocation6 + $0x7c8] sm:$0xff] }
 0x5c6   : > { %5308 = vmatprep.subr.bf16.mxu1 %v5307_v12  ;;  %v5331_v61 = vpack.c.bf16 %v4338_v21, %v4336_v40  ;;  %v4335_v12 = vld [vmem:[#allocation6 + $0x7c0] sm:$0xff] }
 0x5c7   : > { %v5333_v47 = vpack.c.bf16 %v4337_v54, %v4335_v12 }
 0x5c8   : > { %5366 = vmatpush3.bf16.msra.mxu0 %v5365_v56 }
 0x5c9   : > { %5310 = vmatpush1.bf16.msra.mxu1 %v5309_v36  ;;  %v5337_v36 = vpack.c.bf16 %v4341_v24, %v4339_v19 }
 0x5ca   : > { %5312 = vmatprep.subr.bf16.mxu1 %v5311_v52  ;;  %v4389_v52 = vrot.slane %v4343_v57, %v4347_v6  ;;  %v4713_v6 = vld [vmem:[%s8125_s7 + $0xf8] sm:$0xff] }
 0x5cb   : > { %v5367_v28 = vpack.c.bf16 %v4713_v6, %v4712_v9 }
 0x5cd   : > { %5314 = vmatpush1.bf16.msra.mxu1 %v5313_v42  ;;  %v4696_v42 = vld [vmem:[%s8125_s7 + $0x70] sm:$0xff]  ;;  %5368 = vmatprep.subr.bf16.mxu0 %v5367_v28 }
 0x5ce   : > { %5316 = vmatprep.subr.bf16.mxu1 %v5315_v11  ;;  %v5369_v18 = vpack.c.bf16 %v4697_v39, %v4696_v42 }
 0x5d0   : > { %5370 = vmatpush3.bf16.msra.mxu0 %v5369_v18 }
 0x5d1   : > { %5318 = vmatpush1.bf16.msra.mxu1 %v5317_v38  ;;  %v4714_v38 = vld [vmem:[%s8126_s8] sm:$0x1] }
 0x5d2   : > { %5320 = vmatprep.subr.bf16.mxu1 %v5319_v10 }
 0x5d5   : > { %5322 = vmatpush1.bf16.msra.mxu1 %v5321_v22 }
 0x5d6   : > { %5324 = vmatprep.subr.bf16.mxu1 %v5323_v1 }
 0x5d9   : > { %5326 = vmatpush1.bf16.msra.mxu1 %v5325_v31 }
 0x5da   : > { %5328 = vmatprep.subr.bf16.mxu1 %v5327_v60 }
 0x5dd   : > { %5330 = vmatpush1.bf16.msra.mxu1 %v5329_v33 }
 0x5de   : > { %5332 = vmatprep.subr.bf16.mxu1 %v5331_v61 }
 0x5e1   : > { %5334 = vmatpush1.bf16.msra.mxu1 %v5333_v47 }
 0x5e2   : > { %5336 = vmatprep.subr.bf16.mxu1 %v5335_v45 }
 0x5e5   : > { %5338 = vmatpush1.bf16.msra.mxu1 %v5337_v36 }
 0x5e8   : > { %4674 = vmatmul.mubr.f32.vlgmr.msra.gmra.mrb[0].mxu1 %v4372_v53 }
 0x63b   : > { %v4462_v30 = vpop.f32.mrb[30].mxu0 }
 0x63c   : > { %v4463_v48 = vadd.f32 %v4462_v30, %v4389_v52  ;;  %v4464_v41 = vpop.f32.mrb[31].mxu0 }
 0x63d   : > { %v4465_v11 = vadd.f32 %v4464_v41, %v4393_v5 }
 0x6bb   : > { %v4675_v63 = vpop.f32.mrb[0].mxu1 }
 0x6bc   : > { %v5372_v8 = vadd.f32 %v4675_v63, %v4463_v48  ;;  %v4677_v3 = vpop.f32.mrb[1].mxu1 }
 0x6bd   : > { %v5374_v50 = vadd.f32 %v4677_v3, %v4465_v11 }
 0x6be   : > { %v4680_v59 = vmax.f32 %v5372_v8, 0.0 }
 0x6bf   : > { %v4681_v4 = vmax.f32 %v5374_v50, 0.0 }
 0x6c1   : > { %4779 = vmatprep.mubr.f32.mxu0 %v4681_v4 }
 0x6c2   : > { %4780 = vmatmul.mubr.f32.vlgmr.msra.gmra.mrb[32].mxu0 %v4680_v59 }
 0x795   : > { %v5017_v62 = vpop.f32.mrb[32].mxu0 }
 0x796   : > { %v5018_v34 = vpop.f32.mrb[33].mxu0 }
 0x797   : > { %v5019_v20 = vadd.f32 %v5018_v34, %v5017_v62 }
 0x799   : > { %v4782_v27 = vadd.f32 %v5019_v20, %v4714_v38 }
 0x79b   : > { %v4786_v29 = vsel %vm4785_vm10, %v4782_v27, -inf }
 0x79c   : > { %4787 = vmax.xlane.f32.xlu0 %v4786_v29 }
 0x829   : > { %v4788_v46 = vpop.xlane.xlu0 %4787 }
 0x82a   : > { %v4789_v10 = vsub.f32 %v4782_v27, %v4788_v46 }
 0x82c   : > { %v4790_v23 = vmul.f32 1.442695, %v4789_v10 }
 0x82e   : > { %5590 = vpow2.f32 %v4790_v23 }
 0x838   : > { %v5591_v16 = vpop.eup %5590 }
 0x839   : > { %v4792_v0 = vsel %vm4785_vm10, %v5591_v16, 0.0 }
 0x83a   : > { %4793 = vadd.xlane.f32.xlu1 %v4792_v0 }
 0x8c7   : > { %v4794_v44 = vpop.xlane.xlu1 %4793 }
 0x8c8   : > { %5592 = vrcp.f32 %v4794_v44 }
 0x8d2   : > { %v5593_v2 = vpop.eup %5592 }
 0x8d3   : > { %v4796_v17 = vmul.f32 %v5593_v2, %v5591_v16 }
 0x8d5   : > { %4797 = vst.msk [vmem:[%s339_s24] sm:$0x1] %vm4785_vm10, %v4796_v17 }
 0x8d6   : > { %5655 = shalt.err (!%p5652_p7)
}
 0x8d7   : > { %s5656_s25 = scalar_lea.hbm %s8075_s29, 16  ;;  %s5660_s24 = scalar_lea.hbm %s8127_s9, 32 }
 0x8d8   : > { %p5657_p8 = scmp.ne.s32.totalorder %s8075_s29, %s5656_s25  ;;  %p5661_p1 = scmp.lt.u32.totalorder %s8075_s29, %s8127_s9 }
 0x8d9   : > { %p5662_p0 = scmp.lt.u32.totalorder %s5660_s24, %s5656_s25  ;;  %p5664_p6 = scmp.lt.u32.totalorder %s5656_s25, %s8075_s29 }
 0x8da   : > { %p5658_p11 = pnand %p5657_p8, %p8384_p9 }
 0x8db   : > { %p5663_p5 = por %p5662_p0, %p5661_p1 }
 0x8dc   : > { %p5659_p13 = pneg %p5658_p11 }
 0x8dd   : > { %p5665_p10 = por %p5664_p6, %p5663_p5 }
 0x8df   : > { %p5666_p12 = pnand %p5665_p10, %p5659_p13 }
 0x8e1   : > { %5669 = shalt.err (!%p5666_p12)
}
 0x8e2   : > { %5384 = dma.vmem_to_hbm [thread:$0]  (%p8384_p9), %s8077_s28, 16, %s8075_s29, %s4799_s14  }
 0x8e3 PF: > { %p5396_p2 = scmp.ge.s32.totalorder %s5708_s12, 2  ;;  %s4823_s21 = sand.u32 1, %s5696_s30  }
 0x8e4   : > { %p8385_p3 = scmp.ne.s32.totalorder %s8133_s20, 0  ;;  %s4824_s13 = scalar_lea.sflag [#allocation8], %s4823_s21 }
 0x8e6   : > { %p5391_p4 = pnand %p5396_p2, %p8385_p3 }
 0x8e8   : > { %5691 = dma.done.wait (!%p5391_p4), %s4824_s13, 16  }
 0x8e9   : > { %5693 = vsyncadd (!%p5391_p4), %s4824_s13, 4294967280  ;;  %p20_p7 = scmp.ge.s32.totalorder %s5795_s15, 4   ;;  %s8386_s30 = smov %s5700_s10 }
 0x8ea   : > { %s8387_s10 = smov %s5704_s11  ;;  %s8388_s11 = smov %s5806_s18 }
 0x8eb   : > { %s8389_s12 = smov %s5795_s15  ;;  %22 = sbr.rel (!%p20_p7) target bundleno = 4 (0x4), region = 142 }
 0x8f2   :  { %4828 = vsyncpa [#allocation7], 1 }
 0x8f3   :  { %4830 = vsyncpa [#allocation7 + $0x1], 1 }
 0x8f4   :  { %4831 = vsyncpa [#allocation8], 1 }
 0x8f5   :  { %4833 = vsyncpa [#allocation8 + $0x1], 1 }

</bundles_post_ra>
